<compile_context>
chip_gen: v5e
topology: v5e:2x2
jax: 0.10.0
libtpu: 0.0.40
codegen_flags: <defaults>
</compile_context>

<pallas_src>
import functools

import jax
import jax.numpy as jnp
from jax import lax
from jax.experimental import pallas as pl
from jax.experimental.pallas import tpu as pltpu


# --------------------------------------------------------------------------------------
# Fused Pallas kernel: conv3x3 + bias + ReLU + BN(eval) + conv3x3 + bias + ReLU
# --------------------------------------------------------------------------------------
def _diff_kernel(x_ref, w1_ref, b1_ref, s_ref, t_ref, w2_ref, b2_ref,
                 o_ref, hpad_ref, *, H, W):
    """One batch element, NHWC (channels on lanes) in, (Cout, H*W) out."""
    x = x_ref[0]                          # (H+2, W+2, Cin)   bf16, conv1 halo pre-padded
    w1 = w1_ref[...]                      # (3, 3, Cin, Cmid) bf16
    w2 = w2_ref[...]                      # (3, 3, Cmid, Cout) bf16
    b1 = b1_ref[0]                        # (1, Cmid) f32
    b2 = b2_ref[0]                        # (1, Cout) f32
    s = s_ref[0]                          # (1, Cmid) f32  BN scale
    t = t_ref[0]                          # (1, Cmid) f32  BN shift
    Cin = x_ref.shape[-1]
    Cmid = w1_ref.shape[-1]
    Cout = w2_ref.shape[-1]

    # conv1 (3x3, pad=1): 9 shifted bf16 matmuls on the MXU, f32 accumulation.
    acc = jnp.zeros((H * W, Cmid), jnp.float32)
    for ky in range(3):
        for kx in range(3):
            patch = x[ky:ky + H, kx:kx + W, :].reshape(H * W, Cin)
            acc = acc + jnp.dot(patch, w1[ky, kx],
                                preferred_element_type=jnp.float32)
    h = jnp.maximum(acc + b1, 0.0)                      # bias + ReLU
    y = h * s + t                                       # eval-mode BatchNorm, fused

    # Zero-padded intermediate (conv2 halo) kept in VMEM as a bf16 MXU operand.
    hpad_ref[...] = jnp.zeros_like(hpad_ref)
    hpad_ref[pl.ds(1, H), pl.ds(1, W), :] = y.reshape(H, W, Cmid).astype(hpad_ref.dtype)
    hp = hpad_ref[...]                                  # (H+2, W+2, Cmid)

    # conv2 (3x3, pad=1) + bias + ReLU.
    acc2 = jnp.zeros((H * W, Cout), jnp.float32)
    for ky in range(3):
        for kx in range(3):
            patch = hp[ky:ky + H, kx:kx + W, :].reshape(H * W, Cmid)
            acc2 = acc2 + jnp.dot(patch, w2[ky, kx],
                                  preferred_element_type=jnp.float32)
    out = jnp.maximum(acc2 + b2, 0.0)                   # (H*W, Cout) f32
    # Transpose on the XLU so the HBM store is lane-dense (last dim = H*W, mult. of 128).
    o_ref[0] = out.T                                    # (Cout, H*W)


@jax.jit
def diff_forward(params, x):
    """x: (B, Cin, H, W) f32 (PyTorch NCHW). Returns (B, Cout, H, W) f32."""
    B, Cin, H, W = x.shape
    w1_t, b1, bn, w2_t, b2 = (params["w1"], params["b1"], params["bn"],
                              params["w2"], params["b2"])
    Cmid = w1_t.shape[0]
    Cout = w2_t.shape[0]
    gamma, beta, mean, var = bn
    eps = 1e-5
    bn_scale = gamma * lax.rsqrt(var + eps)
    bn_shift = beta - mean * bn_scale

    # One-time layout work at the interface: NCHW -> NHWC (lane-dense channels), pre-pad
    # the conv1 halo, cast MXU operands to bf16 (accumulation stays f32 in-kernel).
    x_nhwc = jnp.transpose(x, (0, 2, 3, 1))
    x_pad = jnp.pad(x_nhwc, ((0, 0), (1, 1), (1, 1), (0, 0))).astype(jnp.bfloat16)
    w1 = jnp.transpose(w1_t, (2, 3, 1, 0)).astype(jnp.bfloat16)   # (3,3,Cin,Cmid)  HWIO
    w2 = jnp.transpose(w2_t, (2, 3, 1, 0)).astype(jnp.bfloat16)   # (3,3,Cmid,Cout) HWIO

    out = pl.pallas_call(
        functools.partial(_diff_kernel, H=H, W=W),
        out_shape=jax.ShapeDtypeStruct((B, Cout, H * W), jnp.float32),
        grid_spec=pltpu.PrefetchScalarGridSpec(
            num_scalar_prefetch=0,
            grid=(B,),
            in_specs=[
                pl.BlockSpec((1, H + 2, W + 2, Cin), lambda b: (b, 0, 0, 0)),
                pl.BlockSpec((3, 3, Cin, Cmid), lambda b: (0, 0, 0, 0)),
                pl.BlockSpec((1, 1, Cmid), lambda b: (0, 0, 0)),
                pl.BlockSpec((1, 1, Cmid), lambda b: (0, 0, 0)),
                pl.BlockSpec((1, 1, Cmid), lambda b: (0, 0, 0)),
                pl.BlockSpec((3, 3, Cmid, Cout), lambda b: (0, 0, 0, 0)),
                pl.BlockSpec((1, 1, Cout), lambda b: (0, 0, 0)),
            ],
            out_specs=pl.BlockSpec((1, Cout, H * W), lambda b: (b, 0, 0)),
            scratch_shapes=[pltpu.VMEM((H + 2, W + 2, Cmid), jnp.bfloat16)],
        ),
        compiler_params=pltpu.CompilerParams(dimension_semantics=("parallel",)),
    )(x_pad, w1,
      b1.reshape(1, 1, Cmid).astype(jnp.float32),
      bn_scale.reshape(1, 1, Cmid).astype(jnp.float32),
      bn_shift.reshape(1, 1, Cmid).astype(jnp.float32),
      w2,
      b2.reshape(1, 1, Cout).astype(jnp.float32))

    # (B, Cout, H*W) -> NCHW: a free reshape (no transpose pass needed).
    return out.reshape(B, Cout, H, W)


# --------------------------------------------------------------------------------------
# Pure-JAX f32 reference (PyTorch semantics) for a numerics check
# --------------------------------------------------------------------------------------
def diff_reference(params, x):
    dn = ("NCHW", "OIHW", "NCHW")
    y = lax.conv_general_dilated(x, params["w1"], (1, 1), ((1, 1), (1, 1)),
                                 dimension_numbers=dn)
    y = jnp.maximum(y + params["b1"][None, :, None, None], 0.0)
    gamma, beta, mean, var = params["bn"]
    y = (y - mean[None, :, None, None]) * lax.rsqrt(var[None, :, None, None] + 1e-5)
    y = y * gamma[None, :, None, None] + beta[None, :, None, None]
    y = lax.conv_general_dilated(y, params["w2"], (1, 1), ((1, 1), (1, 1)),
                                 dimension_numbers=dn)
    return jnp.maximum(y + params["b2"][None, :, None, None], 0.0)


def init_params(key, in_channels, out_channels):
    ks = jax.random.split(key, 8)
    f1 = (in_channels * 9) ** -0.5
    f2 = (out_channels * 9) ** -0.5
    return {
        "w1": f1 * jax.random.normal(ks[0], (out_channels, in_channels, 3, 3), jnp.float32),
        "b1": 0.05 * jax.random.normal(ks[1], (out_channels,), jnp.float32),
        "bn": (1.0 + 0.1 * jax.random.normal(ks[2], (out_channels,), jnp.float32),
               0.1 * jax.random.normal(ks[3], (out_channels,), jnp.float32),
               0.1 * jax.random.normal(ks[4], (out_channels,), jnp.float32),
               0.5 + jax.random.uniform(ks[5], (out_channels,), jnp.float32)),
        "w2": f2 * jax.random.normal(ks[6], (out_channels, out_channels, 3, 3), jnp.float32),
        "b2": 0.05 * jax.random.normal(ks[7], (out_channels,), jnp.float32),
    }


# --------------------------------------------------------------------------------------
if __name__ == "__main__":
    key = jax.random.PRNGKey(0)
    pkey, xkey = jax.random.split(key)

    # Diff(in_channels=64, out_channels=32) on 16x16 feature maps (as used in BIT).
    B, Cin, Cout, H, W = 2, 64, 32, 16, 16
    params = init_params(pkey, Cin, Cout)
    x = jax.random.normal(xkey, (B, Cin, H, W), jnp.float32)

    out = jax.block_until_ready(diff_forward(params, x))
    assert out.shape == (B, Cout, H, W), out.shape
    assert bool(jnp.all(jnp.isfinite(out)))

    # Numerics check vs. f32 reference (bf16 MXU operands -> loose tolerance).
    ref = jax.block_until_ready(diff_reference(params, x))
    max_err = float(jnp.max(jnp.abs(out - ref)))
    tol = 0.05 * float(jnp.max(jnp.abs(ref))) + 0.05
    assert max_err < tol, (max_err, tol)

    print("KERNEL_OK")
</pallas_src>

<mosaic_0001>
module attributes {stable_mosaic.version = 11 : i64} {
  func.func @_diff_kernel(%arg0: i32, %arg1: memref<1x18x18x64xbf16, #tpu.memory_space<vmem>>, %arg2: memref<3x3x64x32xbf16, #tpu.memory_space<vmem>>, %arg3: memref<1x1x32xf32, #tpu.memory_space<vmem>>, %arg4: memref<1x1x32xf32, #tpu.memory_space<vmem>>, %arg5: memref<1x1x32xf32, #tpu.memory_space<vmem>>, %arg6: memref<3x3x32x32xbf16, #tpu.memory_space<vmem>>, %arg7: memref<1x1x32xf32, #tpu.memory_space<vmem>>, %arg8: memref<1x32x256xf32, #tpu.memory_space<vmem>>, %arg9: memref<18x18x32xbf16, #tpu.memory_space<vmem>>) attributes {dimension_semantics = [#tpu.dimension_semantics<parallel>], iteration_bounds = array<i64: 2>, scalar_prefetch = 0 : i64, scratch_operands = 1 : i64, tpu.core_type = #tpu.core_type<tc>, window_params = [{transform_indices = @transform_0, window_bounds = array<i64: 1, 18, 18, 64>}, {pipeline_mode = #tpu.pipeline_mode<synchronous>, transform_indices = @transform_1, window_bounds = array<i64: 3, 3, 64, 32>}, {pipeline_mode = #tpu.pipeline_mode<synchronous>, transform_indices = @transform_2, window_bounds = array<i64: 1, 1, 32>}, {pipeline_mode = #tpu.pipeline_mode<synchronous>, transform_indices = @transform_3, window_bounds = array<i64: 1, 1, 32>}, {pipeline_mode = #tpu.pipeline_mode<synchronous>, transform_indices = @transform_4, window_bounds = array<i64: 1, 1, 32>}, {pipeline_mode = #tpu.pipeline_mode<synchronous>, transform_indices = @transform_5, window_bounds = array<i64: 3, 3, 32, 32>}, {pipeline_mode = #tpu.pipeline_mode<synchronous>, transform_indices = @transform_6, window_bounds = array<i64: 1, 1, 32>}, {transform_indices = @transform_7, window_bounds = array<i64: 1, 32, 256>}]} {
    %c0 = arith.constant 0 : index
    %c0_0 = arith.constant 0 : index
    %c0_1 = arith.constant 0 : index
    %c0_2 = arith.constant 0 : index
    %0 = vector.load %arg1[%c0, %c0_0, %c0_1, %c0_2] : memref<1x18x18x64xbf16, #tpu.memory_space<vmem>>, vector<1x18x18x64xbf16>
    %1 = vector.shape_cast %0 : vector<1x18x18x64xbf16> to vector<18x18x64xbf16>
    %c0_3 = arith.constant 0 : index
    %c0_4 = arith.constant 0 : index
    %c0_5 = arith.constant 0 : index
    %c0_6 = arith.constant 0 : index
    %2 = vector.load %arg2[%c0_3, %c0_4, %c0_5, %c0_6] : memref<3x3x64x32xbf16, #tpu.memory_space<vmem>>, vector<3x3x64x32xbf16>
    %c0_7 = arith.constant 0 : index
    %c0_8 = arith.constant 0 : index
    %c0_9 = arith.constant 0 : index
    %c0_10 = arith.constant 0 : index
    %3 = vector.load %arg6[%c0_7, %c0_8, %c0_9, %c0_10] : memref<3x3x32x32xbf16, #tpu.memory_space<vmem>>, vector<3x3x32x32xbf16>
    %c0_11 = arith.constant 0 : index
    %c0_12 = arith.constant 0 : index
    %c0_13 = arith.constant 0 : index
    %4 = vector.load %arg3[%c0_11, %c0_12, %c0_13] : memref<1x1x32xf32, #tpu.memory_space<vmem>>, vector<1x1x32xf32>
    %5 = vector.shape_cast %4 : vector<1x1x32xf32> to vector<1x32xf32>
    %c0_14 = arith.constant 0 : index
    %c0_15 = arith.constant 0 : index
    %c0_16 = arith.constant 0 : index
    %6 = vector.load %arg7[%c0_14, %c0_15, %c0_16] : memref<1x1x32xf32, #tpu.memory_space<vmem>>, vector<1x1x32xf32>
    %7 = vector.shape_cast %6 : vector<1x1x32xf32> to vector<1x32xf32>
    %c0_17 = arith.constant 0 : index
    %c0_18 = arith.constant 0 : index
    %c0_19 = arith.constant 0 : index
    %8 = vector.load %arg4[%c0_17, %c0_18, %c0_19] : memref<1x1x32xf32, #tpu.memory_space<vmem>>, vector<1x1x32xf32>
    %9 = vector.shape_cast %8 : vector<1x1x32xf32> to vector<1x32xf32>
    %c0_20 = arith.constant 0 : index
    %c0_21 = arith.constant 0 : index
    %c0_22 = arith.constant 0 : index
    %10 = vector.load %arg5[%c0_20, %c0_21, %c0_22] : memref<1x1x32xf32, #tpu.memory_space<vmem>>, vector<1x1x32xf32>
    %11 = vector.shape_cast %10 : vector<1x1x32xf32> to vector<1x32xf32>
    %cst = arith.constant 0.000000e+00 : f32
    %12 = vector.broadcast %cst : f32 to vector<256x32xf32>
    %13 = vector.extract_strided_slice %1 {offsets = [0, 0, 0], sizes = [16, 16, 64], strides = [1, 1, 1]} : vector<18x18x64xbf16> to vector<16x16x64xbf16>
    %14 = vector.shape_cast %13 : vector<16x16x64xbf16> to vector<256x64xbf16>
    %15 = vector.extract_strided_slice %2 {offsets = [0, 0, 0, 0], sizes = [1, 1, 64, 32], strides = [1, 1, 1, 1]} : vector<3x3x64x32xbf16> to vector<1x1x64x32xbf16>
    %16 = vector.shape_cast %15 : vector<1x1x64x32xbf16> to vector<64x32xbf16>
    %cst_23 = arith.constant dense<0.000000e+00> : vector<256x32xf32>
    %17 = tpu.matmul %14, %16, %cst_23 {dimension_numbers = #tpu.dot_dimension_numbers<[1], [0], [0], [1], [0, 0, 1, 1], [], []>} : vector<256x64xbf16>, vector<64x32xbf16>, vector<256x32xf32> -> vector<256x32xf32>
    %18 = arith.addf %12, %17 : vector<256x32xf32>
    %19 = vector.extract_strided_slice %1 {offsets = [0, 1, 0], sizes = [16, 16, 64], strides = [1, 1, 1]} : vector<18x18x64xbf16> to vector<16x16x64xbf16>
    %20 = vector.shape_cast %19 : vector<16x16x64xbf16> to vector<256x64xbf16>
    %21 = vector.extract_strided_slice %2 {offsets = [0, 1, 0, 0], sizes = [1, 1, 64, 32], strides = [1, 1, 1, 1]} : vector<3x3x64x32xbf16> to vector<1x1x64x32xbf16>
    %22 = vector.shape_cast %21 : vector<1x1x64x32xbf16> to vector<64x32xbf16>
    %cst_24 = arith.constant dense<0.000000e+00> : vector<256x32xf32>
    %23 = tpu.matmul %20, %22, %cst_24 {dimension_numbers = #tpu.dot_dimension_numbers<[1], [0], [0], [1], [0, 0, 1, 1], [], []>} : vector<256x64xbf16>, vector<64x32xbf16>, vector<256x32xf32> -> vector<256x32xf32>
    %24 = arith.addf %18, %23 : vector<256x32xf32>
    %25 = vector.extract_strided_slice %1 {offsets = [0, 2, 0], sizes = [16, 16, 64], strides = [1, 1, 1]} : vector<18x18x64xbf16> to vector<16x16x64xbf16>
    %26 = vector.shape_cast %25 : vector<16x16x64xbf16> to vector<256x64xbf16>
    %27 = vector.extract_strided_slice %2 {offsets = [0, 2, 0, 0], sizes = [1, 1, 64, 32], strides = [1, 1, 1, 1]} : vector<3x3x64x32xbf16> to vector<1x1x64x32xbf16>
    %28 = vector.shape_cast %27 : vector<1x1x64x32xbf16> to vector<64x32xbf16>
    %cst_25 = arith.constant dense<0.000000e+00> : vector<256x32xf32>
    %29 = tpu.matmul %26, %28, %cst_25 {dimension_numbers = #tpu.dot_dimension_numbers<[1], [0], [0], [1], [0, 0, 1, 1], [], []>} : vector<256x64xbf16>, vector<64x32xbf16>, vector<256x32xf32> -> vector<256x32xf32>
    %30 = arith.addf %24, %29 : vector<256x32xf32>
    %31 = vector.extract_strided_slice %1 {offsets = [1, 0, 0], sizes = [16, 16, 64], strides = [1, 1, 1]} : vector<18x18x64xbf16> to vector<16x16x64xbf16>
    %32 = vector.shape_cast %31 : vector<16x16x64xbf16> to vector<256x64xbf16>
    %33 = vector.extract_strided_slice %2 {offsets = [1, 0, 0, 0], sizes = [1, 1, 64, 32], strides = [1, 1, 1, 1]} : vector<3x3x64x32xbf16> to vector<1x1x64x32xbf16>
    %34 = vector.shape_cast %33 : vector<1x1x64x32xbf16> to vector<64x32xbf16>
    %cst_26 = arith.constant dense<0.000000e+00> : vector<256x32xf32>
    %35 = tpu.matmul %32, %34, %cst_26 {dimension_numbers = #tpu.dot_dimension_numbers<[1], [0], [0], [1], [0, 0, 1, 1], [], []>} : vector<256x64xbf16>, vector<64x32xbf16>, vector<256x32xf32> -> vector<256x32xf32>
    %36 = arith.addf %30, %35 : vector<256x32xf32>
    %37 = vector.extract_strided_slice %1 {offsets = [1, 1, 0], sizes = [16, 16, 64], strides = [1, 1, 1]} : vector<18x18x64xbf16> to vector<16x16x64xbf16>
    %38 = vector.shape_cast %37 : vector<16x16x64xbf16> to vector<256x64xbf16>
    %39 = vector.extract_strided_slice %2 {offsets = [1, 1, 0, 0], sizes = [1, 1, 64, 32], strides = [1, 1, 1, 1]} : vector<3x3x64x32xbf16> to vector<1x1x64x32xbf16>
    %40 = vector.shape_cast %39 : vector<1x1x64x32xbf16> to vector<64x32xbf16>
    %cst_27 = arith.constant dense<0.000000e+00> : vector<256x32xf32>
    %41 = tpu.matmul %38, %40, %cst_27 {dimension_numbers = #tpu.dot_dimension_numbers<[1], [0], [0], [1], [0, 0, 1, 1], [], []>} : vector<256x64xbf16>, vector<64x32xbf16>, vector<256x32xf32> -> vector<256x32xf32>
    %42 = arith.addf %36, %41 : vector<256x32xf32>
    %43 = vector.extract_strided_slice %1 {offsets = [1, 2, 0], sizes = [16, 16, 64], strides = [1, 1, 1]} : vector<18x18x64xbf16> to vector<16x16x64xbf16>
    %44 = vector.shape_cast %43 : vector<16x16x64xbf16> to vector<256x64xbf16>
    %45 = vector.extract_strided_slice %2 {offsets = [1, 2, 0, 0], sizes = [1, 1, 64, 32], strides = [1, 1, 1, 1]} : vector<3x3x64x32xbf16> to vector<1x1x64x32xbf16>
    %46 = vector.shape_cast %45 : vector<1x1x64x32xbf16> to vector<64x32xbf16>
    %cst_28 = arith.constant dense<0.000000e+00> : vector<256x32xf32>
    %47 = tpu.matmul %44, %46, %cst_28 {dimension_numbers = #tpu.dot_dimension_numbers<[1], [0], [0], [1], [0, 0, 1, 1], [], []>} : vector<256x64xbf16>, vector<64x32xbf16>, vector<256x32xf32> -> vector<256x32xf32>
    %48 = arith.addf %42, %47 : vector<256x32xf32>
    %49 = vector.extract_strided_slice %1 {offsets = [2, 0, 0], sizes = [16, 16, 64], strides = [1, 1, 1]} : vector<18x18x64xbf16> to vector<16x16x64xbf16>
    %50 = vector.shape_cast %49 : vector<16x16x64xbf16> to vector<256x64xbf16>
    %51 = vector.extract_strided_slice %2 {offsets = [2, 0, 0, 0], sizes = [1, 1, 64, 32], strides = [1, 1, 1, 1]} : vector<3x3x64x32xbf16> to vector<1x1x64x32xbf16>
    %52 = vector.shape_cast %51 : vector<1x1x64x32xbf16> to vector<64x32xbf16>
    %cst_29 = arith.constant dense<0.000000e+00> : vector<256x32xf32>
    %53 = tpu.matmul %50, %52, %cst_29 {dimension_numbers = #tpu.dot_dimension_numbers<[1], [0], [0], [1], [0, 0, 1, 1], [], []>} : vector<256x64xbf16>, vector<64x32xbf16>, vector<256x32xf32> -> vector<256x32xf32>
    %54 = arith.addf %48, %53 : vector<256x32xf32>
    %55 = vector.extract_strided_slice %1 {offsets = [2, 1, 0], sizes = [16, 16, 64], strides = [1, 1, 1]} : vector<18x18x64xbf16> to vector<16x16x64xbf16>
    %56 = vector.shape_cast %55 : vector<16x16x64xbf16> to vector<256x64xbf16>
    %57 = vector.extract_strided_slice %2 {offsets = [2, 1, 0, 0], sizes = [1, 1, 64, 32], strides = [1, 1, 1, 1]} : vector<3x3x64x32xbf16> to vector<1x1x64x32xbf16>
    %58 = vector.shape_cast %57 : vector<1x1x64x32xbf16> to vector<64x32xbf16>
    %cst_30 = arith.constant dense<0.000000e+00> : vector<256x32xf32>
    %59 = tpu.matmul %56, %58, %cst_30 {dimension_numbers = #tpu.dot_dimension_numbers<[1], [0], [0], [1], [0, 0, 1, 1], [], []>} : vector<256x64xbf16>, vector<64x32xbf16>, vector<256x32xf32> -> vector<256x32xf32>
    %60 = arith.addf %54, %59 : vector<256x32xf32>
    %61 = vector.extract_strided_slice %1 {offsets = [2, 2, 0], sizes = [16, 16, 64], strides = [1, 1, 1]} : vector<18x18x64xbf16> to vector<16x16x64xbf16>
    %62 = vector.shape_cast %61 : vector<16x16x64xbf16> to vector<256x64xbf16>
    %63 = vector.extract_strided_slice %2 {offsets = [2, 2, 0, 0], sizes = [1, 1, 64, 32], strides = [1, 1, 1, 1]} : vector<3x3x64x32xbf16> to vector<1x1x64x32xbf16>
    %64 = vector.shape_cast %63 : vector<1x1x64x32xbf16> to vector<64x32xbf16>
    %cst_31 = arith.constant dense<0.000000e+00> : vector<256x32xf32>
    %65 = tpu.matmul %62, %64, %cst_31 {dimension_numbers = #tpu.dot_dimension_numbers<[1], [0], [0], [1], [0, 0, 1, 1], [], []>} : vector<256x64xbf16>, vector<64x32xbf16>, vector<256x32xf32> -> vector<256x32xf32>
    %66 = arith.addf %60, %65 : vector<256x32xf32>
    %67 = vector.broadcast %5 : vector<1x32xf32> to vector<256x32xf32>
    %68 = arith.addf %66, %67 : vector<256x32xf32>
    %cst_32 = arith.constant 0.000000e+00 : f32
    %69 = vector.broadcast %cst_32 : f32 to vector<256x32xf32>
    %70 = arith.maximumf %68, %69 : vector<256x32xf32>
    %71 = vector.broadcast %9 : vector<1x32xf32> to vector<256x32xf32>
    %72 = arith.mulf %70, %71 : vector<256x32xf32>
    %73 = vector.broadcast %11 : vector<1x32xf32> to vector<256x32xf32>
    %74 = arith.addf %72, %73 : vector<256x32xf32>
    %cst_33 = arith.constant 0.000000e+00 : bf16
    %75 = vector.broadcast %cst_33 : bf16 to vector<18x18x32xbf16>
    %c0_34 = arith.constant 0 : index
    %c0_35 = arith.constant 0 : index
    %c0_36 = arith.constant 0 : index
    %76 = vector.load %arg9[%c0_34, %c0_35, %c0_36] : memref<18x18x32xbf16, #tpu.memory_space<vmem>>, vector<18x18x32xbf16>
    tpu.vector_store %arg9[%c0_34, %c0_35, %c0_36], %75 {strides = array<i32>} : memref<18x18x32xbf16, #tpu.memory_space<vmem>>, vector<18x18x32xbf16>,
    %77 = vector.shape_cast %74 : vector<256x32xf32> to vector<16x16x32xf32>
    %78 = arith.truncf %77 : vector<16x16x32xf32> to vector<16x16x32xbf16>
    %c1 = arith.constant 1 : index
    %c1_37 = arith.constant 1 : index
    %c0_38 = arith.constant 0 : index
    %79 = vector.load %arg9[%c1, %c1_37, %c0_38] : memref<18x18x32xbf16, #tpu.memory_space<vmem>>, vector<16x16x32xbf16>
    tpu.vector_store %arg9[%c1, %c1_37, %c0_38], %78 {strides = array<i32>} : memref<18x18x32xbf16, #tpu.memory_space<vmem>>, vector<16x16x32xbf16>,
    %c0_39 = arith.constant 0 : index
    %c0_40 = arith.constant 0 : index
    %c0_41 = arith.constant 0 : index
    %80 = vector.load %arg9[%c0_39, %c0_40, %c0_41] : memref<18x18x32xbf16, #tpu.memory_space<vmem>>, vector<18x18x32xbf16>
    %cst_42 = arith.constant 0.000000e+00 : f32
    %81 = vector.broadcast %cst_42 : f32 to vector<256x32xf32>
    %82 = vector.extract_strided_slice %80 {offsets = [0, 0, 0], sizes = [16, 16, 32], strides = [1, 1, 1]} : vector<18x18x32xbf16> to vector<16x16x32xbf16>
    %83 = vector.shape_cast %82 : vector<16x16x32xbf16> to vector<256x32xbf16>
    %84 = vector.extract_strided_slice %3 {offsets = [0, 0, 0, 0], sizes = [1, 1, 32, 32], strides = [1, 1, 1, 1]} : vector<3x3x32x32xbf16> to vector<1x1x32x32xbf16>
    %85 = vector.shape_cast %84 : vector<1x1x32x32xbf16> to vector<32x32xbf16>
    %cst_43 = arith.constant dense<0.000000e+00> : vector<256x32xf32>
    %86 = tpu.matmul %83, %85, %cst_43 {dimension_numbers = #tpu.dot_dimension_numbers<[1], [0], [0], [1], [0, 0, 1, 1], [], []>} : vector<256x32xbf16>, vector<32x32xbf16>, vector<256x32xf32> -> vector<256x32xf32>
    %87 = arith.addf %81, %86 : vector<256x32xf32>
    %88 = vector.extract_strided_slice %80 {offsets = [0, 1, 0], sizes = [16, 16, 32], strides = [1, 1, 1]} : vector<18x18x32xbf16> to vector<16x16x32xbf16>
    %89 = vector.shape_cast %88 : vector<16x16x32xbf16> to vector<256x32xbf16>
    %90 = vector.extract_strided_slice %3 {offsets = [0, 1, 0, 0], sizes = [1, 1, 32, 32], strides = [1, 1, 1, 1]} : vector<3x3x32x32xbf16> to vector<1x1x32x32xbf16>
    %91 = vector.shape_cast %90 : vector<1x1x32x32xbf16> to vector<32x32xbf16>
    %cst_44 = arith.constant dense<0.000000e+00> : vector<256x32xf32>
    %92 = tpu.matmul %89, %91, %cst_44 {dimension_numbers = #tpu.dot_dimension_numbers<[1], [0], [0], [1], [0, 0, 1, 1], [], []>} : vector<256x32xbf16>, vector<32x32xbf16>, vector<256x32xf32> -> vector<256x32xf32>
    %93 = arith.addf %87, %92 : vector<256x32xf32>
    %94 = vector.extract_strided_slice %80 {offsets = [0, 2, 0], sizes = [16, 16, 32], strides = [1, 1, 1]} : vector<18x18x32xbf16> to vector<16x16x32xbf16>
    %95 = vector.shape_cast %94 : vector<16x16x32xbf16> to vector<256x32xbf16>
    %96 = vector.extract_strided_slice %3 {offsets = [0, 2, 0, 0], sizes = [1, 1, 32, 32], strides = [1, 1, 1, 1]} : vector<3x3x32x32xbf16> to vector<1x1x32x32xbf16>
    %97 = vector.shape_cast %96 : vector<1x1x32x32xbf16> to vector<32x32xbf16>
    %cst_45 = arith.constant dense<0.000000e+00> : vector<256x32xf32>
    %98 = tpu.matmul %95, %97, %cst_45 {dimension_numbers = #tpu.dot_dimension_numbers<[1], [0], [0], [1], [0, 0, 1, 1], [], []>} : vector<256x32xbf16>, vector<32x32xbf16>, vector<256x32xf32> -> vector<256x32xf32>
    %99 = arith.addf %93, %98 : vector<256x32xf32>
    %100 = vector.extract_strided_slice %80 {offsets = [1, 0, 0], sizes = [16, 16, 32], strides = [1, 1, 1]} : vector<18x18x32xbf16> to vector<16x16x32xbf16>
    %101 = vector.shape_cast %100 : vector<16x16x32xbf16> to vector<256x32xbf16>
    %102 = vector.extract_strided_slice %3 {offsets = [1, 0, 0, 0], sizes = [1, 1, 32, 32], strides = [1, 1, 1, 1]} : vector<3x3x32x32xbf16> to vector<1x1x32x32xbf16>
    %103 = vector.shape_cast %102 : vector<1x1x32x32xbf16> to vector<32x32xbf16>
    %cst_46 = arith.constant dense<0.000000e+00> : vector<256x32xf32>
    %104 = tpu.matmul %101, %103, %cst_46 {dimension_numbers = #tpu.dot_dimension_numbers<[1], [0], [0], [1], [0, 0, 1, 1], [], []>} : vector<256x32xbf16>, vector<32x32xbf16>, vector<256x32xf32> -> vector<256x32xf32>
    %105 = arith.addf %99, %104 : vector<256x32xf32>
    %106 = vector.extract_strided_slice %80 {offsets = [1, 1, 0], sizes = [16, 16, 32], strides = [1, 1, 1]} : vector<18x18x32xbf16> to vector<16x16x32xbf16>
    %107 = vector.shape_cast %106 : vector<16x16x32xbf16> to vector<256x32xbf16>
    %108 = vector.extract_strided_slice %3 {offsets = [1, 1, 0, 0], sizes = [1, 1, 32, 32], strides = [1, 1, 1, 1]} : vector<3x3x32x32xbf16> to vector<1x1x32x32xbf16>
    %109 = vector.shape_cast %108 : vector<1x1x32x32xbf16> to vector<32x32xbf16>
    %cst_47 = arith.constant dense<0.000000e+00> : vector<256x32xf32>
    %110 = tpu.matmul %107, %109, %cst_47 {dimension_numbers = #tpu.dot_dimension_numbers<[1], [0], [0], [1], [0, 0, 1, 1], [], []>} : vector<256x32xbf16>, vector<32x32xbf16>, vector<256x32xf32> -> vector<256x32xf32>
    %111 = arith.addf %105, %110 : vector<256x32xf32>
    %112 = vector.extract_strided_slice %80 {offsets = [1, 2, 0], sizes = [16, 16, 32], strides = [1, 1, 1]} : vector<18x18x32xbf16> to vector<16x16x32xbf16>
    %113 = vector.shape_cast %112 : vector<16x16x32xbf16> to vector<256x32xbf16>
    %114 = vector.extract_strided_slice %3 {offsets = [1, 2, 0, 0], sizes = [1, 1, 32, 32], strides = [1, 1, 1, 1]} : vector<3x3x32x32xbf16> to vector<1x1x32x32xbf16>
    %115 = vector.shape_cast %114 : vector<1x1x32x32xbf16> to vector<32x32xbf16>
    %cst_48 = arith.constant dense<0.000000e+00> : vector<256x32xf32>
    %116 = tpu.matmul %113, %115, %cst_48 {dimension_numbers = #tpu.dot_dimension_numbers<[1], [0], [0], [1], [0, 0, 1, 1], [], []>} : vector<256x32xbf16>, vector<32x32xbf16>, vector<256x32xf32> -> vector<256x32xf32>
    %117 = arith.addf %111, %116 : vector<256x32xf32>
    %118 = vector.extract_strided_slice %80 {offsets = [2, 0, 0], sizes = [16, 16, 32], strides = [1, 1, 1]} : vector<18x18x32xbf16> to vector<16x16x32xbf16>
    %119 = vector.shape_cast %118 : vector<16x16x32xbf16> to vector<256x32xbf16>
    %120 = vector.extract_strided_slice %3 {offsets = [2, 0, 0, 0], sizes = [1, 1, 32, 32], strides = [1, 1, 1, 1]} : vector<3x3x32x32xbf16> to vector<1x1x32x32xbf16>
    %121 = vector.shape_cast %120 : vector<1x1x32x32xbf16> to vector<32x32xbf16>
    %cst_49 = arith.constant dense<0.000000e+00> : vector<256x32xf32>
    %122 = tpu.matmul %119, %121, %cst_49 {dimension_numbers = #tpu.dot_dimension_numbers<[1], [0], [0], [1], [0, 0, 1, 1], [], []>} : vector<256x32xbf16>, vector<32x32xbf16>, vector<256x32xf32> -> vector<256x32xf32>
    %123 = arith.addf %117, %122 : vector<256x32xf32>
    %124 = vector.extract_strided_slice %80 {offsets = [2, 1, 0], sizes = [16, 16, 32], strides = [1, 1, 1]} : vector<18x18x32xbf16> to vector<16x16x32xbf16>
    %125 = vector.shape_cast %124 : vector<16x16x32xbf16> to vector<256x32xbf16>
    %126 = vector.extract_strided_slice %3 {offsets = [2, 1, 0, 0], sizes = [1, 1, 32, 32], strides = [1, 1, 1, 1]} : vector<3x3x32x32xbf16> to vector<1x1x32x32xbf16>
    %127 = vector.shape_cast %126 : vector<1x1x32x32xbf16> to vector<32x32xbf16>
    %cst_50 = arith.constant dense<0.000000e+00> : vector<256x32xf32>
    %128 = tpu.matmul %125, %127, %cst_50 {dimension_numbers = #tpu.dot_dimension_numbers<[1], [0], [0], [1], [0, 0, 1, 1], [], []>} : vector<256x32xbf16>, vector<32x32xbf16>, vector<256x32xf32> -> vector<256x32xf32>
    %129 = arith.addf %123, %128 : vector<256x32xf32>
    %130 = vector.extract_strided_slice %80 {offsets = [2, 2, 0], sizes = [16, 16, 32], strides = [1, 1, 1]} : vector<18x18x32xbf16> to vector<16x16x32xbf16>
    %131 = vector.shape_cast %130 : vector<16x16x32xbf16> to vector<256x32xbf16>
    %132 = vector.extract_strided_slice %3 {offsets = [2, 2, 0, 0], sizes = [1, 1, 32, 32], strides = [1, 1, 1, 1]} : vector<3x3x32x32xbf16> to vector<1x1x32x32xbf16>
    %133 = vector.shape_cast %132 : vector<1x1x32x32xbf16> to vector<32x32xbf16>
    %cst_51 = arith.constant dense<0.000000e+00> : vector<256x32xf32>
    %134 = tpu.matmul %131, %133, %cst_51 {dimension_numbers = #tpu.dot_dimension_numbers<[1], [0], [0], [1], [0, 0, 1, 1], [], []>} : vector<256x32xbf16>, vector<32x32xbf16>, vector<256x32xf32> -> vector<256x32xf32>
    %135 = arith.addf %129, %134 : vector<256x32xf32>
    %136 = vector.broadcast %7 : vector<1x32xf32> to vector<256x32xf32>
    %137 = arith.addf %135, %136 : vector<256x32xf32>
    %cst_52 = arith.constant 0.000000e+00 : f32
    %138 = vector.broadcast %cst_52 : f32 to vector<256x32xf32>
    %139 = arith.maximumf %137, %138 : vector<256x32xf32>
    %140 = tpu.transpose %139, [1, 0] : vector<256x32xf32> -> vector<32x256xf32>
    %c0_53 = arith.constant 0 : index
    %c0_54 = arith.constant 0 : index
    %c0_55 = arith.constant 0 : index
    %141 = vector.load %arg8[%c0_53, %c0_54, %c0_55] : memref<1x32x256xf32, #tpu.memory_space<vmem>>, vector<1x32x256xf32>
    %142 = vector.shape_cast %141 : vector<1x32x256xf32> to vector<32x256xf32>
    %143 = vector.shape_cast %140 : vector<32x256xf32> to vector<1x32x256xf32>
    tpu.vector_store %arg8[%c0_53, %c0_54, %c0_55], %143 {strides = array<i32>} : memref<1x32x256xf32, #tpu.memory_space<vmem>>, vector<1x32x256xf32>,
    return
  }
  func.func @transform_0(%arg0: i32) -> (i32, i32, i32, i32) {
    %c0_i32 = arith.constant 0 : i32
    %c0_i32_0 = arith.constant 0 : i32
    %c0_i32_1 = arith.constant 0 : i32
    %c0_i32_2 = arith.constant 0 : i32
    return %arg0, %c0_i32, %c0_i32_0, %c0_i32_1 : i32, i32, i32, i32
  }
  func.func @transform_1(%arg0: i32) -> (i32, i32, i32, i32) {
    %c0_i32 = arith.constant 0 : i32
    %c0_i32_0 = arith.constant 0 : i32
    %c0_i32_1 = arith.constant 0 : i32
    %c0_i32_2 = arith.constant 0 : i32
    %c0_i32_3 = arith.constant 0 : i32
    return %c0_i32, %c0_i32_0, %c0_i32_1, %c0_i32_2 : i32, i32, i32, i32
  }
  func.func @transform_2(%arg0: i32) -> (i32, i32, i32) {
    %c0_i32 = arith.constant 0 : i32
    %c0_i32_0 = arith.constant 0 : i32
    %c0_i32_1 = arith.constant 0 : i32
    %c0_i32_2 = arith.constant 0 : i32
    return %c0_i32, %c0_i32_0, %c0_i32_1 : i32, i32, i32
  }
  func.func @transform_3(%arg0: i32) -> (i32, i32, i32) {
    %c0_i32 = arith.constant 0 : i32
    %c0_i32_0 = arith.constant 0 : i32
    %c0_i32_1 = arith.constant 0 : i32
    %c0_i32_2 = arith.constant 0 : i32
    return %c0_i32, %c0_i32_0, %c0_i32_1 : i32, i32, i32
  }
  func.func @transform_4(%arg0: i32) -> (i32, i32, i32) {
    %c0_i32 = arith.constant 0 : i32
    %c0_i32_0 = arith.constant 0 : i32
    %c0_i32_1 = arith.constant 0 : i32
    %c0_i32_2 = arith.constant 0 : i32
    return %c0_i32, %c0_i32_0, %c0_i32_1 : i32, i32, i32
  }
  func.func @transform_5(%arg0: i32) -> (i32, i32, i32, i32) {
    %c0_i32 = arith.constant 0 : i32
    %c0_i32_0 = arith.constant 0 : i32
    %c0_i32_1 = arith.constant 0 : i32
    %c0_i32_2 = arith.constant 0 : i32
    %c0_i32_3 = arith.constant 0 : i32
    return %c0_i32, %c0_i32_0, %c0_i32_1, %c0_i32_2 : i32, i32, i32, i32
  }
  func.func @transform_6(%arg0: i32) -> (i32, i32, i32) {
    %c0_i32 = arith.constant 0 : i32
    %c0_i32_0 = arith.constant 0 : i32
    %c0_i32_1 = arith.constant 0 : i32
    %c0_i32_2 = arith.constant 0 : i32
    return %c0_i32, %c0_i32_0, %c0_i32_1 : i32, i32, i32
  }
  func.func @transform_7(%arg0: i32) -> (i32, i32, i32) {
    %c0_i32 = arith.constant 0 : i32
    %c0_i32_0 = arith.constant 0 : i32
    %c0_i32_1 = arith.constant 0 : i32
    return %arg0, %c0_i32, %c0_i32_0 : i32, i32, i32
  }
}

</mosaic_0001>

<bundles_post_ra>
// kernel: diff_forward.1
= control target key start
LH: loop header
LB: loop body
LE: loop exit
PB: predicated region body
PF: predicated region fallthrough
CT: control target
= control target key end

     0   :  { %s6512_s24 = smov 0   ;;  %s9257_s0 = inlined_call_operand.vmem [shape: bf16[2,18,18,64], index: 0, kind: input, shape index: {}]   ;;  %s9258_s1 = inlined_call_operand.vmem [shape: bf16[3,3,64,32], index: 1, kind: input, shape index: {}]   ;;  %s9259_s2 = inlined_call_operand.vmem [shape: f32[1,1,32], index: 2, kind: input, shape index: {}]   ;;  %s9260_s3 = inlined_call_operand.vmem [shape: f32[1,1,32], index: 3, kind: input, shape index: {}]   ;;  %s9261_s4 = inlined_call_operand.vmem [shape: f32[1,1,32], index: 4, kind: input, shape index: {}]   ;;  %s9262_s5 = inlined_call_operand.vmem [shape: bf16[3,3,32,32], index: 5, kind: input, shape index: {}]   ;;  %s9263_s6 = inlined_call_operand.vmem [shape: f32[1,1,32], index: 6, kind: input, shape index: {}]   ;;  %s9264_s7 = inlined_call_operand.vmem [shape: f32[2,32,256], index: 7, kind: output, shape index: {}]  }
   0x1 LB: > { %s5614_s25 = sadd.s32 4294967295, %s6469_s24   ;;  %p5618_p0 = scmp.ge.s32.totalorder %s6469_s24, 1  ;;  %s6469_s24 = sphi %s6512_s24, %s17_s24  }
   0x2   : > { %p237_p1 = scmp.lt.s32.totalorder %s6469_s24, 3 }
   0x4   : > { %p238_p2 = pnand %p5618_p0, %p237_p1 }
   0x6   : > { %241 = sbr.rel (%p238_p2) target bundleno = 1551 (0x60f), region = 48 }
   0xb   : > { %v6330_v0 = vld [vmem:[%s9258_s1 + $0x18] sm:$0xff]  ;;  %p269_p3 = scmp.lt.s32.totalorder %s5614_s25, 1  ;;  %v6329_v2 = vld [vmem:[%s9258_s1 + $0x10] sm:$0xff]  ;;  %v6328_v4 = vld [vmem:[%s9258_s1 + $0x8] sm:$0xff]  ;;  %vm446_vm0 = vsmask.f32 3328 }
   0xc   : > { %v6334_v1 = vld [vmem:[%s9258_s1 + $0x38] sm:$0xff]  ;;  %6403 = vmatpush.bf16.msra.mxu3 %v6330_v0  ;;  %v6333_v3 = vld [vmem:[%s9258_s1 + $0x30] sm:$0xff]  ;;  %1199 = vmatpush.bf16.msra.mxu1 %v6330_v0  ;;  %v6332_v5 = vld [vmem:[%s9258_s1 + $0x28] sm:$0xff]  ;;  %vm447_vm1 = vsmask.f32 7440  ;;  %vm905_vm2 = vcmask 523264  }
   0xd   : > { %958 = vmatpush.bf16.msra.mxu0 %v6334_v1  ;;  %s9530_s25 = smov (!%p269_p3, %s5614_s25), 1  ;;  %6399 = vmatpush.bf16.msra.mxu2 %v6334_v1  ;;  %v6327_v8 = vld [vmem:[%s9258_s1] sm:$0xff]  ;;  %v6338_v27 = vld [vmem:[%s9258_s1 + $0x58] sm:$0xff]  ;;  %vm6584_vm3 = vmor %vm446_vm0, %vm447_vm1  ;;  %vm1300_vm4 = vcmask 1042432   ;;  %vm1301_vm5 = vcmask 1046532   ;;  %vm2767_vm7 = vcmask 257024  }
   0xe   : > { %s6407_s11 = smul.u32 216, %s9530_s25  ;;  %v6331_v14 = vld [vmem:[%s9258_s1 + $0x20] sm:$0xff]  ;;  %v6342_v28 = vld [vmem:[%s9258_s1 + $0x78] sm:$0xff]  ;;  %vm6977_vm6 = vmor %vm1300_vm4, %vm1301_vm5  ;;  %vm2770_vm8 = vcmask 253952   ;;  %vm3180_vm9 = vsmask.f32 7938 }
   0xf   : > { %v6346_v40 = vld [vmem:[%s9258_s1 + $0x98] sm:$0xff]  ;;  %vm7677_vm10 = vmand %vm2767_vm7, %vm3180_vm9  ;;  %vm2855_vm11 = vsmask.f32 256  ;;  %vm2856_vm12 = vsmask.f32 4368  ;;  %vm3794_vm15 = vcmask 261120  }
  0x10   : > { %6404 = vmatpush.bf16.msra.mxu3 %v6329_v2  ;;  %s6544_s18 = scalar_lea.vmem %s9257_s0, %s6407_s11  ;;  %1200 = vmatpush.bf16.msra.mxu1 %v6329_v2  ;;  %vm7721_vm13 = vmor %vm2855_vm11, %vm2856_vm12  ;;  %s6308_s12 = sshll.u32 %s9530_s25, 6 }
  0x11   : > { %959 = vmatpush.bf16.msra.mxu0 %v6333_v3  ;;  %6400 = vmatpush.bf16.msra.mxu2 %v6333_v3  ;;  %v6547_v6 = vld [vmem:[%s6544_s18] sm:$0xf]  ;;  %v6550_v7 = vld [vmem:[%s6544_s18 + $0x4] sm:$0xf]  ;;  %v6556_v9 = vld [vmem:[%s6544_s18 + $0x8] sm:$0x1]  ;;  %s9237_s15 = scalar_lea.vmem %s9264_s7, %s6308_s12 }
  0x12   : > { %v450_v10 = vshrl.u32 %v6547_v6, 16  ;;  %v453_v11 = vshll.u32 %v6547_v6, 16  ;;  %v459_v12 = vshll.u32 %v6550_v7, 16  ;;  %v463_v13 = vshrl.u32 %v6550_v7, 16  ;;  %v304_v16 = vld [vmem:[%s6544_s18 + $0x60] sm:$0xf]  ;;  %vm7731_vm14 = vmand %vm2770_vm8, %vm2855_vm11 }
  0x13   : > { %v469_v15 = vshll.u32 %v6556_v9, 16  ;;  %v305_v17 = vld [vmem:[%s6544_s18 + $0x64] sm:$0xf]  ;;  %v306_v22 = vld [vmem:[%s6544_s18 + $0x68] sm:$0x1]  ;;  %v642_v24 = vshrl.u32 %v304_v16, 16 }
  0x14   : > { %6405 = vmatpush.bf16.msra.mxu3 %v6328_v4  ;;  %v452_v18 = vrot.slane %v450_v10, 4  ;;  %v455_v19 = vrot.slane %v453_v11, 5  ;;  %v461_v20 = vrot.slane %v459_v12, 5  ;;  %v465_v21 = vrot.slane %v463_v13, 4  ;;  %1201 = vmatpush.bf16.msra.mxu1 %v6328_v4  ;;  %v6576_v33 = vld [vmem:[%s6544_s18 + $0xc] sm:$0xf] }
  0x15   : > { %960 = vmatpush.bf16.msra.mxu0 %v6332_v5  ;;  %6401 = vmatpush.bf16.msra.mxu2 %v6332_v5  ;;  %v471_v23 = vrot.slane %v469_v15, 5  ;;  %v645_v25 = vshll.u32 %v304_v16, 16  ;;  %v651_v26 = vshll.u32 %v305_v17, 16  ;;  %v655_v31 = vshrl.u32 %v305_v17, 16  ;;  %v6579_v34 = vld [vmem:[%s6544_s18 + $0x10] sm:$0xf] }
  0x16   : > { %v456_v29 = vor.u32 %v455_v19, %v452_v18  ;;  %v466_v30 = vor.u32 %v465_v21, %v461_v20  ;;  %v661_v32 = vshll.u32 %v306_v22, 16  ;;  %v6317_v35 = vld [vmem:[%s6544_s18 + $0x60] sm:$0xff]  ;;  %v644_v37 = vrot.slane %v642_v24, 4  ;;  %v6600_v53 = vld [vmem:[%s6544_s18 + $0x14] sm:$0x1] }
  0x17   : > { %v647_v38 = vrot.slane %v645_v25, 5  ;;  %v653_v39 = vrot.slane %v651_v26, 5  ;;  %v657_v43 = vrot.slane %v655_v31, 4  ;;  %v6309_v45 = vld [vmem:[%s6544_s18] sm:$0xff]  ;;  %v474_v47 = vshrl.u32 %v6576_v33, 16 }
  0x18   : > { %6406 = vmatpush.bf16.msra.mxu3 %v6327_v8  ;;  %v457_v41 = vrot.slane %v456_v29, 4  ;;  %v467_v42 = vrot.slane %v466_v30, 4  ;;  %v663_v44 = vrot.slane %v661_v32, 5  ;;  %1202 = vmatpush.bf16.msra.mxu1 %v6327_v8  ;;  %v477_v48 = vshll.u32 %v6576_v33, 16  ;;  %v307_v63 = vld [vmem:[%s6544_s18 + $0x6c] sm:$0xf] }
  0x19   : > { %961 = vmatpush.bf16.msra.mxu0 %v6331_v14  ;;  %6402 = vmatpush.bf16.msra.mxu2 %v6331_v14  ;;  %v648_v46 = vor.u32 %v647_v38, %v644_v37  ;;  %v483_v49 = vshll.u32 %v6579_v34, 16  ;;  %v658_v52 = vor.u32 %v657_v43, %v653_v39  ;;  %v487_v54 = vshrl.u32 %v6579_v34, 16  ;;  %v308_v3 = vld [vmem:[%s6544_s18 + $0x70] sm:$0xf]  ;;  %v309_v11 = vld [vmem:[%s6544_s18 + $0x74] sm:$0x1] }
  0x1a   : > { %v462_v50 = vsel %vm6584_vm3, %v457_v41, %v461_v20  ;;  %v472_v51 = vsel %vm6584_vm3, %v467_v42, %v471_v23  ;;  %v476_v58 = vrot.slane %v474_v47, 4  ;;  %v479_v60 = vrot.slane %v477_v48, 5  ;;  %v6617_v24 = vld [vmem:[%s6544_s18 + $0x18] sm:$0xf]  ;;  %v6624_v29 = vld [vmem:[%s6544_s18 + $0x1c] sm:$0xf] }
  0x1b   : > { %5742 = vmatmul.msk.bf16.vlgmr.msra.gmra.mxu3 %vm905_vm2, %v6317_v35  ;;  %v833_v55 = vunpack.c.l.b16 %v462_v50  ;;  %v834_v56 = vunpack.c.l.b16 %v472_v51  ;;  %v649_v57 = vrot.slane %v648_v46, 4  ;;  %v659_v59 = vrot.slane %v658_v52, 4  ;;  %5734 = vmatmul.msk.bf16.vlgmr.msra.gmra.mxu1 %vm905_vm2, %v6309_v45  ;;  %v6337_v32 = vld [vmem:[%s9258_s1 + $0x50] sm:$0xff]  ;;  %v310_v41 = vld [vmem:[%s6544_s18 + $0x78] sm:$0xf] }
  0x1c   : > { %1692 = vmatpush.bf16.msrb.mxu3 %v6342_v28  ;;  %v485_v61 = vrot.slane %v483_v49, 5  ;;  %v489_v62 = vrot.slane %v487_v54, 4  ;;  %v493_v2 = vshll.u32 %v6600_v53, 16  ;;  %v480_v8 = vor.u32 %v479_v60, %v476_v58  ;;  %v6341_v35 = vld [vmem:[%s9258_s1 + $0x70] sm:$0xff]  ;;  %v6643_v48 = vld [vmem:[%s6544_s18 + $0x20] sm:$0x1] }
  0x1d   : > { %1539 = vmatpush.bf16.msrb.mxu2 %v6338_v27  ;;  %1867 = vmatpush.bf16.msrb.mxu0 %v6346_v40  ;;  %v865_v0 = vpack.c.b16 %v834_v56, %v833_v55  ;;  %v654_v1 = vsel %vm6584_vm3, %v649_v57, %v653_v39  ;;  %v664_v4 = vsel %vm6584_vm3, %v659_v59, %v663_v44  ;;  %v666_v14 = vshrl.u32 %v307_v63, 16  ;;  %v6345_v42 = vld [vmem:[%s9258_s1 + $0x90] sm:$0xff]  ;;  %v311_v56 = vld [vmem:[%s6544_s18 + $0x7c] sm:$0xf] }
  0x1e   : > { %v849_v5 = vunpack.c.l.b16 %v654_v1  ;;  %v490_v10 = vor.u32 %v489_v62, %v485_v61  ;;  %v850_v12 = vunpack.c.l.b16 %v664_v4  ;;  %v495_v13 = vrot.slane %v493_v2, 5  ;;  %v6318_v51 = vld [vmem:[%s6544_s18 + $0x6c] sm:$0xff] }
  0x1f   : > { %5638 = vmatmul.msk.bf16.vlgmr.msra.gmra.mxu0 %vm905_vm2, %v865_v0  ;;  %v669_v15 = vshll.u32 %v307_v63, 16  ;;  %v481_v16 = vrot.slane %v480_v8, 4  ;;  %v675_v18 = vshll.u32 %v308_v3, 16  ;;  %v679_v19 = vshrl.u32 %v308_v3, 16  ;;  %v6652_v59 = vld [vmem:[%s6544_s18 + $0xc] sm:$0xff] }
  0x20   : > { %v491_v17 = vrot.slane %v490_v10, 4  ;;  %v6614_v20 = vpack.c.b16 %v850_v12, %v849_v5  ;;  %v668_v21 = vrot.slane %v666_v14, 4  ;;  %v685_v23 = vshll.u32 %v309_v11, 16  ;;  %1693 = vmatpush.bf16.msrb.mxu3 %v6341_v35  ;;  %v312_v12 = vld [vmem:[%s6544_s18 + $0x80] sm:$0x1] }
  0x21   : > { %v671_v22 = vrot.slane %v669_v15, 5  ;;  %v486_v25 = vsel %vm6584_vm3, %v481_v16, %v485_v61  ;;  %v677_v27 = vrot.slane %v675_v18, 5  ;;  %v681_v28 = vrot.slane %v679_v19, 4  ;;  %1540 = vmatpush.bf16.msrb.mxu2 %v6337_v32  ;;  %1868 = vmatpush.bf16.msrb.mxu0 %v6345_v42  ;;  %v6666_v18 = vld [vmem:[%s6544_s18 + $0x24] sm:$0xf] }
  0x22   : > { %9337 = vst [vmem:[#allocation3_spill] sm:$0xff] %v6614_v20  ;;  %v496_v26 = vsel %vm6584_vm3, %v491_v17, %v495_v13  ;;  %5646 = vmatmul.msk.bf16.vlgmr.msra.gmra.mxu2 %vm905_vm2, %v6614_v20  ;;  %v835_v30 = vunpack.c.l.b16 %v486_v25  ;;  %v687_v38 = vrot.slane %v685_v23, 5  ;;  %v498_v39 = vshrl.u32 %v6617_v24, 16  ;;  %v6669_v19 = vld [vmem:[%s6544_s18 + $0x28] sm:$0xf] }
  0x23   : > { %v672_v31 = vor.u32 %v671_v22, %v668_v21  ;;  %v682_v37 = vor.u32 %v681_v28, %v677_v27  ;;  %v501_v40 = vshll.u32 %v6617_v24, 16  ;;  %v836_v43 = vunpack.c.l.b16 %v496_v26 }
  0x24   : > { %v507_v45 = vshll.u32 %v6624_v29, 16  ;;  %v511_v46 = vshrl.u32 %v6624_v29, 16  ;;  %v500_v49 = vrot.slane %v498_v39, 4  ;;  %v690_v57 = vshrl.u32 %v310_v41, 16  ;;  %v314_v39 = vld [vmem:[%s6544_s18 + $0x88] sm:$0xf] }
  0x25   : > { %v673_v44 = vrot.slane %v672_v31, 4  ;;  %v683_v47 = vrot.slane %v682_v37, 4  ;;  %v503_v50 = vrot.slane %v501_v40, 5  ;;  %v6654_v60 = vpack.c.b16 %v836_v43, %v835_v30  ;;  %v313_v37 = vld [vmem:[%s6544_s18 + $0x84] sm:$0xf] }
  0x26   : > { %v509_v54 = vrot.slane %v507_v45, 5  ;;  %v513_v55 = vrot.slane %v511_v46, 4  ;;  %v517_v61 = vshll.u32 %v6643_v48, 16  ;;  %v693_v62 = vshll.u32 %v310_v41, 16  ;;  %v6687_v46 = vld [vmem:[%s6544_s18 + $0x2c] sm:$0x1] }
  0x27   : > { %v678_v52 = vsel %vm6584_vm3, %v673_v44, %v677_v27  ;;  %v688_v58 = vsel %vm6584_vm3, %v683_v47, %v687_v38  ;;  %v504_v0 = vor.u32 %v503_v50, %v500_v49  ;;  %v699_v1 = vshll.u32 %v311_v56, 16  ;;  %v6319_v44 = vld [vmem:[%s6544_s18 + $0x78] sm:$0xff] }
  0x28   : > { %v851_v63 = vunpack.c.l.b16 %v678_v52  ;;  %v703_v2 = vshrl.u32 %v311_v56, 16  ;;  %v852_v3 = vunpack.c.l.b16 %v688_v58  ;;  %v514_v4 = vor.u32 %v513_v55, %v509_v54  ;;  %v6692_v52 = vld [vmem:[%s6544_s18 + $0x18] sm:$0xff] }
  0x29   : > { %v692_v5 = vrot.slane %v690_v57, 4  ;;  %v695_v8 = vrot.slane %v693_v62, 5  ;;  %v701_v10 = vrot.slane %v699_v1, 5  ;;  %v505_v13 = vrot.slane %v504_v0, 4 }
  0x2a   : > { %v705_v11 = vrot.slane %v703_v2, 4  ;;  %v6663_v14 = vpack.c.b16 %v852_v3, %v851_v63  ;;  %v515_v15 = vrot.slane %v514_v4, 4  ;;  %v519_v16 = vrot.slane %v517_v61, 5  ;;  %v315_v4 = vld [vmem:[%s6544_s18 + $0x8c] sm:$0x1] }
  0x2b   : > { %5743 = vmatmul.msk.bf16.gmra.mxu3 %vm905_vm2, %v6318_v51  ;;  %5735 = vmatmul.msk.bf16.gmra.mxu1 %vm905_vm2, %v6652_v59  ;;  %v696_v17 = vor.u32 %v695_v8, %v692_v5  ;;  %v709_v22 = vshll.u32 %v312_v12, 16  ;;  %v510_v23 = vsel %vm6584_vm3, %v505_v13, %v509_v54  ;;  %v522_v25 = vshrl.u32 %v6666_v18, 16  ;;  %v6706_v13 = vld [vmem:[%s6544_s18 + $0x30] sm:$0xf] }
  0x2c   : > { %9338 = vst [vmem:[#allocation4_spill] sm:$0xff] %v6663_v14  ;;  %v706_v21 = vor.u32 %v705_v11, %v701_v10  ;;  %v525_v26 = vshll.u32 %v6666_v18, 16  ;;  %v531_v27 = vshll.u32 %v6669_v19, 16  ;;  %v520_v28 = vsel %vm6584_vm3, %v515_v15, %v519_v16 }
  0x2d   : > { %v697_v30 = vrot.slane %v696_v17, 4  ;;  %v535_v31 = vshrl.u32 %v6669_v19, 16  ;;  %v711_v35 = vrot.slane %v709_v22, 5  ;;  %v837_v38 = vunpack.c.l.b16 %v510_v23  ;;  %v6709_v17 = vld [vmem:[%s6544_s18 + $0x34] sm:$0xf] }
  0x2e   : > { %v707_v32 = vrot.slane %v706_v21, 4  ;;  %v838_v40 = vunpack.c.l.b16 %v520_v28  ;;  %v524_v41 = vrot.slane %v522_v25, 4  ;;  %v527_v42 = vrot.slane %v525_v26, 5 }
  0x2f   : > { %5639 = vmatmul.msk.bf16.gmra.mxu0 %vm905_vm2, %v6654_v60  ;;  %v533_v43 = vrot.slane %v531_v27, 5  ;;  %v702_v45 = vsel %vm6584_vm3, %v697_v30, %v701_v10  ;;  %v537_v47 = vrot.slane %v535_v31, 4  ;;  %v714_v49 = vshrl.u32 %v313_v37, 16  ;;  %v6336_v30 = vld [vmem:[%s9258_s1 + $0x48] sm:$0xff] }
  0x30   : > { %v717_v50 = vshll.u32 %v313_v37, 16  ;;  %v712_v51 = vsel %vm6584_vm3, %v707_v32, %v711_v35  ;;  %v723_v54 = vshll.u32 %v314_v39, 16  ;;  %v727_v55 = vshrl.u32 %v314_v39, 16  ;;  %v6340_v31 = vld [vmem:[%s9258_s1 + $0x68] sm:$0xff]  ;;  %v316_v37 = vld [vmem:[%s6544_s18 + $0x90] sm:$0xf]  ;;  %1541 = vmatpush.bf16.msrb.mxu2 %v6336_v30 }
  0x31   : > { %v6694_v56 = vpack.c.b16 %v838_v40, %v837_v38  ;;  %v853_v57 = vunpack.c.l.b16 %v702_v45  ;;  %v528_v58 = vor.u32 %v527_v42, %v524_v41  ;;  %v541_v61 = vshll.u32 %v6687_v46, 16  ;;  %v6344_v38 = vld [vmem:[%s9258_s1 + $0x88] sm:$0xff]  ;;  %v317_v39 = vld [vmem:[%s6544_s18 + $0x94] sm:$0xf]  ;;  %1694 = vmatpush.bf16.msrb.mxu3 %v6340_v31 }
  0x32   : > { %5647 = vmatmul.msk.bf16.gmra.mxu2 %vm905_vm2, %v6663_v14  ;;  %v854_v62 = vunpack.c.l.b16 %v712_v51  ;;  %v538_v63 = vor.u32 %v537_v47, %v533_v43  ;;  %v716_v0 = vrot.slane %v714_v49, 4  ;;  %v719_v1 = vrot.slane %v717_v50, 5  ;;  %1869 = vmatpush.bf16.msrb.mxu0 %v6344_v38 }
  0x33   : > { %v725_v2 = vrot.slane %v723_v54, 5  ;;  %v729_v3 = vrot.slane %v727_v55, 4  ;;  %v529_v5 = vrot.slane %v528_v58, 4  ;;  %v543_v11 = vrot.slane %v541_v61, 5  ;;  %v6740_v54 = vld [vmem:[%s6544_s18 + $0x24] sm:$0xff] }
  0x34   : > { %v6703_v8 = vpack.c.b16 %v854_v62, %v853_v57  ;;  %v539_v10 = vrot.slane %v538_v63, 4  ;;  %v720_v12 = vor.u32 %v719_v1, %v716_v0  ;;  %v733_v16 = vshll.u32 %v315_v4, 16  ;;  %v6743_v55 = vld [vmem:[%s6544_s18 + $0x38] sm:$0x1] }
  0x35   : > { %v730_v15 = vor.u32 %v729_v3, %v725_v2  ;;  %v534_v21 = vsel %vm6584_vm3, %v529_v5, %v533_v43  ;;  %v546_v22 = vshrl.u32 %v6706_v13, 16  ;;  %v549_v23 = vshll.u32 %v6706_v13, 16 }
  0x36   : > { %9339 = vst [vmem:[#allocation5_spill] sm:$0xff] %v6703_v8  ;;  %v544_v25 = vsel %vm6584_vm3, %v539_v10, %v543_v11  ;;  %v721_v26 = vrot.slane %v720_v12, 4  ;;  %v555_v27 = vshll.u32 %v6709_v17, 16  ;;  %v559_v28 = vshrl.u32 %v6709_v17, 16  ;;  %v6753_v12 = vld [vmem:[%s6544_s18 + $0x98] sm:$0x1] }
  0x37   : > { %v731_v32 = vrot.slane %v730_v15, 4  ;;  %v735_v35 = vrot.slane %v733_v16, 5  ;;  %v839_v40 = vunpack.c.l.b16 %v534_v21  ;;  %v840_v41 = vunpack.c.l.b16 %v544_v25  ;;  %9340 = vst [vmem:[#allocation6_spill] sm:$0xff] %v6753_v12 }
  0x38   : > { %v548_v42 = vrot.slane %v546_v22, 4  ;;  %v551_v43 = vrot.slane %v549_v23, 5  ;;  %v726_v45 = vsel %vm6584_vm3, %v721_v26, %v725_v2  ;;  %v557_v47 = vrot.slane %v555_v27, 5  ;;  %v6760_v22 = vld [vmem:[%s6544_s18 + $0x3c] sm:$0xf] }
  0x39   : > { %v561_v49 = vrot.slane %v559_v28, 4  ;;  %v738_v50 = vshrl.u32 %v316_v37, 16  ;;  %v736_v51 = vsel %vm6584_vm3, %v731_v32, %v735_v35  ;;  %v741_v57 = vshll.u32 %v316_v37, 16  ;;  %v6763_v23 = vld [vmem:[%s6544_s18 + $0x40] sm:$0xf] }
  0x3a   : > { %v747_v58 = vshll.u32 %v317_v39, 16  ;;  %v751_v61 = vshrl.u32 %v317_v39, 16  ;;  %v6745_v62 = vpack.c.b16 %v840_v41, %v839_v40  ;;  %v855_v63 = vunpack.c.l.b16 %v726_v45  ;;  %v319_v37 = vld [vmem:[%s6544_s18 + $0x9c] sm:$0xf] }
  0x3b   : > { %5744 = vmatmul.msk.bf16.gmra.mxu3 %vm905_vm2, %v6319_v44  ;;  %5736 = vmatmul.msk.bf16.gmra.mxu1 %vm905_vm2, %v6692_v52  ;;  %v6733_v44 = vld [vmem:[%s6544_s18 + $0x84] sm:$0xff]  ;;  %v856_v0 = vunpack.c.l.b16 %v736_v51  ;;  %v552_v1 = vor.u32 %v551_v43, %v548_v42  ;;  %v565_v2 = vshll.u32 %v6743_v55, 16  ;;  %v740_v3 = vrot.slane %v738_v50, 4  ;;  %v6778_v43 = vld [vmem:[%s6544_s18 + $0xa0] sm:$0xf] }
  0x3c   : > { %v562_v4 = vor.u32 %v561_v49, %v557_v47  ;;  %v743_v5 = vrot.slane %v741_v57, 5  ;;  %v749_v10 = vrot.slane %v747_v58, 5  ;;  %v753_v11 = vrot.slane %v751_v61, 4  ;;  %9342 = vst [vmem:[#allocation8_spill] sm:$0xff] %v6778_v43  ;;  %v6781_v61 = vld [vmem:[%s6544_s18 + $0x90] sm:$0xff] }
  0x3d   : > { %v6757_v15 = vpack.c.b16 %v856_v0, %v855_v63  ;;  %v553_v16 = vrot.slane %v552_v1, 4  ;;  %v567_v21 = vrot.slane %v565_v2, 5  ;;  %v757_v28 = vshll.u32 %v6753_v12, 16  ;;  %9343 = vst [vmem:[#allocation9_spill] sm:$0xff] %v6781_v61 }
  0x3e   : > { %v563_v25 = vrot.slane %v562_v4, 4  ;;  %v744_v26 = vor.u32 %v743_v5, %v740_v3  ;;  %v754_v27 = vor.u32 %v753_v11, %v749_v10  ;;  %v570_v30 = vshrl.u32 %v6760_v22, 16  ;;  %v6791_v3 = vld [vmem:[%s6544_s18 + $0x30] sm:$0xff] }
  0x3f   : > { %5640 = vmatmul.msk.bf16.gmra.mxu0 %vm905_vm2, %v6694_v56  ;;  %9341 = vst [vmem:[#allocation7_spill] sm:$0xff] %v6757_v15  ;;  %v573_v31 = vshll.u32 %v6760_v22, 16  ;;  %v579_v32 = vshll.u32 %v6763_v23, 16  ;;  %v583_v35 = vshrl.u32 %v6763_v23, 16  ;;  %v558_v38 = vsel %vm6584_vm3, %v553_v16, %v557_v47  ;;  %v6784_v47 = vld [vmem:[%s6544_s18 + $0x44] sm:$0x1] }
  0x40   : > { %v568_v39 = vsel %vm6584_vm3, %v563_v25, %v567_v21  ;;  %v745_v40 = vrot.slane %v744_v26, 4  ;;  %v755_v41 = vrot.slane %v754_v27, 4  ;;  %v759_v42 = vrot.slane %v757_v28, 5 }
  0x41   : > { %v762_v45 = vshrl.u32 %v319_v37, 16  ;;  %v765_v49 = vshll.u32 %v319_v37, 16  ;;  %v572_v50 = vrot.slane %v570_v30, 4  ;;  %v575_v51 = vrot.slane %v573_v31, 5 }
  0x42   : > { %5648 = vmatmul.msk.bf16.gmra.mxu2 %vm905_vm2, %v6703_v8  ;;  %v581_v57 = vrot.slane %v579_v32, 5  ;;  %v585_v58 = vrot.slane %v583_v35, 4  ;;  %v841_v63 = vunpack.c.l.b16 %v558_v38  ;;  %v842_v0 = vunpack.c.l.b16 %v568_v39  ;;  %v6803_v32 = vld [vmem:[%s6544_s18 + $0xa4] sm:$0x1] }
  0x43   : > { %v750_v1 = vsel %vm6584_vm3, %v745_v40, %v749_v10  ;;  %v760_v2 = vsel %vm6584_vm3, %v755_v41, %v759_v42  ;;  %v771_v4 = vshll.u32 %v6778_v43, 16  ;;  %v775_v5 = vshrl.u32 %v6778_v43, 16  ;;  %9344 = vst [vmem:[#allocation10_spill] sm:$0xff] %v6803_v32  ;;  %v6810_v41 = vld [vmem:[%s6544_s18 + $0x48] sm:$0xf] }
  0x44   : > { %v764_v11 = vrot.slane %v762_v45, 4  ;;  %v767_v16 = vrot.slane %v765_v49, 5  ;;  %v576_v21 = vor.u32 %v575_v51, %v572_v50  ;;  %v586_v25 = vor.u32 %v585_v58, %v581_v57  ;;  %v6814_v49 = vld [vmem:[%s6544_s18 + $0x4c] sm:$0xf] }
  0x45   : > { %v589_v26 = vshll.u32 %v6784_v47, 16  ;;  %v6798_v10 = vpack.c.b16 %v842_v0, %v841_v63  ;;  %v857_v27 = vunpack.c.l.b16 %v750_v1  ;;  %v858_v28 = vunpack.c.l.b16 %v760_v2  ;;  %v6823_v1 = vld [vmem:[%s6544_s18 + $0xa8] sm:$0xf] }
  0x46   : > { %v773_v30 = vrot.slane %v771_v4, 5  ;;  %v777_v31 = vrot.slane %v775_v5, 4  ;;  %v768_v35 = vor.u32 %v767_v16, %v764_v11  ;;  %v577_v37 = vrot.slane %v576_v21, 4  ;;  %9346 = vst [vmem:[#allocation12_spill] sm:$0xff] %v6823_v1  ;;  %v6830_v5 = vld [vmem:[%s6544_s18 + $0xac] sm:$0xf] }
  0x47   : > { %v587_v38 = vrot.slane %v586_v25, 4  ;;  %v591_v39 = vrot.slane %v589_v26, 5  ;;  %v6807_v40 = vpack.c.b16 %v858_v28, %v857_v27  ;;  %v781_v45 = vshll.u32 %v6803_v32, 16  ;;  %9347 = vst [vmem:[#allocation13_spill] sm:$0xff] %v6830_v5  ;;  %v6339_v11 = vld [vmem:[%s9258_s1 + $0x60] sm:$0xff] }
  0x48   : > { %v778_v42 = vor.u32 %v777_v31, %v773_v30  ;;  %v769_v50 = vrot.slane %v768_v35, 4  ;;  %v582_v51 = vsel %vm6584_vm3, %v577_v37, %v581_v57  ;;  %v594_v63 = vshrl.u32 %v6810_v41, 16  ;;  %v6335_v57 = vld [vmem:[%s9258_s1 + $0x40] sm:$0xff]  ;;  %1695 = vmatpush.bf16.msrb.mxu3 %v6339_v11 }
  0x49   : > { %9345 = vst [vmem:[#allocation11_spill] sm:$0xff] %v6807_v40  ;;  %v592_v58 = vsel %vm6584_vm3, %v587_v38, %v591_v39  ;;  %v597_v0 = vshll.u32 %v6810_v41, 16  ;;  %v603_v2 = vshll.u32 %v6814_v49, 16  ;;  %v607_v4 = vshrl.u32 %v6814_v49, 16  ;;  %v6343_v25 = vld [vmem:[%s9258_s1 + $0x80] sm:$0xff]  ;;  %1542 = vmatpush.bf16.msrb.mxu2 %v6335_v57 }
  0x4a   : > { %v779_v16 = vrot.slane %v778_v42, 4  ;;  %v783_v21 = vrot.slane %v781_v45, 5  ;;  %v843_v26 = vunpack.c.l.b16 %v582_v51  ;;  %v844_v27 = vunpack.c.l.b16 %v592_v58  ;;  %1870 = vmatpush.bf16.msrb.mxu0 %v6343_v25  ;;  %v6848_v39 = vld [vmem:[%s6544_s18 + $0x9c] sm:$0xff]  ;;  %v6856_v57 = vld [vmem:[%s6544_s18 + $0x50] sm:$0x1] }
  0x4b   : > { %5745 = vmatmul.msk.bf16.gmra.mxu3 %vm905_vm2, %v6733_v44  ;;  %5737 = vmatmul.msk.bf16.gmra.mxu1 %vm905_vm2, %v6740_v54  ;;  %v774_v28 = vsel %vm6584_vm3, %v769_v50, %v773_v30  ;;  %v786_v31 = vshrl.u32 %v6823_v1, 16  ;;  %v789_v35 = vshll.u32 %v6823_v1, 16  ;;  %v795_v37 = vshll.u32 %v6830_v5, 16  ;;  %9348 = vst [vmem:[#allocation14_spill] sm:$0xff] %v6848_v39  ;;  %v6853_v50 = vld [vmem:[%s6544_s18 + $0x3c] sm:$0xff] }
  0x4c   : > { %v799_v38 = vshrl.u32 %v6830_v5, 16  ;;  %v596_v42 = vrot.slane %v594_v63, 4  ;;  %v599_v45 = vrot.slane %v597_v0, 5  ;;  %v605_v51 = vrot.slane %v603_v2, 5 }
  0x4d   : > { %v609_v58 = vrot.slane %v607_v4, 4  ;;  %v784_v30 = vsel %vm6584_vm3, %v779_v16, %v783_v21  ;;  %v6858_v11 = vpack.c.b16 %v844_v27, %v843_v26  ;;  %v859_v1 = vunpack.c.l.b16 %v774_v28  ;;  %v6864_v16 = vld [vmem:[%s6544_s18 + $0xb0] sm:$0x1] }
  0x4e   : > { %v791_v5 = vrot.slane %v789_v35, 5  ;;  %v797_v25 = vrot.slane %v795_v37, 5  ;;  %v801_v32 = vrot.slane %v799_v38, 4  ;;  %v860_v63 = vunpack.c.l.b16 %v784_v30  ;;  %9349 = vst [vmem:[#allocation15_spill] sm:$0xff] %v6864_v16  ;;  %v6874_v38 = vld [vmem:[%s6544_s18 + $0x54] sm:$0xf] }
  0x4f   : > { %5641 = vmatmul.msk.bf16.gmra.mxu0 %vm905_vm2, %v6745_v62  ;;  %v600_v0 = vor.u32 %v599_v45, %v596_v42  ;;  %v610_v2 = vor.u32 %v609_v58, %v605_v51  ;;  %v613_v4 = vshll.u32 %v6856_v57, 16  ;;  %v805_v27 = vshll.u32 %v6864_v16, 16  ;;  %v6877_v42 = vld [vmem:[%s6544_s18 + $0x58] sm:$0xf] }
  0x50   : > { %v802_v26 = vor.u32 %v801_v32, %v797_v25  ;;  %v6871_v28 = vpack.c.b16 %v860_v63, %v859_v1  ;;  %v618_v58 = vshrl.u32 %v6874_v38, 16  ;;  %v621_v30 = vshll.u32 %v6874_v38, 16 }
  0x51   : > { %v611_v35 = vrot.slane %v610_v2, 4  ;;  %v615_v37 = vrot.slane %v613_v4, 5  ;;  %v807_v32 = vrot.slane %v805_v27, 5  ;;  %v627_v63 = vshll.u32 %v6877_v42, 16  ;;  %v6890_v2 = vld [vmem:[%s6544_s18 + $0xb4] sm:$0xf] }
  0x52   : > { %5649 = vmatmul.msk.bf16.gmra.mxu2 %vm905_vm2, %v6757_v15  ;;  %9350 = vst [vmem:[#allocation16_spill] sm:$0xff] %v6871_v28  ;;  %v6893_v4 = vld [vmem:[%s6544_s18 + $0xb8] sm:$0xf]  ;;  %v813_v16 = vshll.u32 %v6890_v2, 16  ;;  %v6920_v15 = vld [vmem:[%s6544_s18 + $0xbc] sm:$0x1] }
  0x53   : > { %9351 = vst [vmem:[#allocation17_spill] sm:$0xff] %v6890_v2 }
  0x54   : > { %9352 = vst [vmem:[#allocation18_spill] sm:$0xff] %v6893_v4  ;;  %v815_v43 = vrot.slane %v813_v16, 5 }
  0x5b   : > { %5746 = vmatmul.msk.bf16.gmra.mxu3 %vm905_vm2, %v6781_v61  ;;  %5738 = vmatmul.msk.bf16.gmra.mxu1 %vm905_vm2, %v6791_v3  ;;  %v629_v61 = vrot.slane %v627_v63, 5 }
  0x5f   : > { %5642 = vmatmul.msk.bf16.gmra.mxu0 %vm905_vm2, %v6798_v10 }
  0x62   : > { %5650 = vmatmul.msk.bf16.gmra.mxu2 %vm905_vm2, %v6807_v40  ;;  %v788_v40 = vrot.slane %v786_v31, 4  ;;  %v601_v31 = vrot.slane %v600_v0, 4  ;;  %v631_v0 = vshrl.u32 %v6877_v42, 16 }
  0x64   : > { %v792_v21 = vor.u32 %v791_v5, %v788_v40  ;;  %v803_v40 = vrot.slane %v802_v26, 4  ;;  %v606_v1 = vsel %vm6584_vm3, %v601_v31, %v605_v51  ;;  %v616_v5 = vsel %vm6584_vm3, %v611_v35, %v615_v37  ;;  %v6900_v31 = vld [vmem:[%s6544_s18 + $0xa8] sm:$0xff] }
  0x65   : > { %v846_v26 = vunpack.c.l.b16 %v616_v5  ;;  %v620_v35 = vrot.slane %v618_v58, 4  ;;  %v623_v37 = vrot.slane %v621_v30, 5  ;;  %v819_v5 = vshll.u32 %v6893_v4, 16 }
  0x66   : > { %v793_v45 = vrot.slane %v792_v21, 4  ;;  %v845_v21 = vunpack.c.l.b16 %v606_v1  ;;  %v808_v27 = vsel %vm6584_vm3, %v803_v40, %v807_v32  ;;  %v633_v1 = vrot.slane %v631_v0, 4 }
  0x67   : > { %v862_v58 = vunpack.c.l.b16 %v808_v27  ;;  %v624_v30 = vor.u32 %v623_v37, %v620_v35 }
  0x68   : > { %v798_v51 = vsel %vm6584_vm3, %v793_v45, %v797_v25  ;;  %v823_v25 = vshrl.u32 %v6893_v4, 16  ;;  %v6910_v45 = vld [vmem:[%s6544_s18 + $0x5c] sm:$0x1]  ;;  %v6912_v40 = vpack.c.b16 %v846_v26, %v845_v21  ;;  %v634_v63 = vor.u32 %v633_v1, %v629_v61  ;;  %v6349_v1 = vld [vmem:[%s9258_s1 + $0xb0] sm:$0xff] }
  0x69   : > { %v861_v32 = vunpack.c.l.b16 %v798_v51  ;;  %v637_v0 = vshll.u32 %v6910_v45, 16  ;;  %v821_v4 = vrot.slane %v819_v5, 5  ;;  %v6350_v21 = vld [vmem:[%s9258_s1 + $0xb8] sm:$0xff]  ;;  %v829_v26 = vshll.u32 %v6920_v15, 16 }
  0x6a   : > { %v825_v12 = vrot.slane %v823_v25, 4  ;;  %2026 = vmatpush.bf16.msrb.mxu1 %v6350_v21  ;;  %v625_v51 = vrot.slane %v624_v30, 4  ;;  %v635_v27 = vrot.slane %v634_v63, 4  ;;  %v6354_v25 = vld [vmem:[%s9258_s1 + $0xd8] sm:$0xff]  ;;  %v6348_v30 = vld [vmem:[%s9258_s1 + $0xa8] sm:$0xff] }
  0x6b   : > { %5747 = vmatmul.msk.bf16.gmra.mxu3 %vm905_vm2, %v6848_v39  ;;  %5739 = vmatmul.msk.bf16.gmra.mxu1 %vm905_vm2, %v6853_v50  ;;  %v6905_v39 = vld [vmem:[%s6544_s18 + $0x48] sm:$0xff]  ;;  %v639_v35 = vrot.slane %v637_v0, 5  ;;  %v6949_v63 = vld [vmem:[%s6544_s18 + $0xb4] sm:$0xff] }
  0x6c   : > { %v826_v37 = vor.u32 %v825_v12, %v821_v4  ;;  %v630_v12 = vsel %vm6584_vm3, %v625_v51, %v629_v61  ;;  %2179 = vmatpush.bf16.msra.mxu2 %v6354_v25  ;;  %v6362_v61 = vld [vmem:[%s9258_s1 + $0x118] sm:$0xff]  ;;  %v5751_v25 = vrot.slane %v6576_v33, 9  ;;  %v1308_v33 = vrot.slane %v6556_v9, 5 }
  0x6d   : > { %v847_v0 = vunpack.c.l.b16 %v630_v12  ;;  %v6959_v51 = vld [vmem:[%s6544_s18 + $0x54] sm:$0xff]  ;;  %2513 = vmatpush.bf16.msra.mxu0 %v6362_v61  ;;  %v9355_v12 = vmov 0 }
  0x6e   : > { %2027 = vmatpush.bf16.msrb.mxu1 %v6349_v1  ;;  %v9356_v12 = vsel %vm6977_vm6, 4294967295, %v9355_v12 }
  0x6f   : > { %5643 = vmatmul.msk.bf16.gmra.mxu0 %vm905_vm2, %v6858_v11  ;;  %9357 = vst [vmem:[#allocation21_spill] sm:$0xff] %v9356_v12 }
  0x72   : > { %5651 = vmatmul.msk.bf16.gmra.mxu2 %vm905_vm2, %v6871_v28  ;;  %v810_v28 = vshrl.u32 %v6890_v2, 16  ;;  %2028 = vmatpush.bf16.msrb.mxu1 %v6348_v30 }
  0x74   : > { %v812_v2 = vrot.slane %v810_v28, 4  ;;  %v6927_v28 = vpack.c.b16 %v862_v58, %v861_v32  ;;  %v827_v32 = vrot.slane %v826_v37, 4  ;;  %v831_v58 = vrot.slane %v829_v26, 5 }
  0x76   : > { %9353 = vst [vmem:[#allocation19_spill] sm:$0xff] %v6927_v28  ;;  %v816_v16 = vor.u32 %v815_v43, %v812_v2  ;;  %v6358_v43 = vld [vmem:[%s9258_s1 + $0xf8] sm:$0xff]  ;;  %v640_v2 = vsel %vm6584_vm3, %v635_v27, %v639_v35  ;;  %v832_v26 = vsel %vm6584_vm3, %v827_v32, %v831_v58  ;;  %v6347_v27 = vld [vmem:[%s9258_s1 + $0xa0] sm:$0xff]  ;;  %v1312_v35 = vrot.slane %v6579_v34, 5 }
  0x77   : > { %2354 = vmatpush.bf16.msra.mxu3 %v6358_v43  ;;  %v848_v21 = vunpack.c.l.b16 %v640_v2  ;;  %2029 = vmatpush.bf16.msrb.mxu1 %v6347_v27  ;;  %v5750_v58 = vrot.slane %v6547_v6, 9  ;;  %v1319_v27 = vrot.slane %v6624_v29, 5 }
  0x78   : > { %v817_v5 = vrot.slane %v816_v16, 4  ;;  %v1314_v43 = vrot.slane %v1312_v35, 4  ;;  %v1313_v2 = vsel %vm6977_vm6, %v5751_v25, %v1312_v35  ;;  %v1322_v25 = vrot.slane %v6643_v48, 5 }
  0x79   : > { %v6967_v37 = vpack.c.b16 %v848_v21, %v847_v0  ;;  %v1417_v0 = vunpack.c.l.b16 %v1313_v2 }
  0x7a   : > { %v822_v16 = vsel %vm6584_vm3, %v817_v5, %v821_v4  ;;  %v864_v4 = vunpack.c.l.b16 %v832_v26  ;;  %v1315_v5 = vrot.slane %v6600_v53, 5  ;;  %v1305_v53 = vrot.slane %v6550_v7, 5 }
  0x7b   : > { %5748 = vmatmul.msk.bf16.gmra.mxu3 %vm905_vm2, %v6900_v31  ;;  %5740 = vmatmul.msk.bf16.gmra.mxu1 %vm905_vm2, %v6905_v39  ;;  %9354 = vst [vmem:[#allocation20_spill] sm:$0xff] %v6967_v37  ;;  %v863_v1 = vunpack.c.l.b16 %v822_v16 }
  0x7c   : > { %v1316_v32 = vsel %vm6977_vm6, %v1314_v43, %v1315_v5  ;;  %v1307_v30 = vrot.slane %v1305_v53, 4  ;;  %v1306_v61 = vsel %vm6977_vm6, %v5750_v58, %v1305_v53  ;;  %v1321_v5 = vrot.slane %v1319_v27, 4 }
  0x7d   : > { %v6975_v34 = vpack.c.b16 %v864_v4, %v863_v1  ;;  %v1418_v21 = vunpack.c.l.b16 %v1316_v32  ;;  %v1415_v9 = vunpack.c.l.b16 %v1306_v61  ;;  %v5752_v4 = vrot.slane %v6617_v24, 9 }
  0x7e   : > { %v1309_v7 = vsel %vm6977_vm6, %v1307_v30, %v1308_v33  ;;  %v1323_v2 = vsel %vm6977_vm6, %v1321_v5, %v1322_v25  ;;  %v1326_v61 = vrot.slane %v6669_v19, 5 }
  0x7f   : > { %5644 = vmatmul.msk.bf16.gmra.mxu0 %vm905_vm2, %v6912_v40  ;;  %v1448_v16 = vpack.c.b16 %v1418_v21, %v1417_v0  ;;  %v1416_v35 = vunpack.c.l.b16 %v1309_v7  ;;  %v1420_v24 = vunpack.c.l.b16 %v1323_v2 }
  0x81   : > { %v1447_v53 = vpack.c.b16 %v1416_v35, %v1415_v9  ;;  %v1328_v9 = vrot.slane %v1326_v61, 4  ;;  %v1329_v35 = vrot.slane %v6687_v46, 5 }
  0x82   : > { %5652 = vmatmul.msk.bf16.gmra.mxu2 %vm905_vm2, %v6927_v28 }
  0x83   : > { %v1330_v25 = vsel %vm6977_vm6, %v1328_v9, %v1329_v35 }
  0x8b   : > { %5749 = vmatmul.msk.bf16.gmra.mxu3 %vm905_vm2, %v6949_v63  ;;  %5741 = vmatmul.msk.bf16.gmra.mxu1 %vm905_vm2, %v6959_v51 }
  0x8f   : > { %5645 = vmatmul.msk.bf16.gmra.mxu0 %vm905_vm2, %v6967_v37 }
  0x92   : > { %5653 = vmatmul.msk.bf16.gmra.mxu2 %vm905_vm2, %v6975_v34 }
  0x98   : > { %v1204_v26 = vpop.f32.mrf.mxu1 }
  0x9b   : > { %5818 = vmatmul.msk.bf16.vlgmr.msrb.gmra.mxu3 %vm905_vm2, %v6652_v59  ;;  %5883 = vmatmul.msk.bf16.vlgmr.msrb.gmra.mxu1 %vm905_vm2, %v1448_v16  ;;  %v1320_v59 = vsel %vm6977_vm6, %v5752_v4, %v1319_v27  ;;  %v5753_v27 = vrot.slane %v6666_v18, 9 }
  0x9c   : > { %v963_v1 = vpop.f32.mrf.mxu0  ;;  %v1419_v33 = vunpack.c.l.b16 %v1320_v59 }
  0x9d   : > { %v6998_v6 = vadd.f32 %v1204_v26, %v963_v1 }
  0x9e   : > { %v1244_v43 = vpop.f32.mrf.mxu3  ;;  %v7013_v21 = vpack.c.b16 %v1420_v24, %v1419_v33  ;;  %v1333_v24 = vrot.slane %v6709_v17, 5 }
  0x9f   : > { %5850 = vmatmul.msk.bf16.vlgmr.msrb.gmra.mxu0 %vm905_vm2, %v6654_v60 }
  0xa0   : > { %v1206_v29 = vpop.f32.mrf.mxu1 }
  0xa2   : > { %5782 = vmatmul.msk.bf16.vlgmr.msrb.gmra.mxu2 %vm905_vm2, %v1447_v53  ;;  %v1422_v53 = vunpack.c.l.b16 %v1330_v25 }
  0xa4   : > { %v965_v32 = vpop.f32.mrf.mxu0 }
  0xa5   : > { %v7009_v58 = vadd.f32 %v1206_v29, %v965_v32  ;;  %v1003_v48 = vpop.f32.mrf.mxu2 }
  0xa6   : > { %v1246_v30 = vpop.f32.mrf.mxu3  ;;  %v7011_v0 = vadd.f32 %v1244_v43, %v1003_v48 }
  0xa8   : > { %v1209_v60 = vpop.f32.mrf.mxu1 }
  0xab   : > { %5819 = vmatmul.msk.bf16.gmra.mxu3 %vm905_vm2, %v6692_v52  ;;  %5884 = vmatmul.msk.bf16.gmra.mxu1 %vm905_vm2, %v7013_v21  ;;  %v1327_v52 = vsel %vm6977_vm6, %v5753_v27, %v1326_v61  ;;  %v1336_v61 = vrot.slane %v6743_v55, 5  ;;  %v6357_v55 = vld [vmem:[%s9258_s1 + $0xf0] sm:$0xff] }
  0xac   : > { %v968_v7 = vpop.f32.mrf.mxu0  ;;  %v1421_v43 = vunpack.c.l.b16 %v1327_v52  ;;  %2355 = vmatpush.bf16.msra.mxu3 %v6357_v55 }
  0xad   : > { %v7020_v26 = vadd.f32 %v1209_v60, %v968_v7  ;;  %v1005_v1 = vpop.f32.mrf.mxu2  ;;  %v1335_v60 = vrot.slane %v1333_v24, 4 }
  0xae   : > { %v1249_v4 = vpop.f32.mrf.mxu3  ;;  %v7024_v5 = vadd.f32 %v1246_v30, %v1005_v1  ;;  %v7037_v32 = vpack.c.b16 %v1422_v53, %v1421_v43  ;;  %v5754_v30 = vrot.slane %v6706_v13, 9  ;;  %v6353_v13 = vld [vmem:[%s9258_s1 + $0xd0] sm:$0xff] }
  0xaf   : > { %5851 = vmatmul.msk.bf16.gmra.mxu0 %vm905_vm2, %v6694_v56  ;;  %v1337_v35 = vsel %vm6977_vm6, %v1335_v60, %v1336_v61  ;;  %2180 = vmatpush.bf16.msra.mxu2 %v6353_v13  ;;  %v6361_v53 = vld [vmem:[%s9258_s1 + $0x110] sm:$0xff]  ;;  %v5755_v60 = vrot.slane %v6760_v22, 9 }
  0xb0   : > { %v1211_v19 = vpop.f32.mrf.mxu1  ;;  %2514 = vmatpush.bf16.msra.mxu0 %v6361_v53 }
  0xb2   : > { %5783 = vmatmul.msk.bf16.gmra.mxu2 %vm905_vm2, %v1448_v16 }
  0xb4   : > { %v970_v18 = vpop.f32.mrf.mxu0 }
  0xb5   : > { %v7033_v46 = vadd.f32 %v1211_v19, %v970_v18  ;;  %v1008_v29 = vpop.f32.mrf.mxu2  ;;  %v1424_v19 = vunpack.c.l.b16 %v1337_v35 }
  0xb6   : > { %v1251_v59 = vpop.f32.mrf.mxu3  ;;  %v7035_v2 = vadd.f32 %v1249_v4, %v1008_v29 }
  0xb8   : > { %v1214_v33 = vpop.f32.mrf.mxu1 }
  0xbb   : > { %5820 = vmatmul.msk.bf16.gmra.mxu3 %vm905_vm2, %v6740_v54  ;;  %5885 = vmatmul.msk.bf16.gmra.mxu1 %vm905_vm2, %v7037_v32  ;;  %v1334_v54 = vsel %vm6977_vm6, %v5754_v30, %v1333_v24 }
  0xbc   : > { %v973_v48 = vpop.f32.mrf.mxu0  ;;  %v1423_v4 = vunpack.c.l.b16 %v1334_v54 }
  0xbd   : > { %v7044_v16 = vadd.f32 %v1214_v33, %v973_v48  ;;  %v1010_v7 = vpop.f32.mrf.mxu2  ;;  %v1340_v33 = vrot.slane %v6763_v23, 5  ;;  %v1343_v48 = vrot.slane %v6784_v47, 5 }
  0xbe   : > { %v1254_v27 = vpop.f32.mrf.mxu3  ;;  %v7048_v9 = vadd.f32 %v1251_v59, %v1010_v7  ;;  %v7071_v29 = vpack.c.b16 %v1424_v19, %v1423_v4 }
  0xbf   : > { %5852 = vmatmul.msk.bf16.gmra.mxu0 %vm905_vm2, %v6745_v62  ;;  %v1342_v61 = vrot.slane %v1340_v33, 4 }
  0xc0   : > { %v1216_v17 = vpop.f32.mrf.mxu1 }
  0xc1   : > { %v1344_v54 = vsel %vm6977_vm6, %v1342_v61, %v1343_v48 }
  0xc2   : > { %5784 = vmatmul.msk.bf16.gmra.mxu2 %vm905_vm2, %v7013_v21  ;;  %v1426_v35 = vunpack.c.l.b16 %v1344_v54 }
  0xc4   : > { %v975_v1 = vpop.f32.mrf.mxu0 }
  0xc5   : > { %v7064_v52 = vadd.f32 %v1216_v17, %v975_v1  ;;  %v1013_v25 = vpop.f32.mrf.mxu2 }
  0xc6   : > { %v1256_v18 = vpop.f32.mrf.mxu3  ;;  %v7066_v43 = vadd.f32 %v1254_v27, %v1013_v25 }
  0xc8   : > { %v1219_v59 = vpop.f32.mrf.mxu1 }
  0xcb   : > { %5821 = vmatmul.msk.bf16.gmra.mxu3 %vm905_vm2, %v6791_v3  ;;  %5886 = vmatmul.msk.bf16.gmra.mxu1 %vm905_vm2, %v7071_v29  ;;  %v1341_v3 = vsel %vm6977_vm6, %v5755_v60, %v1340_v33 }
  0xcc   : > { %v978_v24 = vpop.f32.mrf.mxu0  ;;  %v1425_v22 = vunpack.c.l.b16 %v1341_v3 }
  0xcd   : > { %v7079_v30 = vadd.f32 %v1219_v59, %v978_v24  ;;  %v1015_v7 = vpop.f32.mrf.mxu2  ;;  %v1350_v59 = vrot.slane %v6856_v57, 5  ;;  %v5756_v24 = vrot.slane %v6810_v41, 9 }
  0xce   : > { %v1259_v27 = vpop.f32.mrf.mxu3  ;;  %v7082_v17 = vadd.f32 %v1256_v18, %v1015_v7  ;;  %v7096_v19 = vpack.c.b16 %v1426_v35, %v1425_v22  ;;  %v1347_v18 = vrot.slane %v6814_v49, 5 }
  0xcf   : > { %5853 = vmatmul.msk.bf16.gmra.mxu0 %vm905_vm2, %v6798_v10 }
  0xd0   : > { %v1221_v23 = vpop.f32.mrf.mxu1  ;;  %v1349_v48 = vrot.slane %v1347_v18, 4 }
  0xd2   : > { %5785 = vmatmul.msk.bf16.gmra.mxu2 %vm905_vm2, %v7037_v32 }
  0xd4   : > { %v980_v47 = vpop.f32.mrf.mxu0 }
  0xd5   : > { %v7092_v13 = vadd.f32 %v1221_v23, %v980_v47  ;;  %v1018_v55 = vpop.f32.mrf.mxu2 }
  0xd6   : > { %v1261_v1 = vpop.f32.mrf.mxu3  ;;  %v7094_v4 = vadd.f32 %v1259_v27, %v1018_v55  ;;  %v1351_v27 = vsel %vm6977_vm6, %v1349_v48, %v1350_v59  ;;  %v5757_v59 = vrot.slane %v6874_v38, 9 }
  0xd7   : > { %v1428_v23 = vunpack.c.l.b16 %v1351_v27 }
  0xd8   : > { %v1224_v25 = vpop.f32.mrf.mxu1 }
  0xdb   : > { %5822 = vmatmul.msk.bf16.gmra.mxu3 %vm905_vm2, %v6853_v50  ;;  %5887 = vmatmul.msk.bf16.gmra.mxu1 %vm905_vm2, %v7096_v19  ;;  %v1348_v50 = vsel %vm6977_vm6, %v5756_v24, %v1347_v18  ;;  %v1357_v18 = vrot.slane %v6910_v45, 5 }
  0xdc   : > { %v983_v53 = vpop.f32.mrf.mxu0  ;;  %v1427_v41 = vunpack.c.l.b16 %v1348_v50 }
  0xdd   : > { %v7104_v33 = vadd.f32 %v1224_v25, %v983_v53  ;;  %v1020_v60 = vpop.f32.mrf.mxu2 }
  0xde   : > { %v1264_v61 = vpop.f32.mrf.mxu3  ;;  %v7107_v7 = vadd.f32 %v1261_v1, %v1020_v60  ;;  %v7121_v35 = vpack.c.b16 %v1428_v23, %v1427_v41  ;;  %v1354_v1 = vrot.slane %v6877_v42, 5 }
  0xdf   : > { %5854 = vmatmul.msk.bf16.gmra.mxu0 %vm905_vm2, %v6858_v11 }
  0xe0   : > { %v1226_v49 = vpop.f32.mrf.mxu1  ;;  %9359 = vst [vmem:[#allocation23_spill] sm:$0xff] %v7121_v35  ;;  %v1356_v24 = vrot.slane %v1354_v1, 4  ;;  %v1355_v42 = vsel %vm6977_vm6, %v5757_v59, %v1354_v1 }
  0xe2   : > { %5786 = vmatmul.msk.bf16.gmra.mxu2 %vm905_vm2, %v7071_v29  ;;  %v1358_v45 = vsel %vm6977_vm6, %v1356_v24, %v1357_v18  ;;  %v6422_v18 = vld [vmem:[%s6544_s18 + $0x68] sm:$0x1] }
  0xe3   : > { %v1430_v50 = vunpack.c.l.b16 %v1358_v45  ;;  %v1364_v59 = vrot.slane %v6422_v18, 5 }
  0xe4   : > { %v985_v57 = vpop.f32.mrf.mxu0 }
  0xe5   : > { %v7117_v3 = vadd.f32 %v1226_v49, %v985_v57  ;;  %v1023_v54 = vpop.f32.mrf.mxu2  ;;  %v1429_v49 = vunpack.c.l.b16 %v1355_v42 }
  0xe6   : > { %v1266_v47 = vpop.f32.mrf.mxu3  ;;  %v7119_v22 = vadd.f32 %v1264_v61, %v1023_v54 }
  0xe7   : > { %v7146_v54 = vpack.c.b16 %v1430_v50, %v1429_v49 }
  0xe8   : > { %9358 = vst [vmem:[#allocation22_spill] sm:$0xff] %v7119_v22  ;;  %v1229_v55 = vpop.f32.mrf.mxu1  ;;  %v7238_v22 = vld [vmem:[%s6544_s18 + $0x78] sm:$0xff] }
  0xe9   : > { %9362 = vst [vmem:[#allocation26_spill] sm:$0xff] %v7146_v54 }
  0xea   : > { %9371 = vst [vmem:[#allocation35_spill] sm:$0xff] %v7238_v22 }
  0xeb   : > { %5823 = vmatmul.msk.bf16.gmra.mxu3 %vm905_vm2, %v6905_v39  ;;  %5888 = vmatmul.msk.bf16.gmra.mxu1 %vm905_vm2, %v7121_v35 }
  0xec   : > { %v988_v25 = vpop.f32.mrf.mxu0 }
  0xed   : > { %v7129_v53 = vadd.f32 %v1229_v55, %v988_v25  ;;  %v1025_v48 = vpop.f32.mrf.mxu2  ;;  %v6421_v55 = vld [vmem:[%s6544_s18 + $0x64] sm:$0xf] }
  0xee   : > { %v1269_v60 = vpop.f32.mrf.mxu3  ;;  %v7132_v61 = vadd.f32 %v1266_v47, %v1025_v48  ;;  %v1361_v1 = vrot.slane %v6421_v55, 5  ;;  %v6423_v48 = vld [vmem:[%s6544_s18 + $0x60] sm:$0xf] }
  0xef   : > { %5855 = vmatmul.msk.bf16.gmra.mxu0 %vm905_vm2, %v6912_v40 }
  0xf0   : > { %9360 = vst [vmem:[#allocation24_spill] sm:$0xff] %v7132_v61  ;;  %v1231_v39 = vpop.f32.mrf.mxu1 }
  0xf2   : > { %5787 = vmatmul.msk.bf16.gmra.mxu2 %vm905_vm2, %v7096_v19 }
  0xf4   : > { %v990_v38 = vpop.f32.mrf.mxu0 }
  0xf5   : > { %v7142_v27 = vadd.f32 %v1231_v39, %v990_v38  ;;  %v1028_v57 = vpop.f32.mrf.mxu2  ;;  %v5758_v39 = vrot.slane %v6423_v48, 9 }
  0xf6   : > { %v1271_v41 = vpop.f32.mrf.mxu3  ;;  %v7144_v23 = vadd.f32 %v1269_v60, %v1028_v57  ;;  %v1363_v60 = vrot.slane %v1361_v1, 4  ;;  %v6352_v57 = vld [vmem:[%s9258_s1 + $0xc8] sm:$0xff] }
  0xf7   : > { %2181 = vmatpush.bf16.msra.mxu2 %v6352_v57 }
  0xf8   : > { %9361 = vst [vmem:[#allocation25_spill] sm:$0xff] %v7144_v23  ;;  %v1234_v47 = vpop.f32.mrf.mxu1  ;;  %v1365_v50 = vsel %vm6977_vm6, %v1363_v60, %v1364_v59  ;;  %v7181_v23 = vld [vmem:[%s6544_s18 + $0x60] sm:$0xff] }
  0xf9   : > { %9366 = vst [vmem:[#allocation30_spill] sm:$0xff] %v7181_v23 }
  0xfb   : > { %5824 = vmatmul.msk.bf16.gmra.mxu3 %vm905_vm2, %v6959_v51  ;;  %5889 = vmatmul.msk.bf16.gmra.mxu1 %vm905_vm2, %v7146_v54  ;;  %v1362_v51 = vsel %vm6977_vm6, %v5758_v39, %v1361_v1  ;;  %v1432_v1 = vunpack.c.l.b16 %v1365_v50 }
  0xfc   : > { %v993_v25 = vpop.f32.mrf.mxu0  ;;  %v1431_v55 = vunpack.c.l.b16 %v1362_v51 }
  0xfd   : > { %v7154_v24 = vadd.f32 %v1234_v47, %v993_v25  ;;  %v1030_v42 = vpop.f32.mrf.mxu2 }
  0xfe   : > { %v1274_v45 = vpop.f32.mrf.mxu3  ;;  %v7157_v38 = vadd.f32 %v1271_v41, %v1030_v42  ;;  %v6356_v41 = vld [vmem:[%s9258_s1 + $0xe8] sm:$0xff]  ;;  %v7177_v39 = vpack.c.b16 %v1432_v1, %v1431_v55  ;;  %v6424_v42 = vld [vmem:[%s6544_s18 + $0x70] sm:$0xf] }
  0xff   : > { %5856 = vmatmul.msk.bf16.gmra.mxu0 %vm905_vm2, %v6967_v37  ;;  %2356 = vmatpush.bf16.msra.mxu3 %v6356_v41  ;;  %v6427_v41 = vld [vmem:[%s6544_s18 + $0x6c] sm:$0xf] }
 0x100   : > { %9363 = vst [vmem:[#allocation27_spill] sm:$0xff] %v7157_v38  ;;  %v1236_v49 = vpop.f32.mrf.mxu1  ;;  %v1368_v38 = vrot.slane %v6424_v42, 5 }
 0x101   : > { %9365 = vst [vmem:[#allocation29_spill] sm:$0xff] %v7177_v39 }
 0x102   : > { %5788 = vmatmul.msk.bf16.gmra.mxu2 %vm905_vm2, %v7121_v35  ;;  %v1370_v55 = vrot.slane %v1368_v38, 4  ;;  %v6436_v35 = vld [vmem:[%s6544_s18 + $0x94] sm:$0xf] }
 0x104   : > { %v995_v47 = vpop.f32.mrf.mxu0 }
 0x105   : > { %v7173_v25 = vadd.f32 %v1236_v49, %v995_v47  ;;  %v1033_v18 = vpop.f32.mrf.mxu2  ;;  %v6426_v49 = vld [vmem:[%s6544_s18 + $0x74] sm:$0x1]  ;;  %v5759_v47 = vrot.slane %v6427_v41, 9 }
 0x106   : > { %v1276_v59 = vpop.f32.mrf.mxu3  ;;  %v7175_v48 = vadd.f32 %v1274_v45, %v1033_v18  ;;  %v1371_v50 = vrot.slane %v6426_v49, 5  ;;  %v6360_v45 = vld [vmem:[%s9258_s1 + $0x108] sm:$0xff] }
 0x107   : > { %2515 = vmatpush.bf16.msra.mxu0 %v6360_v45 }
 0x108   : > { %9364 = vst [vmem:[#allocation28_spill] sm:$0xff] %v7175_v48  ;;  %v1239_v60 = vpop.f32.mrf.mxu1 }
 0x10b   : > { %5825 = vmatmul.msk.bf16.gmra.mxu3 %vm905_vm2, %v7181_v23  ;;  %5890 = vmatmul.msk.bf16.gmra.mxu1 %vm905_vm2, %v7177_v39 }
 0x10c   : > { %v998_v51 = vpop.f32.mrf.mxu0 }
 0x10d   : > { %v7188_v57 = vadd.f32 %v1239_v60, %v998_v51  ;;  %v1035_v1 = vpop.f32.mrf.mxu2  ;;  %v1369_v60 = vsel %vm6977_vm6, %v5759_v47, %v1368_v38  ;;  %v1372_v51 = vsel %vm6977_vm6, %v1370_v55, %v1371_v50  ;;  %v6428_v47 = vld [vmem:[%s6544_s18 + $0x7c] sm:$0xf]  ;;  %v7212_v50 = vld [vmem:[%s6544_s18 + $0x6c] sm:$0xff] }
 0x10e   : > { %v1279_v18 = vpop.f32.mrf.mxu3  ;;  %v7194_v42 = vadd.f32 %v1276_v59, %v1035_v1  ;;  %v1433_v59 = vunpack.c.l.b16 %v1369_v60  ;;  %v1434_v1 = vunpack.c.l.b16 %v1372_v51  ;;  %v1375_v61 = vrot.slane %v6428_v47, 5  ;;  %9369 = vst [vmem:[#allocation33_spill] sm:$0xff] %v7212_v50  ;;  %v6431_v51 = vld [vmem:[%s6544_s18 + $0x78] sm:$0xf] }
 0x10f   : > { %5857 = vmatmul.msk.bf16.gmra.mxu0 %vm905_vm2, %v6614_v20 }
 0x110   : > { %9367 = vst [vmem:[#allocation31_spill] sm:$0xff] %v7194_v42  ;;  %v1241_v49 = vpop.f32.mrf.mxu1  ;;  %v7208_v20 = vpack.c.b16 %v1434_v1, %v1433_v59 }
 0x112   : > { %5789 = vmatmul.msk.bf16.gmra.mxu2 %vm905_vm2, %v7146_v54 }
 0x114   : > { %v1000_v41 = vpop.f32.mrf.mxu0 }
 0x115   : > { %v7204_v42 = vadd.f32 %v1241_v49, %v1000_v41  ;;  %v1038_v48 = vpop.f32.mrf.mxu2  ;;  %v6430_v49 = vld [vmem:[%s6544_s18 + $0x80] sm:$0x1]  ;;  %v5760_v41 = vrot.slane %v6431_v51, 9 }
 0x116   : > { %v1281_v45 = vpop.f32.mrf.mxu3  ;;  %v7206_v23 = vadd.f32 %v1279_v18, %v1038_v48  ;;  %v1378_v60 = vrot.slane %v6430_v49, 5  ;;  %v1377_v48 = vrot.slane %v1375_v61, 4 }
 0x118   : > { %9368 = vst [vmem:[#allocation32_spill] sm:$0xff] %v7206_v23  ;;  %v2031_v38 = vpop.f32.mrf.mxu1  ;;  %v1376_v23 = vsel %vm6977_vm6, %v5760_v41, %v1375_v61  ;;  %v6432_v41 = vld [vmem:[%s6544_s18 + $0x88] sm:$0xf] }
 0x119   : > { %v1435_v51 = vunpack.c.l.b16 %v1376_v23 }
 0x11b   : > { %5826 = vmatmul.msk.bf16.gmra.mxu3 %vm905_vm2, %v7212_v50  ;;  %5891 = vmatmul.msk.bf16.gmra.mxu1 %vm905_vm2, %v7208_v20  ;;  %v1379_v50 = vsel %vm6977_vm6, %v1377_v48, %v1378_v60  ;;  %v6366_v60 = vld [vmem:[%s9262_s5 + $0x18] sm:$0xff]  ;;  %v1382_v48 = vrot.slane %v6432_v41, 5 }
 0x11c   : > { %v1872_v55 = vpop.f32.mrf.mxu0  ;;  %v1436_v54 = vunpack.c.l.b16 %v1379_v50  ;;  %3849 = vmatpush.bf16.msra.mxu1 %v6366_v60 }
 0x11d   : > { %v1040_v18 = vpop.f32.mrf.mxu2 }
 0x11e   : > { %v1697_v59 = vpop.f32.mrf.mxu3  ;;  %v7220_v1 = vadd.f32 %v1281_v45, %v1040_v18 }
 0x11f   : > { %5858 = vmatmul.msk.bf16.gmra.mxu0 %vm905_vm2, %v6663_v14  ;;  %v7231_v14 = vpack.c.b16 %v1436_v54, %v1435_v51  ;;  %v1384_v51 = vrot.slane %v1382_v48, 4 }
 0x120   : > { %9370 = vst [vmem:[#allocation34_spill] sm:$0xff] %v7220_v1  ;;  %v2033_v47 = vpop.f32.mrf.mxu1 }
 0x122   : > { %5790 = vmatmul.msk.bf16.gmra.mxu2 %vm905_vm2, %v7177_v39 }
 0x124   : > { %v1874_v49 = vpop.f32.mrf.mxu0 }
 0x125   : > { %v1544_v45 = vpop.f32.mrf.mxu2 }
 0x126   : > { %v1699_v18 = vpop.f32.mrf.mxu3  ;;  %v1624_v1 = vadd.f32 %v1544_v45, %v6998_v6  ;;  %v6434_v6 = vld [vmem:[%s6544_s18 + $0x8c] sm:$0x1] }
 0x127   : > { %v1385_v54 = vrot.slane %v6434_v6, 5 }
 0x128   : > { %v1777_v37 = vadd.f32 %v1697_v59, %v1624_v1  ;;  %v2036_v61 = vpop.f32.mrf.mxu1  ;;  %v6435_v59 = vld [vmem:[%s6544_s18 + $0x84] sm:$0xf] }
 0x129   : > { %v5761_v1 = vrot.slane %v6435_v59, 9 }
 0x12a   : > { %v1952_v39 = vadd.f32 %v1872_v55, %v1777_v37 }
 0x12b   : > { %5827 = vmatmul.msk.bf16.gmra.mxu3 %vm905_vm2, %v7238_v22  ;;  %5892 = vmatmul.msk.bf16.gmra.mxu1 %vm905_vm2, %v7231_v14  ;;  %v1383_v22 = vsel %vm6977_vm6, %v5761_v1, %v1382_v48 }
 0x12c   : > { %v1877_v23 = vpop.f32.mrf.mxu0  ;;  %v7245_v50 = vadd.f32 %v2031_v38, %v1952_v39  ;;  %v1386_v39 = vsel %vm6977_vm6, %v1384_v51, %v1385_v54  ;;  %v1437_v59 = vunpack.c.l.b16 %v1383_v22  ;;  %v1389_v54 = vrot.slane %v6436_v35, 5  ;;  %v9373_v22 = vld [vmem:[#allocation6_spill] sm:$0xff]  ;;  %v9375_v35 = vld [vmem:[#allocation7_spill] sm:$0xff] }
 0x12d   : > { %v1546_v45 = vpop.f32.mrf.mxu2 }
 0x12e   : > { %9372 = vst [vmem:[#allocation36_spill] sm:$0xff] %v7245_v50  ;;  %v1702_v41 = vpop.f32.mrf.mxu3  ;;  %v1625_v37 = vadd.f32 %v1546_v45, %v7009_v58  ;;  %v1438_v50 = vunpack.c.l.b16 %v1386_v39  ;;  %v6437_v39 = vld [vmem:[%s6544_s18 + $0x90] sm:$0xf] }
 0x12f   : > { %5859 = vmatmul.msk.bf16.gmra.mxu0 %vm905_vm2, %v6703_v8 }
 0x130   : > { %v1778_v55 = vadd.f32 %v1699_v18, %v1625_v37  ;;  %v2038_v60 = vpop.f32.mrf.mxu1  ;;  %v7260_v8 = vpack.c.b16 %v1438_v50, %v1437_v59  ;;  %v1391_v50 = vrot.slane %v1389_v54, 4 }
 0x132   : > { %5791 = vmatmul.msk.bf16.gmra.mxu2 %vm905_vm2, %v7208_v20  ;;  %v1953_v38 = vadd.f32 %v1874_v49, %v1778_v55 }
 0x134   : > { %v1879_v6 = vpop.f32.mrf.mxu0  ;;  %v7257_v58 = vadd.f32 %v2033_v47, %v1953_v38  ;;  %v1392_v47 = vrot.slane %v9373_v22, 5 }
 0x135   : > { %v1549_v45 = vpop.f32.mrf.mxu2 }
 0x136   : > { %v1704_v18 = vpop.f32.mrf.mxu3  ;;  %v1626_v37 = vadd.f32 %v1549_v45, %v7020_v26  ;;  %v5762_v26 = vrot.slane %v6437_v39, 9 }
 0x138   : > { %v1779_v48 = vadd.f32 %v1702_v41, %v1626_v37  ;;  %v2041_v1 = vpop.f32.mrf.mxu1  ;;  %v1390_v45 = vsel %vm6977_vm6, %v5762_v26, %v1389_v54  ;;  %v1393_v37 = vsel %vm6977_vm6, %v1391_v50, %v1392_v47 }
 0x139   : > { %v1440_v22 = vunpack.c.l.b16 %v1393_v37 }
 0x13a   : > { %v1954_v51 = vadd.f32 %v1877_v23, %v1779_v48  ;;  %v6351_v48 = vld [vmem:[%s9258_s1 + $0xc0] sm:$0xff] }
 0x13b   : > { %5828 = vmatmul.msk.bf16.gmra.mxu3 %vm905_vm2, %v6733_v44  ;;  %5893 = vmatmul.msk.bf16.gmra.mxu1 %vm905_vm2, %v7260_v8 }
 0x13c   : > { %v1882_v49 = vpop.f32.mrf.mxu0  ;;  %v7268_v55 = vadd.f32 %v2036_v61, %v1954_v51  ;;  %v1439_v51 = vunpack.c.l.b16 %v1390_v45  ;;  %2182 = vmatpush.bf16.msra.mxu2 %v6351_v48 }
 0x13d   : > { %v1551_v38 = vpop.f32.mrf.mxu2 }
 0x13e   : > { %9374 = vst [vmem:[#allocation6_spill] sm:$0xff] %v7268_v55  ;;  %v1707_v41 = vpop.f32.mrf.mxu3  ;;  %v1627_v59 = vadd.f32 %v1551_v38, %v7033_v46 }
 0x13f   : > { %5860 = vmatmul.msk.bf16.gmra.mxu0 %vm905_vm2, %v9375_v35 }
 0x140   : > { %v1780_v23 = vadd.f32 %v1704_v18, %v1627_v59  ;;  %v2043_v44 = vpop.f32.mrf.mxu1  ;;  %v6355_v18 = vld [vmem:[%s9258_s1 + $0xe0] sm:$0xff] }
 0x141   : > { %2357 = vmatpush.bf16.msra.mxu3 %v6355_v18  ;;  %v9377_v59 = vld [vmem:[#allocation8_spill] sm:$0xff] }
 0x142   : > { %5792 = vmatmul.msk.bf16.gmra.mxu2 %vm905_vm2, %v7231_v14  ;;  %v1955_v61 = vadd.f32 %v1879_v6, %v1780_v23  ;;  %v7289_v6 = vpack.c.b16 %v1440_v22, %v1439_v51  ;;  %v1396_v23 = vrot.slane %v9377_v59, 5 }
 0x144   : > { %v1884_v46 = vpop.f32.mrf.mxu0  ;;  %v7283_v39 = vadd.f32 %v2038_v60, %v1955_v61  ;;  %v9378_v60 = vld [vmem:[#allocation9_spill] sm:$0xff]  ;;  %v9379_v61 = vld [vmem:[#allocation10_spill] sm:$0xff]  ;;  %v1398_v22 = vrot.slane %v1396_v23, 4 }
 0x145   : > { %v1554_v54 = vpop.f32.mrf.mxu2  ;;  %v1399_v48 = vrot.slane %v9379_v61, 5 }
 0x146   : > { %9376 = vst [vmem:[#allocation7_spill] sm:$0xff] %v7283_v39  ;;  %v1709_v47 = vpop.f32.mrf.mxu3  ;;  %v1628_v26 = vadd.f32 %v1554_v54, %v7044_v16  ;;  %v6359_v16 = vld [vmem:[%s9258_s1 + $0x100] sm:$0xff] }
 0x147   : > { %2516 = vmatpush.bf16.msra.mxu0 %v6359_v16 }
 0x148   : > { %v1781_v50 = vadd.f32 %v1707_v41, %v1628_v26  ;;  %v2046_v38 = vpop.f32.mrf.mxu1  ;;  %v6438_v41 = vld [vmem:[%s6544_s18 + $0x9c] sm:$0xf] }
 0x149   : > { %v5763_v51 = vrot.slane %v6438_v41, 9  ;;  %v9381_v26 = vld [vmem:[#allocation11_spill] sm:$0xff] }
 0x14a   : > { %v1956_v45 = vadd.f32 %v1882_v49, %v1781_v50 }
 0x14b   : > { %5829 = vmatmul.msk.bf16.gmra.mxu3 %vm905_vm2, %v9378_v60  ;;  %5894 = vmatmul.msk.bf16.gmra.mxu1 %vm905_vm2, %v7289_v6 }
 0x14c   : > { %v1887_v37 = vpop.f32.mrf.mxu0  ;;  %v7297_v39 = vadd.f32 %v2041_v1, %v1956_v45  ;;  %v1397_v1 = vsel %vm6977_vm6, %v5763_v51, %v1396_v23  ;;  %v1400_v45 = vsel %vm6977_vm6, %v1398_v22, %v1399_v48  ;;  %v9382_v51 = vld [vmem:[#allocation13_spill] sm:$0xff]  ;;  %v9383_v22 = vld [vmem:[#allocation14_spill] sm:$0xff] }
 0x14d   : > { %v1556_v18 = vpop.f32.mrf.mxu2  ;;  %v1441_v41 = vunpack.c.l.b16 %v1397_v1  ;;  %v1403_v55 = vrot.slane %v9382_v51, 5 }
 0x14e   : > { %9380 = vst [vmem:[#allocation8_spill] sm:$0xff] %v7297_v39  ;;  %v1712_v49 = vpop.f32.mrf.mxu3  ;;  %v1629_v54 = vadd.f32 %v1556_v18, %v7064_v52  ;;  %v1442_v39 = vunpack.c.l.b16 %v1400_v45  ;;  %v9386_v45 = vld [vmem:[#allocation12_spill] sm:$0xff] }
 0x14f   : > { %5861 = vmatmul.msk.bf16.gmra.mxu0 %vm905_vm2, %v9381_v26 }
 0x150   : > { %v1782_v50 = vadd.f32 %v1709_v47, %v1629_v54  ;;  %v2048_v59 = vpop.f32.mrf.mxu1  ;;  %v7315_v16 = vpack.c.b16 %v1442_v39, %v1441_v41  ;;  %v1405_v39 = vrot.slane %v1403_v55, 4 }
 0x152   : > { %5793 = vmatmul.msk.bf16.gmra.mxu2 %vm905_vm2, %v7260_v8  ;;  %v1957_v60 = vadd.f32 %v1884_v46, %v1782_v50 }
 0x154   : > { %v1889_v61 = vpop.f32.mrf.mxu0  ;;  %v7312_v52 = vadd.f32 %v2043_v44, %v1957_v60  ;;  %v9384_v44 = vld [vmem:[#allocation15_spill] sm:$0xff] }
 0x155   : > { %v1559_v18 = vpop.f32.mrf.mxu2  ;;  %v1406_v50 = vrot.slane %v9384_v44, 5 }
 0x156   : > { %v1714_v26 = vpop.f32.mrf.mxu3  ;;  %v1630_v47 = vadd.f32 %v1559_v18, %v7079_v30  ;;  %v5764_v30 = vrot.slane %v9386_v45, 9  ;;  %v9387_v18 = vld [vmem:[#allocation16_spill] sm:$0xff] }
 0x158   : > { %v1783_v54 = vadd.f32 %v1712_v49, %v1630_v47  ;;  %v2051_v23 = vpop.f32.mrf.mxu1 }
 0x15a   : > { %v1958_v48 = vadd.f32 %v1887_v37, %v1783_v54  ;;  %v1404_v54 = vsel %vm6977_vm6, %v5764_v30, %v1403_v55 }
 0x15b   : > { %5830 = vmatmul.msk.bf16.gmra.mxu3 %vm905_vm2, %v9383_v22  ;;  %5895 = vmatmul.msk.bf16.gmra.mxu1 %vm905_vm2, %v7315_v16  ;;  %v1443_v22 = vunpack.c.l.b16 %v1404_v54 }
 0x15c   : > { %v1892_v46 = vpop.f32.mrf.mxu0  ;;  %v7323_v1 = vadd.f32 %v2046_v38, %v1958_v48  ;;  %v1407_v38 = vsel %vm6977_vm6, %v1405_v39, %v1406_v50 }
 0x15d   : > { %v1561_v60 = vpop.f32.mrf.mxu2  ;;  %v1444_v44 = vunpack.c.l.b16 %v1407_v38 }
 0x15e   : > { %9385 = vst [vmem:[#allocation9_spill] sm:$0xff] %v7323_v1  ;;  %v1717_v49 = vpop.f32.mrf.mxu3  ;;  %v1631_v41 = vadd.f32 %v1561_v60, %v7092_v13 }
 0x15f   : > { %5862 = vmatmul.msk.bf16.gmra.mxu0 %vm905_vm2, %v9387_v18 }
 0x160   : > { %v1784_v37 = vadd.f32 %v1714_v26, %v1631_v41  ;;  %v7329_v47 = vpop.f32.mrf.mxu1  ;;  %v7340_v41 = vpack.c.b16 %v1444_v44, %v1443_v22 }
 0x161   : > { %9388 = vst [vmem:[#allocation10_spill] sm:$0xff] %v7329_v47  ;;  %v9390_v47 = vld [vmem:[#allocation18_spill] sm:$0xff] }
 0x162   : > { %5794 = vmatmul.msk.bf16.gmra.mxu2 %vm905_vm2, %v7289_v6  ;;  %v1959_v51 = vadd.f32 %v1889_v61, %v1784_v37  ;;  %v1410_v50 = vrot.slane %v9390_v47, 5 }
 0x164   : > { %v1894_v48 = vpop.f32.mrf.mxu0  ;;  %v7337_v13 = vadd.f32 %v2048_v59, %v1959_v51  ;;  %v1413_v59 = vrot.slane %v6920_v15, 5  ;;  %v1412_v38 = vrot.slane %v1410_v50, 4 }
 0x165   : > { %v1564_v45 = vpop.f32.mrf.mxu2 }
 0x166   : > { %9389 = vst [vmem:[#allocation13_spill] sm:$0xff] %v7337_v13  ;;  %v1719_v60 = vpop.f32.mrf.mxu3  ;;  %v1632_v26 = vadd.f32 %v1564_v45, %v7104_v33  ;;  %v9392_v33 = vld [vmem:[#allocation17_spill] sm:$0xff]  ;;  %v1414_v15 = vsel %vm6977_vm6, %v1412_v38, %v1413_v59 }
 0x167   : > { %v5765_v54 = vrot.slane %v9392_v33, 9 }
 0x168   : > { %v1785_v55 = vadd.f32 %v1717_v49, %v1632_v26  ;;  %v2056_v30 = vpop.f32.mrf.mxu1 }
 0x169   : > { %v1411_v44 = vsel %vm6977_vm6, %v5765_v54, %v1410_v50 }
 0x16a   : > { %v1960_v39 = vadd.f32 %v1892_v46, %v1785_v55 }
 0x16b   : > { %5831 = vmatmul.msk.bf16.gmra.mxu3 %vm905_vm2, %v6900_v31  ;;  %5896 = vmatmul.msk.bf16.gmra.mxu1 %vm905_vm2, %v7340_v41  ;;  %v328_v31 = vld [vmem:[%s6544_s18 + $0xc0] sm:$0xf] }
 0x16c   : > { %v1897_v61 = vpop.f32.mrf.mxu0  ;;  %v7348_v37 = vadd.f32 %v2051_v23, %v1960_v39  ;;  %v329_v23 = vld [vmem:[%s6544_s18 + $0xc4] sm:$0xf]  ;;  %v1813_v26 = vshll.u32 %v328_v31, 16  ;;  %v1445_v39 = vunpack.c.l.b16 %v1411_v44 }
 0x16d   : > { %v1566_v49 = vpop.f32.mrf.mxu2  ;;  %v1819_v33 = vshll.u32 %v329_v23, 16 }
 0x16e   : > { %9391 = vst [vmem:[#allocation14_spill] sm:$0xff] %v7348_v37  ;;  %v1722_v51 = vpop.f32.mrf.mxu3  ;;  %v1633_v47 = vadd.f32 %v1566_v49, %v7117_v3  ;;  %v1810_v3 = vshrl.u32 %v328_v31, 16  ;;  %v1823_v49 = vshrl.u32 %v329_v23, 16  ;;  %v1815_v38 = vrot.slane %v1813_v26, 5 }
 0x16f   : > { %5863 = vmatmul.msk.bf16.gmra.mxu0 %vm905_vm2, %v6927_v28  ;;  %v1821_v13 = vrot.slane %v1819_v33, 5  ;;  %v1987_v28 = vrot.slane %v329_v23, 5  ;;  %v5866_v26 = vrot.slane %v328_v31, 9 }
 0x170   : > { %v1786_v46 = vadd.f32 %v1719_v60, %v1633_v47  ;;  %v7355_v22 = vpop.f32.mrf.mxu1  ;;  %v1446_v60 = vunpack.c.l.b16 %v1414_v15  ;;  %v1812_v54 = vrot.slane %v1810_v3, 4 }
 0x171   : > { %9393 = vst [vmem:[#allocation15_spill] sm:$0xff] %v7355_v22  ;;  %v1825_v22 = vrot.slane %v1823_v49, 4 }
 0x172   : > { %5795 = vmatmul.msk.bf16.gmra.mxu2 %vm905_vm2, %v7315_v16  ;;  %v7364_v45 = vadd.f32 %v1894_v48, %v1786_v46  ;;  %v7367_v59 = vpack.c.b16 %v1446_v60, %v1445_v39  ;;  %v1816_v15 = vor.u32 %v1815_v38, %v1812_v54  ;;  %v1989_v60 = vrot.slane %v1987_v28, 4 }
 0x174   : > { %9394 = vst [vmem:[#allocation12_spill] sm:$0xff] %v7364_v45  ;;  %v1899_v55 = vpop.f32.mrf.mxu0  ;;  %v330_v45 = vld [vmem:[%s6544_s18 + $0xc8] sm:$0x1] }
 0x175   : > { %v1569_v47 = vpop.f32.mrf.mxu2  ;;  %v1829_v3 = vshll.u32 %v330_v45, 16  ;;  %v1990_v33 = vrot.slane %v330_v45, 5 }
 0x176   : > { %v1724_v37 = vpop.f32.mrf.mxu3  ;;  %v1634_v50 = vadd.f32 %v1569_v47, %v7129_v53  ;;  %v1826_v53 = vor.u32 %v1825_v22, %v1821_v13 }
 0x177   : > { %v1831_v47 = vrot.slane %v1829_v3, 5 }
 0x178   : > { %v1787_v48 = vadd.f32 %v1722_v51, %v1634_v50  ;;  %v2061_v46 = vpop.f32.mrf.mxu1 }
 0x17a   : > { %v1962_v1 = vadd.f32 %v1897_v61, %v1787_v48  ;;  %v1827_v61 = vrot.slane %v1826_v53, 4  ;;  %v6325_v53 = vld [vmem:[%s6544_s18 + $0xc0] sm:$0xff] }
 0x17b   : > { %5832 = vmatmul.msk.bf16.gmra.mxu3 %vm905_vm2, %v6949_v63  ;;  %5897 = vmatmul.msk.bf16.gmra.mxu1 %vm905_vm2, %v7367_v59  ;;  %v1817_v63 = vrot.slane %v1816_v15, 4 }
 0x17c   : > { %v1902_v44 = vpop.f32.mrf.mxu0  ;;  %v7374_v39 = vadd.f32 %v2056_v30, %v1962_v1  ;;  %v1988_v1 = vsel %vm6977_vm6, %v5866_v26, %v1987_v28  ;;  %v1991_v30 = vsel %vm6977_vm6, %v1989_v60, %v1990_v33 }
 0x17d   : > { %v1571_v51 = vpop.f32.mrf.mxu2  ;;  %v1822_v22 = vsel %vm6584_vm3, %v1817_v63, %v1821_v13  ;;  %v1992_v45 = vunpack.c.l.b16 %v1988_v1  ;;  %v1993_v38 = vunpack.c.l.b16 %v1991_v30 }
 0x17e   : > { %v1727_v49 = vpop.f32.mrf.mxu3  ;;  %v1635_v23 = vadd.f32 %v1571_v51, %v7142_v27  ;;  %v1833_v3 = vunpack.c.l.b16 %v1822_v22 }
 0x17f   : > { %5864 = vmatmul.msk.bf16.gmra.mxu0 %vm905_vm2, %v6975_v34  ;;  %v7395_v60 = vpack.c.b16 %v1993_v38, %v1992_v45 }
 0x180   : > { %v1788_v50 = vadd.f32 %v1724_v37, %v1635_v23  ;;  %v7379_v54 = vpop.f32.mrf.mxu1  ;;  %v1832_v37 = vsel %vm6584_vm3, %v1827_v61, %v1831_v47 }
 0x181   : > { %v1834_v26 = vunpack.c.l.b16 %v1832_v37 }
 0x182   : > { %5796 = vmatmul.msk.bf16.gmra.mxu2 %vm905_vm2, %v7340_v41  ;;  %v7387_v27 = vadd.f32 %v1899_v55, %v1788_v50 }
 0x183   : > { %v7398_v13 = vpack.c.b16 %v1834_v26, %v1833_v3 }
 0x184   : > { %v1904_v31 = vpop.f32.mrf.mxu0 }
 0x185   : > { %v1574_v48 = vpop.f32.mrf.mxu2 }
 0x186   : > { %v1729_v15 = vpop.f32.mrf.mxu3  ;;  %v1636_v28 = vadd.f32 %v1574_v48, %v7154_v24 }
 0x188   : > { %v1789_v55 = vadd.f32 %v1727_v49, %v1636_v28  ;;  %v2066_v33 = vpop.f32.mrf.mxu1 }
 0x18a   : > { %v1964_v51 = vadd.f32 %v1902_v44, %v1789_v55 }
 0x18b   : > { %5833 = vmatmul.msk.bf16.gmra.mxu3 %vm905_vm2, %v6325_v53  ;;  %5898 = vmatmul.msk.bf16.gmra.mxu1 %vm905_vm2, %v7395_v60 }
 0x18c   : > { %v1907_v23 = vpop.f32.mrf.mxu0  ;;  %v7402_v63 = vadd.f32 %v2061_v46, %v1964_v51 }
 0x18d   : > { %v1576_v61 = vpop.f32.mrf.mxu2 }
 0x18e   : > { %v1732_v24 = vpop.f32.mrf.mxu3  ;;  %v1637_v47 = vadd.f32 %v1576_v61, %v7173_v25 }
 0x18f   : > { %5865 = vmatmul.msk.bf16.gmra.mxu0 %vm905_vm2, %v7398_v13 }
 0x190   : > { %v1790_v49 = vadd.f32 %v1729_v15, %v1637_v47  ;;  %v7407_v50 = vpop.f32.mrf.mxu1 }
 0x192   : > { %5797 = vmatmul.msk.bf16.gmra.mxu2 %vm905_vm2, %v7367_v59  ;;  %v7411_v44 = vadd.f32 %v1904_v31, %v1790_v49 }
 0x194   : > { %v1909_v1 = vpop.f32.mrf.mxu0 }
 0x195   : > { %v1579_v30 = vpop.f32.mrf.mxu2 }
 0x196   : > { %v1734_v46 = vpop.f32.mrf.mxu3  ;;  %v1638_v22 = vadd.f32 %v1579_v30, %v7188_v57  ;;  %v6439_v57 = vld [vmem:[%s6544_s18 + $0x18] sm:$0xff] }
 0x198   : > { %v1791_v37 = vadd.f32 %v1732_v24, %v1638_v22  ;;  %v2071_v45 = vpop.f32.mrf.mxu1  ;;  %v6440_v22 = vld [vmem:[%s6544_s18 + $0x24] sm:$0xff] }
 0x19a   : > { %v1966_v25 = vadd.f32 %v1907_v23, %v1791_v37 }
 0x19b   : > { %5951 = vmatmul.msk.bf16.vlgmr.msra.gmra.mxu3 %vm905_vm2, %v6694_v56 }
 0x19c   : > { %v1912_v38 = vpop.f32.mrf.mxu0  ;;  %v7416_v48 = vadd.f32 %v2066_v33, %v1966_v25 }
 0x19d   : > { %v1581_v15 = vpop.f32.mrf.mxu2 }
 0x19e   : > { %v1737_v28 = vpop.f32.mrf.mxu3  ;;  %v1639_v31 = vadd.f32 %v1581_v15, %v7204_v42 }
 0x19f   : > { %5984 = vmatmul.msk.bf16.vlgmr.msra.gmra.mxu0 %vm905_vm2, %v7013_v21  ;;  %v6365_v21 = vld [vmem:[%s9262_s5 + $0x10] sm:$0xff] }
 0x1a0   : > { %v1792_v53 = vadd.f32 %v1734_v46, %v1639_v31  ;;  %v7421_v3 = vpop.f32.mrf.mxu1  ;;  %3850 = vmatpush.bf16.msra.mxu1 %v6365_v21 }
 0x1a2   : > { %5919 = vmatmul.msk.bf16.vlgmr.msra.gmra.mxu2 %vm905_vm2, %v6439_v57  ;;  %v7425_v26 = vadd.f32 %v1909_v1, %v1792_v53 }
 0x1a4   : > { %v1914_v55 = vpop.f32.mrf.mxu0 }
 0x1a5   : > { %v1584_v56 = vpop.f32.mrf.mxu2 }
 0x1a6   : > { %v1739_v51 = vpop.f32.mrf.mxu3  ;;  %v1640_v33 = vadd.f32 %v1584_v56, %v7011_v0 }
 0x1a8   : > { %v1793_v23 = vadd.f32 %v1737_v28, %v1640_v33  ;;  %v2076_v61 = vpop.f32.mrf.mxu1 }
 0x1aa   : > { %v1968_v42 = vadd.f32 %v1912_v38, %v1793_v23 }
 0x1ab   : > { %5952 = vmatmul.msk.bf16.gmra.mxu3 %vm905_vm2, %v6745_v62 }
 0x1ac   : > { %v1917_v24 = vpop.f32.mrf.mxu0  ;;  %v7433_v47 = vadd.f32 %v2071_v45, %v1968_v42 }
 0x1ad   : > { %v1586_v49 = vpop.f32.mrf.mxu2 }
 0x1ae   : > { %v1742_v1 = vpop.f32.mrf.mxu3  ;;  %v1641_v30 = vadd.f32 %v1586_v49, %v7024_v5 }
 0x1af   : > { %5985 = vmatmul.msk.bf16.gmra.mxu0 %vm905_vm2, %v7037_v32 }
 0x1b0   : > { %v1794_v0 = vadd.f32 %v1739_v51, %v1641_v30  ;;  %v7438_v46 = vpop.f32.mrf.mxu1 }
 0x1b2   : > { %5920 = vmatmul.msk.bf16.gmra.mxu2 %vm905_vm2, %v6440_v22  ;;  %v7442_v37 = vadd.f32 %v1914_v55, %v1794_v0 }
 0x1b4   : > { %v1919_v62 = vpop.f32.mrf.mxu0 }
 0x1b5   : > { %v1589_v25 = vpop.f32.mrf.mxu2 }
 0x1b6   : > { %v1744_v45 = vpop.f32.mrf.mxu3  ;;  %v1642_v38 = vadd.f32 %v1589_v25, %v7035_v2  ;;  %v6441_v2 = vld [vmem:[%s6544_s18 + $0x30] sm:$0xff] }
 0x1b8   : > { %v1795_v15 = vadd.f32 %v1742_v1, %v1642_v38  ;;  %v2081_v28 = vpop.f32.mrf.mxu1 }
 0x1ba   : > { %v1970_v5 = vadd.f32 %v1917_v24, %v1795_v15 }
 0x1bb   : > { %5953 = vmatmul.msk.bf16.gmra.mxu3 %vm905_vm2, %v6798_v10 }
 0x1bc   : > { %v1922_v32 = vpop.f32.mrf.mxu0  ;;  %v7447_v31 = vadd.f32 %v2076_v61, %v1970_v5 }
 0x1bd   : > { %v1591_v53 = vpop.f32.mrf.mxu2 }
 0x1be   : > { %v1747_v57 = vpop.f32.mrf.mxu3  ;;  %v1643_v55 = vadd.f32 %v1591_v53, %v7048_v9 }
 0x1bf   : > { %5986 = vmatmul.msk.bf16.gmra.mxu0 %vm905_vm2, %v7071_v29 }
 0x1c0   : > { %v1796_v56 = vadd.f32 %v1744_v45, %v1643_v55  ;;  %v7452_v51 = vpop.f32.mrf.mxu1 }
 0x1c1   : > { %9395 = vst [vmem:[#allocation16_spill] sm:$0xff] %v7452_v51 }
 0x1c2   : > { %5921 = vmatmul.msk.bf16.gmra.mxu2 %vm905_vm2, %v6441_v2  ;;  %v7456_v33 = vadd.f32 %v1919_v62, %v1796_v56  ;;  %v6442_v62 = vld [vmem:[%s6544_s18 + $0x3c] sm:$0xff] }
 0x1c3   : > { %v9400_v56 = vld [vmem:[#allocation23_spill] sm:$0xff] }
 0x1c4   : > { %v1924_v10 = vpop.f32.mrf.mxu0 }
 0x1c5   : > { %v1594_v23 = vpop.f32.mrf.mxu2 }
 0x1c6   : > { %v1749_v61 = vpop.f32.mrf.mxu3  ;;  %v1644_v21 = vadd.f32 %v1594_v23, %v7066_v43 }
 0x1c8   : > { %v1797_v42 = vadd.f32 %v1747_v57, %v1644_v21  ;;  %v2086_v24 = vpop.f32.mrf.mxu1  ;;  %v9402_v21 = vld [vmem:[#allocation22_spill] sm:$0xff] }
 0x1ca   : > { %v1972_v9 = vadd.f32 %v1922_v32, %v1797_v42 }
 0x1cb   : > { %5954 = vmatmul.msk.bf16.gmra.mxu3 %vm905_vm2, %v6858_v11 }
 0x1cc   : > { %v1927_v29 = vpop.f32.mrf.mxu0  ;;  %v7461_v49 = vadd.f32 %v2081_v28, %v1972_v9 }
 0x1cd   : > { %v1596_v1 = vpop.f32.mrf.mxu2 }
 0x1ce   : > { %9396 = vst [vmem:[#allocation18_spill] sm:$0xff] %v7461_v49  ;;  %v1752_v30 = vpop.f32.mrf.mxu3  ;;  %v1645_v0 = vadd.f32 %v1596_v1, %v7082_v17 }
 0x1cf   : > { %5987 = vmatmul.msk.bf16.gmra.mxu0 %vm905_vm2, %v7096_v19 }
 0x1d0   : > { %v1798_v22 = vadd.f32 %v1749_v61, %v1645_v0  ;;  %v7470_v25 = vpop.f32.mrf.mxu1 }
 0x1d1   : > { %9398 = vst [vmem:[#allocation37_spill] sm:$0xff] %v7470_v25 }
 0x1d2   : > { %5922 = vmatmul.msk.bf16.gmra.mxu2 %vm905_vm2, %v6442_v62  ;;  %v7468_v43 = vadd.f32 %v1924_v10, %v1798_v22  ;;  %v6443_v10 = vld [vmem:[%s6544_s18 + $0x48] sm:$0xff]  ;;  %v9406_v62 = vld [vmem:[#allocation24_spill] sm:$0xff] }
 0x1d4   : > { %9397 = vst [vmem:[#allocation17_spill] sm:$0xff] %v7468_v43  ;;  %v1929_v11 = vpop.f32.mrf.mxu0 }
 0x1d5   : > { %v1599_v45 = vpop.f32.mrf.mxu2 }
 0x1d6   : > { %v1754_v38 = vpop.f32.mrf.mxu3  ;;  %v1646_v15 = vadd.f32 %v1599_v45, %v7094_v4  ;;  %v9407_v45 = vld [vmem:[#allocation26_spill] sm:$0xff] }
 0x1d8   : > { %v1799_v28 = vadd.f32 %v1752_v30, %v1646_v15  ;;  %v2091_v32 = vpop.f32.mrf.mxu1 }
 0x1da   : > { %v1974_v5 = vadd.f32 %v1927_v29, %v1799_v28  ;;  %v6444_v28 = vld [vmem:[%s6544_s18 + $0x54] sm:$0xff] }
 0x1db   : > { %5955 = vmatmul.msk.bf16.gmra.mxu3 %vm905_vm2, %v6912_v40 }
 0x1dc   : > { %v1932_v17 = vpop.f32.mrf.mxu0  ;;  %v7475_v19 = vadd.f32 %v2086_v24, %v1974_v5 }
 0x1dd   : > { %v1601_v53 = vpop.f32.mrf.mxu2 }
 0x1de   : > { %9399 = vst [vmem:[#allocation38_spill] sm:$0xff] %v7475_v19  ;;  %v1757_v57 = vpop.f32.mrf.mxu3  ;;  %v1647_v55 = vadd.f32 %v1601_v53, %v7107_v7  ;;  %v9404_v7 = vld [vmem:[#allocation20_spill] sm:$0xff] }
 0x1df   : > { %5988 = vmatmul.msk.bf16.gmra.mxu0 %vm905_vm2, %v9400_v56 }
 0x1e0   : > { %v1800_v2 = vadd.f32 %v1754_v38, %v1647_v55  ;;  %v7485_v24 = vpop.f32.mrf.mxu1  ;;  %v9409_v55 = vld [vmem:[#allocation25_spill] sm:$0xff] }
 0x1e1   : > { %9403 = vst [vmem:[#allocation22_spill] sm:$0xff] %v7485_v24 }
 0x1e2   : > { %5923 = vmatmul.msk.bf16.gmra.mxu2 %vm905_vm2, %v6443_v10  ;;  %v7482_v4 = vadd.f32 %v1929_v11, %v1800_v2  ;;  %v9410_v10 = vld [vmem:[#allocation3_spill] sm:$0xff] }
 0x1e4   : > { %9401 = vst [vmem:[#allocation23_spill] sm:$0xff] %v7482_v4  ;;  %v1934_v23 = vpop.f32.mrf.mxu0 }
 0x1e5   : > { %v1604_v40 = vpop.f32.mrf.mxu2 }
 0x1e6   : > { %v1759_v61 = vpop.f32.mrf.mxu3  ;;  %v1648_v42 = vadd.f32 %v1604_v40, %v9402_v21 }
 0x1e8   : > { %v1801_v9 = vadd.f32 %v1757_v57, %v1648_v42  ;;  %v2096_v15 = vpop.f32.mrf.mxu1 }
 0x1ea   : > { %v1976_v29 = vadd.f32 %v1932_v17, %v1801_v9 }
 0x1eb   : > { %5956 = vmatmul.msk.bf16.gmra.mxu3 %vm905_vm2, %v9404_v7  ;;  %v9414_v7 = vld [vmem:[#allocation29_spill] sm:$0xff] }
 0x1ec   : > { %v1937_v1 = vpop.f32.mrf.mxu0  ;;  %v7489_v30 = vadd.f32 %v2091_v32, %v1976_v29  ;;  %v9413_v29 = vld [vmem:[#allocation27_spill] sm:$0xff] }
 0x1ed   : > { %v1606_v0 = vpop.f32.mrf.mxu2 }
 0x1ee   : > { %9405 = vst [vmem:[#allocation20_spill] sm:$0xff] %v7489_v30  ;;  %v1762_v22 = vpop.f32.mrf.mxu3  ;;  %v1649_v11 = vadd.f32 %v1606_v0, %v9406_v62  ;;  %v9415_v62 = vld [vmem:[#allocation30_spill] sm:$0xff] }
 0x1ef   : > { %5989 = vmatmul.msk.bf16.gmra.mxu0 %vm905_vm2, %v9407_v45 }
 0x1f0   : > { %v1802_v38 = vadd.f32 %v1759_v61, %v1649_v11  ;;  %v7501_v40 = vpop.f32.mrf.mxu1 }
 0x1f1   : > { %9411 = vst [vmem:[#allocation26_spill] sm:$0xff] %v7501_v40 }
 0x1f2   : > { %5924 = vmatmul.msk.bf16.gmra.mxu2 %vm905_vm2, %v6444_v28  ;;  %v7496_v5 = vadd.f32 %v1934_v23, %v1802_v38  ;;  %v9417_v28 = vld [vmem:[#allocation28_spill] sm:$0xff] }
 0x1f4   : > { %9408 = vst [vmem:[#allocation24_spill] sm:$0xff] %v7496_v5  ;;  %v1939_v17 = vpop.f32.mrf.mxu0 }
 0x1f5   : > { %v1609_v53 = vpop.f32.mrf.mxu2 }
 0x1f6   : > { %v1764_v57 = vpop.f32.mrf.mxu3  ;;  %v1650_v32 = vadd.f32 %v1609_v53, %v9409_v55 }
 0x1f8   : > { %v1803_v56 = vadd.f32 %v1762_v22, %v1650_v32  ;;  %v2101_v11 = vpop.f32.mrf.mxu1  ;;  %v9418_v32 = vld [vmem:[#allocation4_spill] sm:$0xff] }
 0x1fa   : > { %v1978_v2 = vadd.f32 %v1937_v1, %v1803_v56 }
 0x1fb   : > { %5957 = vmatmul.msk.bf16.gmra.mxu3 %vm905_vm2, %v9410_v10 }
 0x1fc   : > { %v1942_v21 = vpop.f32.mrf.mxu0  ;;  %v7503_v61 = vadd.f32 %v2096_v15, %v1978_v2 }
 0x1fd   : > { %v1611_v42 = vpop.f32.mrf.mxu2 }
 0x1fe   : > { %9412 = vst [vmem:[#allocation25_spill] sm:$0xff] %v7503_v61  ;;  %v1767_v9 = vpop.f32.mrf.mxu3  ;;  %v1651_v23 = vadd.f32 %v1611_v42, %v9413_v29  ;;  %v6471_v42 = vmov 0   ;;  %v9440_v61 = vld [vmem:[#allocation8_spill] sm:$0xff] }
 0x1ff   : > { %5990 = vmatmul.msk.bf16.gmra.mxu0 %vm905_vm2, %v9414_v7  ;;  %2772 = vst.msk [vmem:[#allocation2 + $0xc] sm:$0xf] %vm2767_vm7, %v6471_v42 }
 0x200   : > { %v1804_v0 = vadd.f32 %v1764_v57, %v1651_v23  ;;  %2768 = vst.msk [vmem:[#allocation2] sm:$0xf] %vm2767_vm7, %v6471_v42  ;;  %v9422_v23 = vld [vmem:[#allocation33_spill] sm:$0xff] }
 0x201   : > { %2769 = vst.msk [vmem:[#allocation2 + $0x4] sm:$0xf] %vm2767_vm7, %v6471_v42 }
 0x202   : > { %5925 = vmatmul.msk.bf16.gmra.mxu2 %vm905_vm2, %v9415_v62  ;;  %v7510_v1 = vadd.f32 %v1939_v17, %v1804_v0  ;;  %v9420_v17 = vld [vmem:[#allocation31_spill] sm:$0xff]  ;;  %2773 = vst.msk [vmem:[#allocation2 + $0x10] sm:$0xf] %vm2767_vm7, %v6471_v42 }
 0x203   : > { %2775 = vst.msk [vmem:[#allocation2 + $0x18] sm:$0xf] %vm2767_vm7, %v6471_v42 }
 0x204   : > { %9416 = vst [vmem:[#allocation3_spill] sm:$0xff] %v7510_v1  ;;  %v1944_v22 = vpop.f32.mrf.mxu0 }
 0x205   : > { %v1614_v45 = vpop.f32.mrf.mxu2  ;;  %2776 = vst.msk [vmem:[#allocation2 + $0x1c] sm:$0xf] %vm2767_vm7, %v6471_v42 }
 0x206   : > { %v1769_v38 = vpop.f32.mrf.mxu3  ;;  %v1652_v15 = vadd.f32 %v1614_v45, %v9417_v28  ;;  %2778 = vst.msk [vmem:[#allocation2 + $0x24] sm:$0xf] %vm2767_vm7, %v6471_v42 }
 0x207   : > { %2779 = vst.msk [vmem:[#allocation2 + $0x28] sm:$0xf] %vm2767_vm7, %v6471_v42 }
 0x208   : > { %v1805_v53 = vadd.f32 %v1767_v9, %v1652_v15  ;;  %2781 = vst.msk [vmem:[#allocation2 + $0x30] sm:$0xf] %vm2767_vm7, %v6471_v42  ;;  %v9425_v15 = vld [vmem:[#allocation5_spill] sm:$0xff] }
 0x209   : > { %2782 = vst.msk [vmem:[#allocation2 + $0x34] sm:$0xf] %vm2767_vm7, %v6471_v42 }
 0x20a   : > { %v1980_v55 = vadd.f32 %v1942_v21, %v1805_v53  ;;  %v7524_v21 = vpop.f32.mrf.mxu1  ;;  %2784 = vst.msk [vmem:[#allocation2 + $0x3c] sm:$0xf] %vm2767_vm7, %v6471_v42  ;;  %v3191_v5 = vld [vmem:[#allocation2 + $0x18] sm:$0xf] }
 0x20b   : > { %5958 = vmatmul.msk.bf16.gmra.mxu3 %vm905_vm2, %v9418_v32  ;;  %9421 = vst [vmem:[#allocation29_spill] sm:$0xff] %v7524_v21 }
 0x20c   : > { %v1947_v56 = vpop.f32.mrf.mxu0  ;;  %v7515_v2 = vadd.f32 %v2101_v11, %v1980_v55  ;;  %v9424_v11 = vld [vmem:[#allocation32_spill] sm:$0xff]  ;;  %2785 = vst.msk [vmem:[#allocation2 + $0x40] sm:$0xf] %vm2767_vm7, %v6471_v42 }
 0x20d   : > { %v1616_v57 = vpop.f32.mrf.mxu2  ;;  %2787 = vst.msk [vmem:[#allocation2 + $0x48] sm:$0xf] %vm2767_vm7, %v6471_v42  ;;  %v3198_v19 = vld [vmem:[#allocation2 + $0x24] sm:$0xf] }
 0x20e   : > { %9419 = vst [vmem:[#allocation27_spill] sm:$0xff] %v7515_v2  ;;  %v1772_v10 = vpop.f32.mrf.mxu3  ;;  %v1653_v29 = vadd.f32 %v1616_v57, %v9420_v17  ;;  %v3182_v2 = vld [vmem:[#allocation2 + $0xc] sm:$0xf] }
 0x20f   : > { %5991 = vmatmul.msk.bf16.gmra.mxu0 %vm905_vm2, %v7208_v20  ;;  %2788 = vst.msk [vmem:[#allocation2 + $0x4c] sm:$0xf] %vm2767_vm7, %v6471_v42 }
 0x210   : > { %v1806_v9 = vadd.f32 %v1769_v38, %v1653_v29  ;;  %2790 = vst.msk [vmem:[#allocation2 + $0x54] sm:$0xf] %vm2767_vm7, %v6471_v42  ;;  %v9428_v29 = vld [vmem:[#allocation35_spill] sm:$0xff] }
 0x211   : > { %2791 = vst.msk [vmem:[#allocation2 + $0x58] sm:$0xf] %vm2767_vm7, %v6471_v42 }
 0x212   : > { %5926 = vmatmul.msk.bf16.gmra.mxu2 %vm905_vm2, %v9422_v23  ;;  %v7534_v7 = vadd.f32 %v1944_v22, %v1806_v9  ;;  %v2106_v38 = vpop.f32.mrf.mxu1  ;;  %2793 = vst.msk [vmem:[#allocation2 + $0x60] sm:$0xf] %vm2767_vm7, %v6471_v42 }
 0x213   : > { %2794 = vst.msk [vmem:[#allocation2 + $0x64] sm:$0xf] %vm2767_vm7, %v6471_v42 }
 0x214   : > { %9423 = vst [vmem:[#allocation30_spill] sm:$0xff] %v7534_v7  ;;  %v1949_v20 = vpop.f32.mrf.mxu0 }
 0x215   : > { %v1619_v0 = vpop.f32.mrf.mxu2  ;;  %2796 = vst.msk [vmem:[#allocation2 + $0x6c] sm:$0xf] %vm2767_vm7, %v6471_v42 }
 0x216   : > { %v1774_v62 = vpop.f32.mrf.mxu3  ;;  %v1654_v45 = vadd.f32 %v1619_v0, %v9424_v11  ;;  %2797 = vst.msk [vmem:[#allocation2 + $0x70] sm:$0xf] %vm2767_vm7, %v6471_v42 }
 0x217   : > { %2799 = vst.msk [vmem:[#allocation2 + $0x78] sm:$0xf] %vm2767_vm7, %v6471_v42 }
 0x218   : > { %v1807_v22 = vadd.f32 %v1772_v10, %v1654_v45  ;;  %2800 = vst.msk [vmem:[#allocation2 + $0x7c] sm:$0xf] %vm2767_vm7, %v6471_v42  ;;  %v7596_v45 = vld [vmem:[%s9259_s2] ss:$0 sm:$0xff] }
 0x219   : > { %2802 = vst.msk [vmem:[#allocation2 + $0x84] sm:$0xf] %vm2767_vm7, %v6471_v42 }
 0x21a   : > { %v1982_v28 = vadd.f32 %v1947_v56, %v1807_v22  ;;  %v9427_v56 = vld [vmem:[#allocation34_spill] sm:$0xff]  ;;  %2803 = vst.msk [vmem:[#allocation2 + $0x88] sm:$0xf] %vm2767_vm7, %v6471_v42  ;;  %v7600_v22 = vld [vmem:[#allocation2] sm:$0xf] }
 0x21b   : > { %5959 = vmatmul.msk.bf16.gmra.mxu3 %vm905_vm2, %v9425_v15  ;;  %2805 = vst.msk [vmem:[#allocation2 + $0x90] sm:$0xf] %vm2767_vm7, %v6471_v42  ;;  %v3351_v15 = vshrl.u32 %v7600_v22, 16 }
 0x21c   : > { %v2518_v53 = vpop.f32.mrf.mxu0  ;;  %v7559_v55 = vadd.f32 %v2106_v38, %v1982_v28  ;;  %2806 = vst.msk [vmem:[#allocation2 + $0x94] sm:$0xf] %vm2767_vm7, %v6471_v42 }
 0x21d   : > { %v1621_v32 = vpop.f32.mrf.mxu2  ;;  %2808 = vst.msk [vmem:[#allocation2 + $0x9c] sm:$0xf] %vm2767_vm7, %v6471_v42 }
 0x21e   : > { %9426 = vst [vmem:[#allocation28_spill] sm:$0xff] %v7559_v55  ;;  %v2359_v57 = vpop.f32.mrf.mxu3  ;;  %v1655_v10 = vadd.f32 %v1621_v32, %v9427_v56  ;;  %v3354_v32 = vshll.u32 %v7600_v22, 16 }
 0x21f   : > { %5992 = vmatmul.msk.bf16.gmra.mxu0 %vm905_vm2, %v7231_v14  ;;  %2809 = vst.msk [vmem:[#allocation2 + $0xa0] sm:$0xf] %vm2767_vm7, %v6471_v42 }
 0x220   : > { %v1808_v17 = vadd.f32 %v1774_v62, %v1655_v10  ;;  %v9430_v62 = vld [vmem:[#allocation36_spill] sm:$0xff]  ;;  %2811 = vst.msk [vmem:[#allocation2 + $0xa8] sm:$0xf] %vm2767_vm7, %v6471_v42 }
 0x221   : > { %2812 = vst.msk [vmem:[#allocation2 + $0xac] sm:$0xf] %vm2767_vm7, %v6471_v42 }
 0x222   : > { %5927 = vmatmul.msk.bf16.gmra.mxu2 %vm905_vm2, %v9428_v29  ;;  %v7578_v9 = vadd.f32 %v1949_v20, %v1808_v17  ;;  %2814 = vst.msk [vmem:[#allocation2 + $0xb4] sm:$0xf] %vm2767_vm7, %v6471_v42  ;;  %v7629_v29 = vld [vmem:[%s9261_s4] ss:$0 sm:$0xff] }
 0x223   : > { %2815 = vst.msk [vmem:[#allocation2 + $0xb8] sm:$0xf] %vm2767_vm7, %v6471_v42 }
 0x224   : > { %9429 = vst [vmem:[#allocation4_spill] sm:$0xff] %v7578_v9  ;;  %v2520_v14 = vpop.f32.mrf.mxu0 }
 0x225   : > { %v2184_v23 = vpop.f32.mrf.mxu2  ;;  %2817 = vst.msk [vmem:[#allocation2 + $0xc0] sm:$0xf] %vm2767_vm7, %v6471_v42 }
 0x226   : > { %v2361_v0 = vpop.f32.mrf.mxu3  ;;  %v2264_v11 = vadd.f32 %v2184_v23, %v9430_v62  ;;  %2818 = vst.msk [vmem:[#allocation2 + $0xc4] sm:$0xf] %vm2767_vm7, %v6471_v42  ;;  %v3353_v62 = vrot.slane %v3351_v15, 4  ;;  %v6445_v15 = vld [vmem:[%s6544_s18 + $0x84] sm:$0xff] }
 0x227   : > { %2820 = vst.msk [vmem:[#allocation2 + $0xcc] sm:$0xf] %vm2767_vm7, %v6471_v42 }
 0x228   : > { %v2439_v20 = vadd.f32 %v2359_v57, %v2264_v11  ;;  %v3356_v11 = vrot.slane %v3354_v32, 5  ;;  %2821 = vst.msk [vmem:[#allocation2 + $0xd0] sm:$0xf] %vm2767_vm7, %v6471_v42 }
 0x229   : > { %2774 = vst.msk [vmem:[#allocation2 + $0x14] sm:$0x1] %vm2770_vm8, %v6471_v42 }
 0x22a   : > { %v2598_v38 = vadd.f32 %v2518_v53, %v2439_v20  ;;  %v7618_v53 = vld [vmem:[%s9260_s3] ss:$0 sm:$0xff]  ;;  %2771 = vst.msk [vmem:[#allocation2 + $0x8] sm:$0x1] %vm2770_vm8, %v6471_v42 }
 0x22b   : > { %5960 = vmatmul.msk.bf16.gmra.mxu3 %vm905_vm2, %v9375_v35  ;;  %v7622_v35 = vld [vmem:[#allocation2 + $0x4] sm:$0xf]  ;;  %2777 = vst.msk [vmem:[#allocation2 + $0x20] sm:$0x1] %vm2770_vm8, %v6471_v42 }
 0x22c   : > { %v7610_v28 = vpop.f32.mrf.mxu0  ;;  %v2633_v57 = vadd.f32 %v7596_v45, %v2598_v38  ;;  %v3360_v20 = vshll.u32 %v7622_v35, 16  ;;  %v3364_v38 = vshrl.u32 %v7622_v35, 16  ;;  %2780 = vst.msk [vmem:[#allocation2 + $0x2c] sm:$0x1] %vm2770_vm8, %v6471_v42 }
 0x22d   : > { %v2186_v56 = vpop.f32.mrf.mxu2  ;;  %2783 = vst.msk [vmem:[#allocation2 + $0x38] sm:$0x1] %vm2770_vm8, %v6471_v42 }
 0x22e   : > { %v2364_v10 = vpop.f32.mrf.mxu3  ;;  %v2665_v17 = vmax.f32 %v2633_v57, 0.0  ;;  %v2265_v23 = vadd.f32 %v2186_v56, %v7257_v58  ;;  %v3357_v56 = vor.u32 %v3356_v11, %v3353_v62  ;;  %2786 = vst.msk [vmem:[#allocation2 + $0x44] sm:$0x1] %vm2770_vm8, %v6471_v42  ;;  %v9431_v62 = vld [vmem:[#allocation6_spill] sm:$0xff] }
 0x22f   : > { %5993 = vmatmul.msk.bf16.gmra.mxu0 %vm905_vm2, %v7260_v8  ;;  %2789 = vst.msk [vmem:[#allocation2 + $0x50] sm:$0x1] %vm2770_vm8, %v6471_v42 }
 0x230   : > { %v2700_v57 = vmul.f32 %v7618_v53, %v2665_v17  ;;  %v2440_v9 = vadd.f32 %v2361_v0, %v2265_v23  ;;  %v3362_v17 = vrot.slane %v3360_v20, 5  ;;  %v3366_v0 = vrot.slane %v3364_v38, 4  ;;  %v6364_v20 = vld [vmem:[%s9262_s5 + $0x8] sm:$0xff]  ;;  %2792 = vst.msk [vmem:[#allocation2 + $0x5c] sm:$0x1] %vm2770_vm8, %v6471_v42 }
 0x231   : > { %v6368_v38 = vld [vmem:[%s9262_s5 + $0x28] sm:$0xff]  ;;  %4078 = vmatpush.bf16.msrb.mxu2 %v6364_v20  ;;  %2795 = vst.msk [vmem:[#allocation2 + $0x68] sm:$0x1] %vm2770_vm8, %v6471_v42 }
 0x232   : > { %v2735_v8 = vadd.f32 %v7629_v29, %v2700_v57  ;;  %v2599_v58 = vadd.f32 %v2520_v14, %v2440_v9  ;;  %5928 = vmatmul.msk.bf16.gmra.mxu2 %vm905_vm2, %v6445_v15  ;;  %4403 = vmatpush.bf16.msrb.mxu3 %v6368_v38  ;;  %2798 = vst.msk [vmem:[#allocation2 + $0x74] sm:$0x1] %vm2770_vm8, %v6471_v42  ;;  %v3195_v25 = vld [vmem:[#allocation2 + $0x20] sm:$0x1] }
 0x233   : > { %2801 = vst.msk [vmem:[#allocation2 + $0x80] sm:$0x1] %vm2770_vm8, %v6471_v42 }
 0x234   : > { %v7652_v32 = vpop.f32.mrf.mxu0  ;;  %v2823_v23 = vpack.c.bf16 %v2735_v8, %v2735_v8  ;;  %v2634_v55 = vadd.f32 %v7596_v45, %v2599_v58  ;;  %v3358_v8 = vrot.slane %v3357_v56, 4  ;;  %v3367_v58 = vor.u32 %v3366_v0, %v3362_v17  ;;  %v7683_v56 = vld [vmem:[#allocation2 + $0x8] sm:$0x1]  ;;  %2804 = vst.msk [vmem:[#allocation2 + $0x8c] sm:$0x1] %vm2770_vm8, %v6471_v42 }
 0x235   : > { %v2189_v9 = vpop.f32.mrf.mxu2  ;;  %v3370_v20 = vshll.u32 %v7683_v56, 16  ;;  %2807 = vst.msk [vmem:[#allocation2 + $0x98] sm:$0x1] %vm2770_vm8, %v6471_v42 }
 0x236   : > { %v2366_v14 = vpop.f32.mrf.mxu3  ;;  %v2859_v57 = vshrl.u32 %v2823_v23, 16  ;;  %v2666_v15 = vmax.f32 %v2634_v55, 0.0  ;;  %v2266_v11 = vadd.f32 %v2189_v9, %v9431_v62  ;;  %v2862_v55 = vshll.u32 %v2823_v23, 16  ;;  %2810 = vst.msk [vmem:[#allocation2 + $0xa4] sm:$0x1] %vm2770_vm8, %v6471_v42 }
 0x237   : > { %v3372_v40 = vrot.slane %v3370_v20, 5  ;;  %2813 = vst.msk [vmem:[#allocation2 + $0xb0] sm:$0x1] %vm2770_vm8, %v6471_v42 }
 0x238   : > { %v7670_v21 = vrot.slane %v2859_v57, 7  ;;  %v2701_v7 = vmul.f32 %v7618_v53, %v2666_v15  ;;  %v2441_v9 = vadd.f32 %v2364_v10, %v2266_v11  ;;  %v9434_v57 = vld [vmem:[#allocation11_spill] sm:$0xff]  ;;  %v3368_v11 = vrot.slane %v3367_v58, 4  ;;  %2816 = vst.msk [vmem:[#allocation2 + $0xbc] sm:$0x1] %vm2770_vm8, %v6471_v42 }
 0x239   : > { %v6370_v58 = vld [vmem:[%s9262_s5 + $0x38] sm:$0xff]  ;;  %2819 = vst.msk [vmem:[#allocation2 + $0xc8] sm:$0x1] %vm2770_vm8, %v6471_v42 }
 0x23a   : > { %v2864_v0 = vor.u32 %v2862_v55, %v7670_v21  ;;  %v2736_v23 = vadd.f32 %v7629_v29, %v2701_v7  ;;  %v2600_v10 = vadd.f32 %v7610_v28, %v2441_v9  ;;  %v3363_v55 = vsel %vm6584_vm3, %v3358_v8, %v3362_v17  ;;  %4544 = vmatpush.bf16.msrb.mxu0 %v6370_v58 }
 0x23b   : > { %5961 = vmatmul.msk.bf16.gmra.mxu3 %vm905_vm2, %v9434_v57  ;;  %v3373_v8 = vsel %vm6584_vm3, %v3368_v11, %v3372_v40  ;;  %v3734_v20 = vunpack.c.l.b16 %v3363_v55  ;;  %v2865_v40 = vrot.slane %v7670_v21, 4  ;;  %v3188_v55 = vld [vmem:[#allocation2 + $0x14] sm:$0x1]  ;;  %2822 = vst.msk [vmem:[#allocation2 + $0xd4] sm:$0x1] %vm2770_vm8, %v6471_v42 }
 0x23c   : > { %v7694_v15 = vpop.f32.mrf.mxu0  ;;  %v3183_v7 = vsel %vm7677_vm10, %v2864_v0, %v3182_v2  ;;  %v2824_v38 = vpack.c.bf16 %v2736_v23, %v2736_v23  ;;  %v2635_v28 = vadd.f32 %v7596_v45, %v2600_v10  ;;  %v6372_v2 = vld [vmem:[%s9262_s5 + $0x48] sm:$0xff]  ;;  %v9435_v10 = vld [vmem:[#allocation7_spill] sm:$0xff] }
 0x23d   : > { %3184 = vst [vmem:[#allocation2 + $0xc] sm:$0xf] %v3183_v7  ;;  %v2191_v9 = vpop.f32.mrf.mxu2  ;;  %4707 = vmatpush.bf16.msrb.mxu1 %v6372_v2 }
 0x23e   : > { %v2369_v57 = vpop.f32.mrf.mxu3  ;;  %v2867_v0 = vshrl.u32 %v2824_v38, 16  ;;  %v2667_v23 = vmax.f32 %v2635_v28, 0.0  ;;  %v2267_v1 = vadd.f32 %v2191_v9, %v9435_v10  ;;  %v2870_v17 = vshll.u32 %v2824_v38, 16 }
 0x23f   : > { %5994 = vmatmul.msk.bf16.gmra.mxu0 %vm905_vm2, %v7289_v6  ;;  %v3735_v9 = vunpack.c.l.b16 %v3373_v8 }
 0x240   : > { %v2869_v28 = vrot.slane %v2867_v0, 7  ;;  %v2702_v6 = vmul.f32 %v7618_v53, %v2667_v23  ;;  %v2442_v38 = vadd.f32 %v2366_v14, %v2267_v1  ;;  %v6446_v14 = vld [vmem:[%s6544_s18 + $0x90] sm:$0xff] }
 0x241   : > { %v3766_v0 = vpack.c.b16 %v3735_v9, %v3734_v20 }
 0x242   : > { %v2872_v58 = vor.u32 %v2870_v17, %v2869_v28  ;;  %v2874_v2 = vrot.slane %v2869_v28, 4  ;;  %v2737_v1 = vadd.f32 %v7629_v29, %v2702_v6  ;;  %v2601_v21 = vadd.f32 %v7652_v32, %v2442_v38  ;;  %5929 = vmatmul.msk.bf16.gmra.mxu2 %vm905_vm2, %v6446_v14 }
 0x243   : > { %6008 = vmatmul.msk.bf16.vlgmr.msra.gmra.mxu1 %vm3794_vm15, %v3766_v0 }
 0x244   : > { %v2530_v23 = vpop.f32.mrf.mxu0  ;;  %v2873_v10 = vsel %vm7721_vm13, %v2865_v40, %v2872_v58  ;;  %v3189_v17 = vsel %vm7731_vm14, %v2874_v2, %v3188_v55  ;;  %v2825_v8 = vpack.c.bf16 %v2737_v1, %v2737_v1  ;;  %v2636_v28 = vadd.f32 %v7596_v45, %v2601_v21  ;;  %v3299_v6 = vld [vmem:[#allocation2 + $0xc] sm:$0xf] }
 0x245   : > { %3185 = vst.msk [vmem:[#allocation2 + $0x10] sm:$0xf] %vm2767_vm7, %v2873_v10  ;;  %v2194_v32 = vpop.f32.mrf.mxu2  ;;  %v3375_v14 = vshrl.u32 %v3299_v6, 16  ;;  %v3378_v42 = vshll.u32 %v3299_v6, 16 }
 0x246   : > { %v2371_v38 = vpop.f32.mrf.mxu3  ;;  %3190 = vst [vmem:[#allocation2 + $0x14] sm:$0x1] %v3189_v17  ;;  %v2876_v20 = vshrl.u32 %v2825_v8, 16  ;;  %v2668_v9 = vmax.f32 %v2636_v28, 0.0  ;;  %v2268_v40 = vadd.f32 %v2194_v32, %v9440_v61  ;;  %v2879_v2 = vshll.u32 %v2825_v8, 16 }
 0x247   : > { %v3377_v58 = vrot.slane %v3375_v14, 4  ;;  %v3380_v24 = vrot.slane %v3378_v42, 5  ;;  %v6113_v61 = vrot.slane %v3299_v6, 9 }
 0x248   : > { %v2878_v55 = vrot.slane %v2876_v20, 7  ;;  %v2703_v1 = vmul.f32 %v7618_v53, %v2668_v9  ;;  %v2443_v21 = vadd.f32 %v2369_v57, %v2268_v40 }
 0x249   : > { %v3381_v17 = vor.u32 %v3380_v24, %v3377_v58 }
 0x24a   : > { %v2881_v10 = vor.u32 %v2879_v2, %v2878_v55  ;;  %v2738_v0 = vadd.f32 %v7629_v29, %v2703_v1  ;;  %v2602_v30 = vadd.f32 %v7694_v15, %v2443_v21  ;;  %v2882_v32 = vrot.slane %v2878_v55, 4 }
 0x24b   : > { %5962 = vmatmul.msk.bf16.gmra.mxu3 %vm905_vm2, %v9387_v18  ;;  %v3382_v6 = vrot.slane %v3381_v17, 4 }
 0x24c   : > { %v7758_v28 = vpop.f32.mrf.mxu0  ;;  %v3192_v8 = vsel %vm7677_vm10, %v2881_v10, %v3191_v5  ;;  %v2826_v14 = vpack.c.bf16 %v2738_v0, %v2738_v0  ;;  %v2637_v57 = vadd.f32 %v7596_v45, %v2602_v30  ;;  %v3300_v42 = vld [vmem:[#allocation2 + $0x10] sm:$0xf] }
 0x24d   : > { %3193 = vst [vmem:[#allocation2 + $0x18] sm:$0xf] %v3192_v8  ;;  %v2196_v20 = vpop.f32.mrf.mxu2  ;;  %v3301_v40 = vld [vmem:[#allocation2 + $0x14] sm:$0x1]  ;;  %v3384_v15 = vshll.u32 %v3300_v42, 16  ;;  %v3388_v2 = vshrl.u32 %v3300_v42, 16 }
 0x24e   : > { %v2374_v9 = vpop.f32.mrf.mxu3  ;;  %v2884_v1 = vshrl.u32 %v2826_v14, 16  ;;  %v2669_v18 = vmax.f32 %v2637_v57, 0.0  ;;  %v2269_v24 = vadd.f32 %v2196_v20, %v7312_v52  ;;  %v3394_v55 = vshll.u32 %v3301_v40, 16 }
 0x24f   : > { %5995 = vmatmul.msk.bf16.gmra.mxu0 %vm905_vm2, %v7315_v16  ;;  %v3386_v58 = vrot.slane %v3384_v15, 5  ;;  %v3390_v5 = vrot.slane %v3388_v2, 4  ;;  %v4186_v30 = vrot.slane %v3300_v42, 5  ;;  %v2887_v10 = vshll.u32 %v2826_v14, 16  ;;  %v6447_v42 = vld [vmem:[%s6544_s18 + $0x9c] sm:$0xff] }
 0x250   : > { %v2886_v21 = vrot.slane %v2884_v1, 7  ;;  %v2704_v0 = vmul.f32 %v7618_v53, %v2669_v18  ;;  %v2444_v8 = vadd.f32 %v2371_v38, %v2269_v24  ;;  %v4189_v16 = vrot.slane %v3301_v40, 5 }
 0x251   : > { %v3387_v57 = vsel %vm6584_vm3, %v3382_v6, %v3386_v58  ;;  %v3391_v4 = vor.u32 %v3390_v5, %v3386_v58  ;;  %v4187_v52 = vsel %vm6977_vm6, %v6113_v61, %v4186_v30  ;;  %v3396_v1 = vrot.slane %v3394_v55, 5 }
 0x252   : > { %v2889_v17 = vor.u32 %v2887_v10, %v2886_v21  ;;  %v2891_v20 = vrot.slane %v2886_v21, 4  ;;  %v2739_v15 = vadd.f32 %v7629_v29, %v2704_v0  ;;  %v2603_v2 = vadd.f32 %v2530_v23, %v2444_v8  ;;  %5930 = vmatmul.msk.bf16.gmra.mxu2 %vm905_vm2, %v6447_v42  ;;  %v9441_v0 = vld [vmem:[#allocation9_spill] sm:$0xff] }
 0x253   : > { %v3392_v38 = vrot.slane %v3391_v4, 4  ;;  %v3736_v18 = vunpack.c.l.b16 %v3387_v57  ;;  %v4188_v24 = vrot.slane %v4186_v30, 4  ;;  %v4291_v57 = vunpack.c.l.b16 %v4187_v52  ;;  %v9443_v52 = vld [vmem:[#allocation19_spill] sm:$0xff] }
 0x254   : > { %v7774_v14 = vpop.f32.mrf.mxu0  ;;  %v2890_v6 = vsel %vm7721_vm13, %v2882_v32, %v2889_v17  ;;  %v3196_v61 = vsel %vm7731_vm14, %v2891_v20, %v3195_v25  ;;  %v2827_v40 = vpack.c.bf16 %v2739_v15, %v2739_v15  ;;  %v2638_v58 = vadd.f32 %v7596_v45, %v2603_v2  ;;  %v7781_v5 = vld [vmem:[#allocation2 + $0x18] sm:$0xf] }
 0x255   : > { %3194 = vst.msk [vmem:[#allocation2 + $0x1c] sm:$0xf] %vm2767_vm7, %v2890_v6  ;;  %v2199_v23 = vpop.f32.mrf.mxu2  ;;  %v3397_v4 = vsel %vm6584_vm3, %v3392_v38, %v3396_v1  ;;  %v3399_v55 = vshrl.u32 %v7781_v5, 16  ;;  %v3402_v30 = vshll.u32 %v7781_v5, 16  ;;  %v4190_v32 = vsel %vm6977_vm6, %v4188_v24, %v4189_v16 }
 0x256   : > { %v2376_v21 = vpop.f32.mrf.mxu3  ;;  %3197 = vst [vmem:[#allocation2 + $0x20] sm:$0x1] %v3196_v61  ;;  %v2893_v25 = vshrl.u32 %v2827_v40, 16  ;;  %v2670_v10 = vmax.f32 %v2638_v58, 0.0  ;;  %v2270_v8 = vadd.f32 %v2199_v23, %v9441_v0  ;;  %v3737_v17 = vunpack.c.l.b16 %v3397_v4  ;;  %v9444_v23 = vld [vmem:[#allocation12_spill] sm:$0xff]  ;;  %v9445_v4 = vld [vmem:[#allocation10_spill] sm:$0xff] }
 0x257   : > { %v3401_v20 = vrot.slane %v3399_v55, 4  ;;  %v3404_v15 = vrot.slane %v3402_v30, 5  ;;  %v4292_v2 = vunpack.c.l.b16 %v4190_v32  ;;  %v2896_v6 = vshll.u32 %v2827_v40, 16 }
 0x258   : > { %v2895_v42 = vrot.slane %v2893_v25, 7  ;;  %v2705_v38 = vmul.f32 %v7618_v53, %v2670_v10  ;;  %v2445_v1 = vadd.f32 %v2374_v9, %v2270_v8  ;;  %v7792_v51 = vpack.c.b16 %v3737_v17, %v3736_v18  ;;  %v9446_v9 = vld [vmem:[#allocation15_spill] sm:$0xff] }
 0x259   : > { %v7794_v43 = vpack.c.b16 %v4292_v2, %v4291_v57  ;;  %v3405_v58 = vor.u32 %v3404_v15, %v3401_v20  ;;  %v7802_v40 = vadd.f32 %v9445_v4, %v9444_v23  ;;  %v7806_v55 = vadd.f32 %v9446_v9, %v7387_v27 }
 0x25a   : > { %9442 = vst [vmem:[#allocation31_spill] sm:$0xff] %v7792_v51  ;;  %v2898_v16 = vor.u32 %v2896_v6, %v2895_v42  ;;  %v2740_v24 = vadd.f32 %v7629_v29, %v2705_v38  ;;  %v2604_v61 = vadd.f32 %v7758_v28, %v2445_v1  ;;  %6009 = vmatmul.msk.bf16.gmra.mxu1 %vm3794_vm15, %v7792_v51  ;;  %v6114_v30 = vrot.slane %v7781_v5, 9 }
 0x25b   : > { %5963 = vmatmul.msk.bf16.gmra.mxu3 %vm905_vm2, %v9443_v52  ;;  %v2899_v28 = vrot.slane %v2895_v42, 4  ;;  %v7818_v8 = vadd.f32 %v7379_v54, %v7411_v44  ;;  %v7822_v27 = vadd.f32 %v7407_v50, %v7425_v26  ;;  %v9447_v42 = vld [vmem:[#allocation13_spill] sm:$0xff]  ;;  %v3406_v38 = vrot.slane %v3405_v58, 4 }
 0x25c   : > { %v7810_v18 = vpop.f32.mrf.mxu0  ;;  %v3199_v32 = vsel %vm7677_vm10, %v2898_v16, %v3198_v19  ;;  %v2828_v25 = vpack.c.bf16 %v2740_v24, %v2740_v24  ;;  %v2639_v10 = vadd.f32 %v7596_v45, %v2604_v61  ;;  %v3303_v0 = vld [vmem:[#allocation2 + $0x1c] sm:$0xf]  ;;  %v3202_v52 = vld [vmem:[#allocation2 + $0x2c] sm:$0x1] }
 0x25d   : > { %3200 = vst [vmem:[#allocation2 + $0x24] sm:$0xf] %v3199_v32  ;;  %v2201_v57 = vpop.f32.mrf.mxu2  ;;  %v3304_v5 = vld [vmem:[#allocation2 + $0x20] sm:$0x1]  ;;  %v3408_v20 = vshll.u32 %v3303_v0, 16  ;;  %v3412_v15 = vshrl.u32 %v3303_v0, 16 }
 0x25e   : > { %v2379_v17 = vpop.f32.mrf.mxu3  ;;  %v2901_v2 = vshrl.u32 %v2828_v25, 16  ;;  %v2671_v19 = vmax.f32 %v2639_v10, 0.0  ;;  %v2271_v6 = vadd.f32 %v2201_v57, %v9447_v42  ;;  %v3418_v1 = vshll.u32 %v3304_v5, 16 }
 0x25f   : > { %5996 = vmatmul.msk.bf16.gmra.mxu0 %vm905_vm2, %v7340_v41  ;;  %v3410_v54 = vrot.slane %v3408_v20, 5  ;;  %v3414_v44 = vrot.slane %v3412_v15, 4  ;;  %v4193_v50 = vrot.slane %v3303_v0, 5  ;;  %v2904_v16 = vshll.u32 %v2828_v25, 16  ;;  %v6448_v0 = vld [vmem:[%s6544_s18 + $0xa8] sm:$0xff] }
 0x260   : > { %v2903_v26 = vrot.slane %v2901_v2, 7  ;;  %v2706_v24 = vmul.f32 %v7618_v53, %v2671_v19  ;;  %v2446_v61 = vadd.f32 %v2376_v21, %v2271_v6  ;;  %v4196_v41 = vrot.slane %v3304_v5, 5  ;;  %v7848_v6 = vld [vmem:[%s6544_s18 + $0xcc] sm:$0xf] }
 0x261   : > { %v3411_v23 = vsel %vm6584_vm3, %v3406_v38, %v3410_v54  ;;  %v3415_v4 = vor.u32 %v3414_v44, %v3410_v54  ;;  %v7832_v9 = vsel %vm6977_vm6, %v6114_v30, %v4193_v50  ;;  %v3420_v20 = vrot.slane %v3418_v1, 5 }
 0x262   : > { %v2906_v58 = vor.u32 %v2904_v16, %v2903_v26  ;;  %v2908_v32 = vrot.slane %v2903_v26, 4  ;;  %v2741_v10 = vadd.f32 %v7629_v29, %v2706_v24  ;;  %v2605_v25 = vadd.f32 %v7774_v14, %v2446_v61  ;;  %5931 = vmatmul.msk.bf16.gmra.mxu2 %vm905_vm2, %v6448_v0 }
 0x263   : > { %v3416_v57 = vrot.slane %v3415_v4, 4  ;;  %v3738_v15 = vunpack.c.l.b16 %v3411_v23  ;;  %v4195_v2 = vrot.slane %v4193_v50, 4  ;;  %v7856_v50 = vld [vmem:[%s6544_s18 + $0xd0] sm:$0xf] }
 0x264   : > { %v7838_v21 = vpop.f32.mrf.mxu0  ;;  %v2907_v30 = vsel %vm7721_vm13, %v2899_v28, %v2906_v58  ;;  %v3203_v5 = vsel %vm7731_vm14, %v2908_v32, %v3202_v52  ;;  %v2829_v19 = vpack.c.bf16 %v2741_v10, %v2741_v10  ;;  %v2640_v42 = vadd.f32 %v7596_v45, %v2605_v25  ;;  %v7845_v14 = vld [vmem:[#allocation2 + $0x24] sm:$0xf]  ;;  %v9448_v52 = vld [vmem:[#allocation14_spill] sm:$0xff] }
 0x265   : > { %3201 = vst.msk [vmem:[#allocation2 + $0x28] sm:$0xf] %vm2767_vm7, %v2907_v30  ;;  %v2204_v38 = vpop.f32.mrf.mxu2  ;;  %v3421_v44 = vsel %vm6584_vm3, %v3416_v57, %v3420_v20  ;;  %v3423_v1 = vshrl.u32 %v7845_v14, 16  ;;  %v3426_v28 = vshll.u32 %v7845_v14, 16  ;;  %v7860_v26 = vsel %vm6977_vm6, %v4195_v2, %v4196_v41  ;;  %v3205_v20 = vld [vmem:[#allocation2 + $0x30] sm:$0xf] }
 0x266   : > { %v2381_v54 = vpop.f32.mrf.mxu3  ;;  %3204 = vst [vmem:[#allocation2 + $0x2c] sm:$0x1] %v3203_v5  ;;  %v2910_v16 = vshrl.u32 %v2829_v19, 16  ;;  %v2913_v24 = vshll.u32 %v2829_v19, 16  ;;  %v2672_v61 = vmax.f32 %v2640_v42, 0.0  ;;  %v2272_v23 = vadd.f32 %v2204_v38, %v9448_v52 }
 0x267   : > { %v3739_v4 = vunpack.c.l.b16 %v3421_v44  ;;  %v3425_v58 = vrot.slane %v3423_v1, 4  ;;  %v3428_v32 = vrot.slane %v3426_v28, 5  ;;  %v2297_v10 = vshrl.u32 %v7848_v6, 16  ;;  %v7871_v5 = vld [vmem:[%s6544_s18 + $0xd4] sm:$0x1] }
 0x268   : > { %v7864_v25 = vrot.slane %v2910_v16, 7  ;;  %v2707_v0 = vmul.f32 %v7618_v53, %v2672_v61  ;;  %v2447_v57 = vadd.f32 %v2379_v17, %v2272_v23  ;;  %v2300_v41 = vshll.u32 %v7848_v6, 16 }
 0x269   : > { %v7868_v2 = vpack.c.b16 %v3739_v4, %v3738_v15  ;;  %v3429_v30 = vor.u32 %v3428_v32, %v3425_v58  ;;  %v2299_v19 = vrot.slane %v2297_v10, 4  ;;  %v2306_v42 = vshll.u32 %v7856_v50, 16 }
 0x26a   : > { %v2915_v38 = vor.u32 %v2913_v24, %v7864_v25  ;;  %v2916_v44 = vrot.slane %v7864_v25, 4  ;;  %v2742_v1 = vadd.f32 %v7629_v29, %v2707_v0  ;;  %v2606_v28 = vadd.f32 %v7810_v18, %v2447_v57 }
 0x26b   : > { %9449 = vst [vmem:[#allocation33_spill] sm:$0xff] %v7868_v2  ;;  %5964 = vmatmul.msk.bf16.gmra.mxu3 %vm905_vm2, %v6975_v34  ;;  %6010 = vmatmul.msk.bf16.gmra.mxu1 %vm3794_vm15, %v7868_v2  ;;  %v3430_v15 = vrot.slane %v3429_v30, 4  ;;  %v2302_v16 = vrot.slane %v2300_v41, 5  ;;  %v7884_v61 = vrot.slane %v2306_v42, 5  ;;  %v2310_v24 = vshrl.u32 %v7856_v50, 16 }
 0x26c   : > { %v7882_v17 = vpop.f32.mrf.mxu0  ;;  %v3206_v52 = vsel %vm7677_vm10, %v2915_v38, %v3205_v20  ;;  %v2830_v23 = vpack.c.bf16 %v2742_v1, %v2742_v1  ;;  %v2641_v18 = vadd.f32 %v7596_v45, %v2606_v28  ;;  %v7890_v4 = vld [vmem:[#allocation2 + $0x28] sm:$0xf]  ;;  %v2316_v34 = vshll.u32 %v7871_v5, 16  ;;  %v3209_v41 = vld [vmem:[#allocation2 + $0x38] sm:$0x1] }
 0x26d   : > { %3207 = vst [vmem:[#allocation2 + $0x30] sm:$0xf] %v3206_v52  ;;  %v2206_v58 = vpop.f32.mrf.mxu2  ;;  %v7893_v10 = vld [vmem:[#allocation2 + $0x2c] sm:$0x1]  ;;  %v3432_v25 = vshll.u32 %v7890_v4, 16  ;;  %v3436_v0 = vshrl.u32 %v7890_v4, 16  ;;  %v2303_v57 = vor.u32 %v2302_v16, %v2299_v19 }
 0x26e   : > { %v2384_v32 = vpop.f32.mrf.mxu3  ;;  %v2918_v20 = vshrl.u32 %v2830_v23, 16  ;;  %v2921_v30 = vshll.u32 %v2830_v23, 16  ;;  %v2673_v42 = vmax.f32 %v2641_v18, 0.0  ;;  %v2273_v38 = vadd.f32 %v2206_v58, %v7802_v40 }
 0x26f   : > { %5997 = vmatmul.msk.bf16.gmra.mxu0 %vm905_vm2, %v7367_v59  ;;  %v3434_v1 = vrot.slane %v3432_v25, 5  ;;  %v3438_v28 = vrot.slane %v3436_v0, 4  ;;  %v3442_v52 = vshll.u32 %v7893_v10, 16  ;;  %v2304_v2 = vrot.slane %v2303_v57, 4 }
 0x270   : > { %v2920_v51 = vrot.slane %v2918_v20, 7  ;;  %v2708_v49 = vmul.f32 %v7618_v53, %v2673_v42  ;;  %v2448_v19 = vadd.f32 %v2381_v54, %v2273_v38  ;;  %v2312_v16 = vrot.slane %v2310_v24, 4  ;;  %v6449_v20 = vld [vmem:[%s6544_s18 + $0xb4] sm:$0xff] }
 0x271   : > { %v3435_v23 = vsel %vm6584_vm3, %v3430_v15, %v3434_v1  ;;  %v3439_v18 = vor.u32 %v3438_v28, %v3434_v1  ;;  %v3444_v40 = vrot.slane %v3442_v52, 5  ;;  %v2309_v59 = vsel %vm6584_vm3, %v2304_v2, %v7884_v61 }
 0x272   : > { %v2923_v58 = vor.u32 %v2921_v30, %v2920_v51  ;;  %v2925_v25 = vrot.slane %v2920_v51, 4  ;;  %v2743_v0 = vadd.f32 %v7629_v29, %v2708_v49  ;;  %v2607_v57 = vadd.f32 %v7838_v21, %v2448_v19  ;;  %5932 = vmatmul.msk.bf16.gmra.mxu2 %vm905_vm2, %v6449_v20 }
 0x273   : > { %v3440_v24 = vrot.slane %v3439_v18, 4  ;;  %v3740_v42 = vunpack.c.l.b16 %v3435_v23  ;;  %v2313_v15 = vor.u32 %v2312_v16, %v7884_v61  ;;  %v2318_v38 = vrot.slane %v2316_v34, 5 }
 0x274   : > { %v7912_v54 = vpop.f32.mrf.mxu0  ;;  %v2924_v1 = vsel %vm7721_vm13, %v2916_v44, %v2923_v58  ;;  %v3210_v51 = vsel %vm7731_vm14, %v2925_v25, %v3209_v41  ;;  %v2831_v2 = vpack.c.bf16 %v2743_v0, %v2743_v0  ;;  %v2642_v49 = vadd.f32 %v7596_v45, %v2607_v57  ;;  %v7920_v21 = vld [vmem:[#allocation2 + $0x30] sm:$0xf] }
 0x275   : > { %3208 = vst.msk [vmem:[#allocation2 + $0x34] sm:$0xf] %vm2767_vm7, %v2924_v1  ;;  %v2209_v30 = vpop.f32.mrf.mxu2  ;;  %v3445_v52 = vsel %vm6584_vm3, %v3440_v24, %v3444_v40  ;;  %v3447_v61 = vshrl.u32 %v7920_v21, 16  ;;  %v3450_v34 = vshll.u32 %v7920_v21, 16  ;;  %v7927_v44 = vunpack.c.l.b16 %v2309_v59  ;;  %v3212_v1 = vld [vmem:[#allocation2 + $0x3c] sm:$0xf] }
 0x276   : > { %v2386_v28 = vpop.f32.mrf.mxu3  ;;  %3211 = vst [vmem:[#allocation2 + $0x38] sm:$0x1] %v3210_v51  ;;  %v2927_v41 = vshrl.u32 %v2831_v2, 16  ;;  %v2930_v19 = vshll.u32 %v2831_v2, 16  ;;  %v2674_v16 = vmax.f32 %v2642_v49, 0.0  ;;  %v2274_v23 = vadd.f32 %v2209_v30, %v7374_v39 }
 0x277   : > { %v3741_v18 = vunpack.c.l.b16 %v3445_v52  ;;  %v3449_v58 = vrot.slane %v3447_v61, 4  ;;  %v3452_v25 = vrot.slane %v3450_v34, 5  ;;  %v2314_v0 = vrot.slane %v2313_v15, 4 }
 0x278   : > { %v7930_v57 = vrot.slane %v2927_v41, 7  ;;  %v2709_v40 = vmul.f32 %v7618_v53, %v2674_v16  ;;  %v2449_v20 = vadd.f32 %v2384_v32, %v2274_v23  ;;  %v5967_v24 = vrot.slane %v7848_v6, 9 }
 0x279   : > { %v7934_v59 = vpack.c.b16 %v3741_v18, %v3740_v42  ;;  %v3453_v51 = vor.u32 %v3452_v25, %v3449_v58  ;;  %v2319_v2 = vsel %vm6584_vm3, %v2314_v0, %v2318_v38  ;;  %v2474_v39 = vrot.slane %v7856_v50, 5 }
 0x27a   : > { %v2932_v49 = vor.u32 %v2930_v19, %v7930_v57  ;;  %v2933_v15 = vrot.slane %v7930_v57, 4  ;;  %v2744_v30 = vadd.f32 %v7629_v29, %v2709_v40  ;;  %v2608_v52 = vadd.f32 %v7882_v17, %v2449_v20  ;;  %v6367_v19 = vld [vmem:[%s9262_s5 + $0x20] sm:$0xff] }
 0x27b   : > { %5965 = vmatmul.msk.bf16.gmra.mxu3 %vm905_vm2, %v7398_v13  ;;  %6011 = vmatmul.msk.bf16.gmra.mxu1 %vm3794_vm15, %v7934_v59  ;;  %v3454_v32 = vrot.slane %v3453_v51, 4  ;;  %v7949_v42 = vunpack.c.l.b16 %v2319_v2  ;;  %v7953_v50 = vsel %vm6977_vm6, %v5967_v24, %v2474_v39  ;;  %v2476_v38 = vrot.slane %v2474_v39, 4 }
 0x27c   : > { %v7947_v6 = vpop.f32.mrf.mxu0  ;;  %v3213_v61 = vsel %vm7677_vm10, %v2932_v49, %v3212_v1  ;;  %v2832_v17 = vpack.c.bf16 %v2744_v30, %v2744_v30  ;;  %v2643_v34 = vadd.f32 %v7596_v45, %v2608_v52  ;;  %v7958_v13 = vld [vmem:[#allocation2 + $0x34] sm:$0xf]  ;;  %v2477_v41 = vrot.slane %v7871_v5, 5  ;;  %4404 = vmatpush.bf16.msrb.mxu3 %v6367_v19 }
 0x27d   : > { %3214 = vst [vmem:[#allocation2 + $0x3c] sm:$0xf] %v3213_v61  ;;  %v2211_v16 = vpop.f32.mrf.mxu2  ;;  %v7966_v18 = vld [vmem:[#allocation2 + $0x38] sm:$0x1]  ;;  %v3456_v58 = vshll.u32 %v7958_v13, 16  ;;  %v3460_v25 = vshrl.u32 %v7958_v13, 16  ;;  %v4294_v57 = vunpack.c.l.b16 %v7860_v26  ;;  %v2479_v24 = vunpack.c.l.b16 %v7953_v50 }
 0x27e   : > { %v7964_v23 = vpop.f32.mrf.mxu3  ;;  %v2935_v5 = vshrl.u32 %v2832_v17, 16  ;;  %v2675_v40 = vmax.f32 %v2643_v34, 0.0  ;;  %v2275_v20 = vadd.f32 %v2211_v16, %v7806_v55  ;;  %v3466_v2 = vshll.u32 %v7966_v18, 16  ;;  %v6369_v55 = vld [vmem:[%s9262_s5 + $0x30] sm:$0xff]  ;;  %v3216_v50 = vld [vmem:[#allocation2 + $0x44] sm:$0x1] }
 0x27f   : > { %5998 = vmatmul.msk.bf16.gmra.mxu0 %vm905_vm2, %v7395_v60  ;;  %v3458_v1 = vrot.slane %v3456_v58, 5  ;;  %v3462_v51 = vrot.slane %v3460_v25, 4  ;;  %v2478_v39 = vsel %vm6977_vm6, %v2476_v38, %v2477_v41  ;;  %v2938_v30 = vshll.u32 %v2832_v17, 16  ;;  %v6363_v60 = vld [vmem:[%s9262_s5] sm:$0xff] }
 0x280   : > { %v2937_v49 = vrot.slane %v2935_v5, 7  ;;  %v2710_v52 = vmul.f32 %v7618_v53, %v2675_v40  ;;  %v2450_v61 = vadd.f32 %v2386_v28, %v2275_v20  ;;  %v2480_v38 = vunpack.c.l.b16 %v2478_v39  ;;  %v6450_v25 = vld [vmem:[%s6544_s18 + $0xc0] sm:$0xff]  ;;  %4545 = vmatpush.bf16.msrb.mxu0 %v6369_v55  ;;  %4079 = vmatpush.bf16.msrb.mxu2 %v6363_v60 }
 0x281   : > { %v3459_v34 = vsel %vm6584_vm3, %v3454_v32, %v3458_v1  ;;  %v3463_v19 = vor.u32 %v3462_v51, %v3458_v1  ;;  %v6112_v41 = vrot.slane %v7600_v22, 9  ;;  %v3468_v20 = vrot.slane %v3466_v2, 5 }
 0x282   : > { %v2940_v17 = vor.u32 %v2938_v30, %v2937_v49  ;;  %v2942_v16 = vrot.slane %v2937_v49, 4  ;;  %v2745_v28 = vadd.f32 %v7629_v29, %v2710_v52  ;;  %v2609_v58 = vadd.f32 %v7912_v54, %v2450_v61  ;;  %5933 = vmatmul.msk.bf16.gmra.mxu2 %vm905_vm2, %v6450_v25 }
 0x283   : > { %v3464_v40 = vrot.slane %v3463_v19, 4  ;;  %v3742_v0 = vunpack.c.l.b16 %v3459_v34  ;;  %v4179_v32 = vrot.slane %v7622_v35, 5 }
 0x284   : > { %v7994_v5 = vpop.f32.mrf.mxu0  ;;  %v2941_v22 = vsel %vm7721_vm13, %v2933_v15, %v2940_v17  ;;  %v3217_v1 = vsel %vm7731_vm14, %v2942_v16, %v3216_v50  ;;  %v2833_v51 = vpack.c.bf16 %v2745_v28, %v2745_v28  ;;  %v2644_v54 = vadd.f32 %v7596_v45, %v2609_v58  ;;  %v8002_v39 = vld [vmem:[#allocation2 + $0x3c] sm:$0xf] }
 0x285   : > { %3215 = vst.msk [vmem:[#allocation2 + $0x40] sm:$0xf] %vm2767_vm7, %v2941_v22  ;;  %v2214_v49 = vpop.f32.mrf.mxu2  ;;  %v3469_v2 = vsel %vm6584_vm3, %v3464_v40, %v3468_v20  ;;  %v3471_v35 = vshrl.u32 %v8002_v39, 16  ;;  %v3474_v52 = vshll.u32 %v8002_v39, 16  ;;  %v4180_v15 = vsel %vm6977_vm6, %v6112_v41, %v4179_v32  ;;  %v3219_v20 = vld [vmem:[#allocation2 + $0x48] sm:$0xf] }
 0x286   : > { %v2391_v30 = vpop.f32.mrf.mxu3  ;;  %3218 = vst [vmem:[#allocation2 + $0x44] sm:$0x1] %v3217_v1  ;;  %v2944_v61 = vshrl.u32 %v2833_v51, 16  ;;  %v2947_v60 = vshll.u32 %v2833_v51, 16  ;;  %v2676_v55 = vmax.f32 %v2644_v54, 0.0  ;;  %v2276_v50 = vadd.f32 %v2214_v49, %v7402_v63 }
 0x287   : > { %v3743_v34 = vunpack.c.l.b16 %v3469_v2  ;;  %v3473_v19 = vrot.slane %v3471_v35, 4  ;;  %v3476_v17 = vrot.slane %v3474_v52, 5  ;;  %v4181_v16 = vrot.slane %v4179_v32, 4 }
 0x288   : > { %v8012_v28 = vrot.slane %v2944_v61, 7  ;;  %v2711_v58 = vmul.f32 %v7618_v53, %v2676_v55  ;;  %v2451_v25 = vadd.f32 %v7964_v23, %v2276_v50  ;;  %v4182_v40 = vrot.slane %v7683_v56, 5 }
 0x289   : > { %v8019_v41 = vadd.f32 %v7421_v3, %v7442_v37  ;;  %v8021_v22 = vpack.c.b16 %v3743_v34, %v3742_v0  ;;  %v2481_v63 = vpack.c.b16 %v2480_v38, %v2479_v24  ;;  %v9450_v1 = vunpack.c.l.b16 %v7832_v9 }
 0x28a   : > { %v2949_v51 = vor.u32 %v2947_v60, %v8012_v28  ;;  %v2746_v23 = vadd.f32 %v7629_v29, %v2711_v58  ;;  %v2610_v56 = vadd.f32 %v7947_v6, %v2451_v25  ;;  %v9451_v3 = vpack.c.b16 %v7949_v42, %v7927_v44 }
 0x28b   : > { %v8027_v32 = vpack.c.b16 %v4294_v57, %v9450_v1  ;;  %v3477_v37 = vor.u32 %v3476_v17, %v3473_v19  ;;  %6012 = vmatmul.msk.bf16.gmra.mxu1 %vm3794_vm15, %v8021_v22  ;;  %v4183_v26 = vsel %vm6977_vm6, %v4181_v16, %v4182_v40  ;;  %v4289_v0 = vunpack.c.l.b16 %v4180_v15 }
 0x28c   : > { %5966 = vmatmul.msk.bf16.gmra.mxu3 %vm905_vm2, %v9451_v3  ;;  %v8038_v9 = vpop.f32.mrf.mxu0  ;;  %v6115_v57 = vrot.slane %v7845_v14, 9  ;;  %v4200_v24 = vrot.slane %v7890_v4, 5  ;;  %v2950_v6 = vrot.slane %v8012_v28, 4  ;;  %v3220_v44 = vsel %vm7677_vm10, %v2949_v51, %v3219_v20  ;;  %v8048_v54 = vld [vmem:[#allocation2 + $0x40] sm:$0xf] }
 0x28d   : > { %v2834_v42 = vpack.c.bf16 %v2746_v23, %v2746_v23  ;;  %v2645_v38 = vadd.f32 %v7596_v45, %v2610_v56  ;;  %3221 = vst [vmem:[#allocation2 + $0x48] sm:$0xf] %v3220_v44  ;;  %v2216_v49 = vpop.f32.mrf.mxu2  ;;  %v8050_v35 = vld [vmem:[#allocation2 + $0x44] sm:$0x1]  ;;  %v3480_v14 = vshll.u32 %v8048_v54, 16  ;;  %v3484_v4 = vshrl.u32 %v8048_v54, 16 }
 0x28e   : > { %v2394_v2 = vpop.f32.mrf.mxu3  ;;  %v4290_v52 = vunpack.c.l.b16 %v4183_v26  ;;  %v4201_v15 = vsel %vm6977_vm6, %v6115_v57, %v4200_v24  ;;  %v2277_v55 = vadd.f32 %v2216_v49, %v7818_v8  ;;  %v6326_v45 = vld [vmem:[%s6544_s18 + $0xcc] sm:$0xff]  ;;  %v3478_v50 = vrot.slane %v3477_v37, 4 }
 0x28f   : > { %v2952_v61 = vshrl.u32 %v2834_v42, 16  ;;  %v2677_v60 = vmax.f32 %v2645_v38, 0.0  ;;  %5999 = vmatmul.msk.bf16.gmra.mxu0 %vm905_vm2, %v2481_v63  ;;  %v2955_v34 = vshll.u32 %v2834_v42, 16  ;;  %v3482_v19 = vrot.slane %v3480_v14, 5  ;;  %v3223_v20 = vld [vmem:[#allocation2 + $0x50] sm:$0x1] }
 0x290   : > { %v3486_v17 = vrot.slane %v3484_v4, 4  ;;  %v3490_v16 = vshll.u32 %v8050_v35, 16  ;;  %v2452_v25 = vadd.f32 %v2391_v30, %v2277_v55  ;;  %v4202_v40 = vrot.slane %v4200_v24, 4 }
 0x291   : > { %v2954_v28 = vrot.slane %v2952_v61, 7  ;;  %v2712_v58 = vmul.f32 %v7618_v53, %v2677_v60  ;;  %v3483_v1 = vsel %vm6584_vm3, %v3478_v50, %v3482_v19  ;;  %v4321_v8 = vpack.c.b16 %v4290_v52, %v4289_v0 }
 0x292   : > { %v3487_v51 = vor.u32 %v3486_v17, %v3482_v19  ;;  %v4203_v23 = vrot.slane %v7893_v10, 5  ;;  %v2611_v37 = vadd.f32 %v7994_v5, %v2452_v25  ;;  %5934 = vmatmul.msk.bf16.gmra.mxu2 %vm905_vm2, %v6326_v45  ;;  %v3492_v30 = vrot.slane %v3490_v16, 5 }
 0x293   : > { %v2957_v63 = vor.u32 %v2955_v34, %v2954_v28  ;;  %v2959_v56 = vrot.slane %v2954_v28, 4  ;;  %v2747_v3 = vadd.f32 %v7629_v29, %v2712_v58  ;;  %v4295_v24 = vunpack.c.l.b16 %v4201_v15  ;;  %v8078_v29 = vld [vmem:[%s9259_s2] ss:$0 sm:$0xff] }
 0x294   : > { %v8067_v26 = vpop.f32.mrf.mxu0  ;;  %v3488_v53 = vrot.slane %v3487_v51, 4  ;;  %v4204_v57 = vsel %vm6977_vm6, %v4202_v40, %v4203_v23  ;;  %v2646_v5 = vadd.f32 %v8078_v29, %v2611_v37  ;;  %v8081_v42 = vld [vmem:[#allocation2 + $0x48] sm:$0xf]  ;;  %v3744_v55 = vunpack.c.l.b16 %v3483_v1  ;;  %v8096_v28 = vld [vmem:[%s9260_s3] ss:$0 sm:$0xff] }
 0x295   : > { %v2958_v0 = vsel %vm7721_vm13, %v2950_v6, %v2957_v63  ;;  %v3224_v10 = vsel %vm7731_vm14, %v2959_v56, %v3223_v20  ;;  %v2835_v44 = vpack.c.bf16 %v2747_v3, %v2747_v3  ;;  %v2219_v38 = vpop.f32.mrf.mxu2  ;;  %v3495_v14 = vshrl.u32 %v8081_v42, 16  ;;  %v3226_v40 = vld [vmem:[#allocation2 + $0x54] sm:$0xf]  ;;  %v8107_v63 = vld [vmem:[%s9261_s4] ss:$0 sm:$0xff] }
 0x296   : > { %3222 = vst.msk [vmem:[#allocation2 + $0x4c] sm:$0xf] %vm2767_vm7, %v2958_v0  ;;  %v2396_v49 = vpop.f32.mrf.mxu3  ;;  %v3493_v6 = vsel %vm6584_vm3, %v3488_v53, %v3492_v30  ;;  %v3498_v4 = vshll.u32 %v8081_v42, 16  ;;  %v4296_v52 = vunpack.c.l.b16 %v4204_v57  ;;  %v2678_v61 = vmax.f32 %v2646_v5, 0.0 }
 0x297   : > { %3225 = vst [vmem:[#allocation2 + $0x50] sm:$0x1] %v3224_v10  ;;  %v2961_v15 = vshrl.u32 %v2835_v44, 16  ;;  %v2278_v60 = vadd.f32 %v2219_v38, %v7416_v48  ;;  %v3745_v45 = vunpack.c.l.b16 %v3493_v6  ;;  %v3497_v50 = vrot.slane %v3495_v14, 4 }
 0x298   : > { %v3500_v34 = vrot.slane %v3498_v4, 5  ;;  %v8089_v19 = vpack.c.b16 %v4296_v52, %v4295_v24  ;;  %v2964_v16 = vshll.u32 %v2835_v44, 16  ;;  %v2713_v58 = vmul.f32 %v8096_v28, %v2678_v61  ;;  %v8123_v24 = vld [vmem:[#allocation2 + $0xc] sm:$0xff] }
 0x299   : > { %v8091_v17 = vrot.slane %v2961_v15, 7  ;;  %v2453_v25 = vadd.f32 %v2394_v2, %v2278_v60  ;;  %v8099_v20 = vpack.c.b16 %v3745_v45, %v3744_v55  ;;  %v6116_v1 = vrot.slane %v7920_v21, 9  ;;  %v6381_v55 = vld [vmem:[#allocation2] sm:$0xff] }
 0x29a   : > { %9452 = vst [vmem:[#allocation32_spill] sm:$0xff] %v8089_v19  ;;  %v3501_v48 = vor.u32 %v3500_v34, %v3497_v50  ;;  %v4207_v51 = vrot.slane %v7958_v13, 5  ;;  %v2748_v56 = vadd.f32 %v8107_v63, %v2713_v58  ;;  %v4210_v2 = vrot.slane %v7966_v18, 5 }
 0x29b   : > { %v2966_v23 = vor.u32 %v2964_v16, %v8091_v17  ;;  %v2612_v3 = vadd.f32 %v8038_v9, %v2453_v25  ;;  %v2967_v37 = vrot.slane %v8091_v17, 4  ;;  %6013 = vmatmul.msk.bf16.gmra.mxu1 %vm3794_vm15, %v8099_v20  ;;  %v6117_v0 = vrot.slane %v8002_v39, 9 }
 0x29c   : > { %6136 = vmatmul.msk.bf16.vlgmr.msrb.gmra.mxu3 %vm3794_vm15, %v4321_v8  ;;  %v8116_v21 = vpop.f32.mrf.mxu0  ;;  %v3502_v13 = vrot.slane %v3501_v48, 4  ;;  %v4208_v53 = vsel %vm6977_vm6, %v6116_v1, %v4207_v51  ;;  %v4209_v30 = vrot.slane %v4207_v51, 4  ;;  %v2836_v9 = vpack.c.bf16 %v2748_v56, %v2748_v56 }
 0x29d   : > { %v3227_v57 = vsel %vm7677_vm10, %v2966_v23, %v3226_v40  ;;  %v2647_v8 = vadd.f32 %v8078_v29, %v2612_v3  ;;  %v8125_v18 = vld [vmem:[#allocation2 + $0x4c] sm:$0xf]  ;;  %v2221_v10 = vpop.f32.mrf.mxu2  ;;  %v4297_v4 = vunpack.c.l.b16 %v4208_v53  ;;  %v4214_v25 = vrot.slane %v8048_v54, 5  ;;  %v3230_v40 = vld [vmem:[#allocation2 + $0x5c] sm:$0x1] }
 0x29e   : > { %3228 = vst [vmem:[#allocation2 + $0x54] sm:$0xf] %v3227_v57  ;;  %v2399_v44 = vpop.f32.mrf.mxu3  ;;  %v8128_v5 = vld [vmem:[#allocation2 + $0x50] sm:$0x1]  ;;  %v3504_v38 = vshll.u32 %v8125_v18, 16  ;;  %v3508_v6 = vshrl.u32 %v8125_v18, 16  ;;  %v4211_v14 = vsel %vm6977_vm6, %v4209_v30, %v4210_v2  ;;  %v2279_v60 = vadd.f32 %v2221_v10, %v7822_v27 }
 0x29f   : > { %v2969_v52 = vshrl.u32 %v2836_v9, 16  ;;  %v2972_v15 = vshll.u32 %v2836_v9, 16  ;;  %v2679_v61 = vmax.f32 %v2647_v8, 0.0  ;;  %6164 = vmatmul.msk.bf16.vlgmr.msrb.gmra.mxu0 %vm3794_vm15, %v8123_v24  ;;  %v3514_v50 = vshll.u32 %v8128_v5, 16 }
 0x2a0   : > { %v3506_v39 = vrot.slane %v3504_v38, 5  ;;  %v3510_v45 = vrot.slane %v3508_v6, 4  ;;  %v4298_v34 = vunpack.c.l.b16 %v4211_v14  ;;  %v2454_v58 = vadd.f32 %v2396_v49, %v2279_v60 }
 0x2a1   : > { %v2971_v17 = vrot.slane %v2969_v52, 7  ;;  %v2714_v16 = vmul.f32 %v8096_v28, %v2679_v61  ;;  %v3516_v1 = vrot.slane %v3514_v50, 5  ;;  %v4215_v30 = vsel %vm6977_vm6, %v6117_v0, %v4214_v25 }
 0x2a2   : > { %v3507_v48 = vsel %vm6584_vm3, %v3502_v13, %v3506_v39  ;;  %v3511_v27 = vor.u32 %v3510_v45, %v3506_v39  ;;  %v8142_v51 = vpack.c.b16 %v4298_v34, %v4297_v4  ;;  %v2613_v2 = vadd.f32 %v8067_v26, %v2454_v58  ;;  %6096 = vmatmul.msk.bf16.vlgmr.msrb.gmra.mxu2 %vm3794_vm15, %v6381_v55 }
 0x2a3   : > { %v2974_v23 = vor.u32 %v2972_v15, %v2971_v17  ;;  %v2976_v56 = vrot.slane %v2971_v17, 4  ;;  %v2749_v3 = vadd.f32 %v8107_v63, %v2714_v16  ;;  %v3746_v54 = vunpack.c.l.b16 %v3507_v48 }
 0x2a4   : > { %9453 = vst [vmem:[#allocation5_spill] sm:$0xff] %v8142_v51  ;;  %v8147_v53 = vpop.f32.mrf.mxu0  ;;  %v3512_v49 = vrot.slane %v3511_v27, 4  ;;  %v4216_v13 = vrot.slane %v4214_v25, 4  ;;  %v2648_v10 = vadd.f32 %v8078_v29, %v2613_v2  ;;  %v4217_v50 = vrot.slane %v8050_v35, 5  ;;  %v3233_v25 = vld [vmem:[#allocation2 + $0x60] sm:$0xf] }
 0x2a5   : > { %v2975_v57 = vsel %vm7721_vm13, %v2967_v37, %v2974_v23  ;;  %v3231_v9 = vsel %vm7731_vm14, %v2976_v56, %v3230_v40  ;;  %v2837_v8 = vpack.c.bf16 %v2749_v3, %v2749_v3  ;;  %v8156_v26 = vld [vmem:[#allocation2 + $0x54] sm:$0xf]  ;;  %v2224_v38 = vpop.f32.mrf.mxu2  ;;  %v4299_v37 = vunpack.c.l.b16 %v4215_v30  ;;  %v8189_v30 = vld [vmem:[#allocation2 + $0x18] sm:$0xff] }
 0x2a6   : > { %3229 = vst.msk [vmem:[#allocation2 + $0x58] sm:$0xf] %vm2767_vm7, %v2975_v57  ;;  %v2401_v6 = vpop.f32.mrf.mxu3  ;;  %v3517_v14 = vsel %vm6584_vm3, %v3512_v49, %v3516_v1  ;;  %v3519_v0 = vshrl.u32 %v8156_v26, 16  ;;  %v3522_v4 = vshll.u32 %v8156_v26, 16  ;;  %v2680_v61 = vmax.f32 %v2648_v10, 0.0 }
 0x2a7   : > { %3232 = vst [vmem:[#allocation2 + $0x5c] sm:$0x1] %v3231_v9  ;;  %v2978_v52 = vshrl.u32 %v2837_v8, 16  ;;  %v2981_v15 = vshll.u32 %v2837_v8, 16  ;;  %v2280_v60 = vadd.f32 %v2224_v38, %v7433_v47  ;;  %v3747_v55 = vunpack.c.l.b16 %v3517_v14 }
 0x2a8   : > { %v3521_v39 = vrot.slane %v3519_v0, 4  ;;  %v3524_v45 = vrot.slane %v3522_v4, 5  ;;  %v2715_v17 = vmul.f32 %v8096_v28, %v2680_v61  ;;  %v6118_v58 = vrot.slane %v8081_v42, 9 }
 0x2a9   : > { %v8165_v34 = vrot.slane %v2978_v52, 7  ;;  %v2455_v16 = vadd.f32 %v2399_v44, %v2280_v60  ;;  %v8169_v40 = vpack.c.b16 %v3747_v55, %v3746_v54  ;;  %v4218_v27 = vsel %vm6977_vm6, %v4216_v13, %v4217_v50 }
 0x2aa   : > { %v3525_v48 = vor.u32 %v3524_v45, %v3521_v39  ;;  %v4221_v47 = vrot.slane %v8125_v18, 5  ;;  %v2750_v23 = vadd.f32 %v8107_v63, %v2715_v17  ;;  %v4300_v3 = vunpack.c.l.b16 %v4218_v27  ;;  %v3237_v17 = vld [vmem:[#allocation2 + $0x68] sm:$0x1] }
 0x2ab   : > { %v2983_v1 = vor.u32 %v2981_v15, %v8165_v34  ;;  %v2984_v35 = vrot.slane %v8165_v34, 4  ;;  %v2614_v56 = vadd.f32 %v8116_v21, %v2455_v16  ;;  %6014 = vmatmul.msk.bf16.gmra.mxu1 %vm3794_vm15, %v8169_v40  ;;  %v4224_v57 = vrot.slane %v8128_v5, 5 }
 0x2ac   : > { %6137 = vmatmul.msk.bf16.gmra.mxu3 %vm3794_vm15, %v7794_v43  ;;  %v8182_v42 = vpop.f32.mrf.mxu0  ;;  %v3526_v44 = vrot.slane %v3525_v48, 4  ;;  %v4222_v18 = vsel %vm6977_vm6, %v6118_v58, %v4221_v47  ;;  %v4223_v2 = vrot.slane %v4221_v47, 4  ;;  %v2838_v54 = vpack.c.bf16 %v2750_v23, %v2750_v23 }
 0x2ad   : > { %v3234_v49 = vsel %vm7677_vm10, %v2983_v1, %v3233_v25  ;;  %v2649_v21 = vadd.f32 %v8078_v29, %v2614_v56  ;;  %v3318_v13 = vld [vmem:[#allocation2 + $0x58] sm:$0xf]  ;;  %v2226_v9 = vpop.f32.mrf.mxu2  ;;  %v8192_v0 = vpack.c.b16 %v4300_v3, %v4299_v37  ;;  %v4301_v25 = vunpack.c.l.b16 %v4222_v18 }
 0x2ae   : > { %3235 = vst [vmem:[#allocation2 + $0x60] sm:$0xf] %v3234_v49  ;;  %v2404_v8 = vpop.f32.mrf.mxu3  ;;  %v3319_v10 = vld [vmem:[#allocation2 + $0x5c] sm:$0x1]  ;;  %v3528_v38 = vshll.u32 %v3318_v13, 16  ;;  %v3532_v14 = vshrl.u32 %v3318_v13, 16  ;;  %v2281_v61 = vadd.f32 %v2226_v9, %v8019_v41  ;;  %v4225_v5 = vsel %vm6977_vm6, %v4223_v2, %v4224_v57 }
 0x2af   : > { %9454 = vst [vmem:[#allocation34_spill] sm:$0xff] %v8192_v0  ;;  %v2986_v4 = vshrl.u32 %v2838_v54, 16  ;;  %v2989_v52 = vshll.u32 %v2838_v54, 16  ;;  %v2681_v15 = vmax.f32 %v2649_v21, 0.0  ;;  %6165 = vmatmul.msk.bf16.gmra.mxu0 %vm3794_vm15, %v8189_v30  ;;  %v3538_v39 = vshll.u32 %v3319_v10, 16 }
 0x2b0   : > { %v3530_v60 = vrot.slane %v3528_v38, 5  ;;  %v3534_v55 = vrot.slane %v3532_v14, 4  ;;  %v2456_v34 = vadd.f32 %v2401_v6, %v2281_v61  ;;  %v4302_v37 = vunpack.c.l.b16 %v4225_v5  ;;  %v3240_v5 = vld [vmem:[#allocation2 + $0x6c] sm:$0xf] }
 0x2b1   : > { %v2988_v45 = vrot.slane %v2986_v4, 7  ;;  %v2716_v50 = vmul.f32 %v8096_v28, %v2681_v15  ;;  %v3540_v41 = vrot.slane %v3538_v39, 5  ;;  %v6119_v3 = vrot.slane %v8156_v26, 9 }
 0x2b2   : > { %v3531_v16 = vsel %vm6584_vm3, %v3526_v44, %v3530_v60  ;;  %v3535_v58 = vor.u32 %v3534_v55, %v3530_v60  ;;  %v2615_v1 = vadd.f32 %v8147_v53, %v2456_v34  ;;  %6097 = vmatmul.msk.bf16.gmra.mxu2 %vm3794_vm15, %v8123_v24  ;;  %v8208_v56 = vpack.c.b16 %v4302_v37, %v4301_v25 }
 0x2b3   : > { %v2991_v48 = vor.u32 %v2989_v52, %v2988_v45  ;;  %v2993_v27 = vrot.slane %v2988_v45, 4  ;;  %v2751_v47 = vadd.f32 %v8107_v63, %v2716_v50  ;;  %v4228_v44 = vrot.slane %v3318_v13, 5 }
 0x2b4   : > { %v8206_v23 = vpop.f32.mrf.mxu0  ;;  %v3536_v6 = vrot.slane %v3535_v58, 4  ;;  %9455 = vst [vmem:[#allocation35_spill] sm:$0xff] %v8208_v56  ;;  %v2650_v53 = vadd.f32 %v8078_v29, %v2615_v1  ;;  %v4231_v57 = vrot.slane %v3319_v10, 5  ;;  %v3748_v4 = vunpack.c.l.b16 %v3531_v16 }
 0x2b5   : > { %v2992_v18 = vsel %vm7721_vm13, %v2984_v35, %v2991_v48  ;;  %v3238_v2 = vsel %vm7731_vm14, %v2993_v27, %v3237_v17  ;;  %v2839_v49 = vpack.c.bf16 %v2751_v47, %v2751_v47  ;;  %v2229_v24 = vpop.f32.mrf.mxu2  ;;  %v4229_v26 = vsel %vm6977_vm6, %v6119_v3, %v4228_v44  ;;  %v8227_v10 = vld [vmem:[#allocation2 + $0x60] sm:$0xf]  ;;  %v8246_v27 = vld [vmem:[#allocation2 + $0x24] sm:$0xff]  ;;  %v8248_v3 = vpop.f32.mrf.mxu1 }
 0x2b6   : > { %3236 = vst.msk [vmem:[#allocation2 + $0x64] sm:$0xf] %vm2767_vm7, %v2992_v18  ;;  %v2406_v54 = vpop.f32.mrf.mxu3  ;;  %v3541_v21 = vsel %vm6584_vm3, %v3536_v6, %v3540_v41  ;;  %v4230_v13 = vrot.slane %v4228_v44, 4  ;;  %v2682_v9 = vmax.f32 %v2650_v53, 0.0  ;;  %v2282_v38 = vadd.f32 %v2229_v24, %v7447_v31 }
 0x2b7   : > { %3239 = vst [vmem:[#allocation2 + $0x68] sm:$0x1] %v3238_v2  ;;  %v2995_v35 = vshrl.u32 %v2839_v49, 16  ;;  %v2998_v14 = vshll.u32 %v2839_v49, 16  ;;  %v3749_v52 = vunpack.c.l.b16 %v3541_v21  ;;  %v4303_v50 = vunpack.c.l.b16 %v4229_v26 }
 0x2b8   : > { %v4232_v15 = vsel %vm6977_vm6, %v4230_v13, %v4231_v57  ;;  %v2717_v60 = vmul.f32 %v8096_v28, %v2682_v9  ;;  %v2457_v55 = vadd.f32 %v2404_v8, %v2282_v38  ;;  %v3543_v8 = vshrl.u32 %v8227_v10, 16  ;;  %v3244_v38 = vld [vmem:[#allocation2 + $0x74] sm:$0x1] }
 0x2b9   : > { %v2997_v61 = vrot.slane %v2995_v35, 7  ;;  %v4304_v39 = vunpack.c.l.b16 %v4232_v15  ;;  %v8225_v45 = vpack.c.b16 %v3749_v52, %v3748_v4  ;;  %v3546_v16 = vshll.u32 %v8227_v10, 16 }
 0x2ba   : > { %v2752_v31 = vadd.f32 %v8107_v63, %v2717_v60  ;;  %v2616_v37 = vadd.f32 %v8182_v42, %v2457_v55  ;;  %v2130_v41 = vadd.f32 %v7438_v46, %v7456_v33  ;;  %v6371_v33 = vld [vmem:[%s9262_s5 + $0x40] sm:$0xff]  ;;  %v3545_v53 = vrot.slane %v3543_v8, 4 }
 0x2bb   : > { %v3000_v34 = vor.u32 %v2998_v14, %v2997_v61  ;;  %6015 = vmatmul.msk.bf16.gmra.mxu1 %vm3794_vm15, %v8225_v45  ;;  %v8239_v58 = vpack.c.b16 %v4304_v39, %v4303_v50  ;;  %v3001_v44 = vrot.slane %v2997_v61, 4  ;;  %v3548_v24 = vrot.slane %v3546_v16, 5 }
 0x2bc   : > { %6138 = vmatmul.msk.bf16.gmra.mxu3 %vm3794_vm15, %v8027_v32  ;;  %v8235_v17 = vpop.f32.mrf.mxu0  ;;  %v2840_v25 = vpack.c.bf16 %v2752_v31, %v2752_v31  ;;  %v2651_v48 = vadd.f32 %v8078_v29, %v2616_v37  ;;  %4708 = vmatpush.bf16.msrb.mxu1 %v6371_v33 }
 0x2bd   : > { %9456 = vst [vmem:[#allocation36_spill] sm:$0xff] %v8239_v58  ;;  %v3241_v42 = vsel %vm7677_vm10, %v3000_v34, %v3240_v5  ;;  %v2231_v47 = vpop.f32.mrf.mxu2  ;;  %v3321_v6 = vld [vmem:[#allocation2 + $0x64] sm:$0xf]  ;;  %v3549_v14 = vor.u32 %v3548_v24, %v3545_v53 }
 0x2be   : > { %3242 = vst [vmem:[#allocation2 + $0x6c] sm:$0xf] %v3241_v42  ;;  %v2409_v1 = vpop.f32.mrf.mxu3  ;;  %v3003_v18 = vshrl.u32 %v2840_v25, 16  ;;  %v2683_v2 = vmax.f32 %v2651_v48, 0.0  ;;  %v2283_v49 = vadd.f32 %v2231_v47, %v2130_v41  ;;  %v3322_v46 = vld [vmem:[#allocation2 + $0x68] sm:$0x1] }
 0x2bf   : > { %6166 = vmatmul.msk.bf16.gmra.mxu0 %vm3794_vm15, %v8246_v27  ;;  %v3552_v21 = vshll.u32 %v3321_v6, 16  ;;  %v3556_v26 = vshrl.u32 %v3321_v6, 16  ;;  %v3006_v57 = vshll.u32 %v2840_v25, 16  ;;  %v3562_v15 = vshll.u32 %v3322_v46, 16 }
 0x2c0   : > { %v3005_v13 = vrot.slane %v3003_v18, 7  ;;  %v2718_v35 = vmul.f32 %v8096_v28, %v2683_v2  ;;  %v2458_v9 = vadd.f32 %v2406_v54, %v2283_v49  ;;  %v3550_v50 = vrot.slane %v3549_v14, 4  ;;  %v9457_v18 = vld [vmem:[#allocation18_spill] sm:$0xff] }
 0x2c1   : > { %v3554_v4 = vrot.slane %v3552_v21, 5  ;;  %v3558_v52 = vrot.slane %v3556_v26, 4  ;;  %v6120_v54 = vrot.slane %v8227_v10, 9  ;;  %v4235_v31 = vrot.slane %v3321_v6, 5 }
 0x2c2   : > { %v3008_v61 = vor.u32 %v3006_v57, %v3005_v13  ;;  %v3010_v60 = vrot.slane %v3005_v13, 4  ;;  %v2753_v55 = vadd.f32 %v8107_v63, %v2718_v35  ;;  %v2617_v39 = vadd.f32 %v8206_v23, %v2458_v9  ;;  %6098 = vmatmul.msk.bf16.gmra.mxu2 %vm3794_vm15, %v8189_v30  ;;  %v3247_v35 = vld [vmem:[#allocation2 + $0x78] sm:$0xf] }
 0x2c3   : > { %v3559_v34 = vor.u32 %v3558_v52, %v3554_v4  ;;  %v3564_v25 = vrot.slane %v3562_v15, 5  ;;  %v4236_v48 = vsel %vm6977_vm6, %v6120_v54, %v4235_v31  ;;  %v4237_v10 = vrot.slane %v4235_v31, 4 }
 0x2c4   : > { %v8260_v5 = vpop.f32.mrf.mxu0  ;;  %v3009_v37 = vsel %vm7721_vm13, %v3001_v44, %v3008_v61  ;;  %v3245_v8 = vsel %vm7731_vm14, %v3010_v60, %v3244_v38  ;;  %v2841_v16 = vpack.c.bf16 %v2753_v55, %v2753_v55  ;;  %v2652_v41 = vadd.f32 %v8078_v29, %v2617_v39  ;;  %v8271_v44 = vpop.f32.mrf.mxu1 }
 0x2c5   : > { %3243 = vst.msk [vmem:[#allocation2 + $0x70] sm:$0xf] %vm2767_vm7, %v3009_v37  ;;  %v2234_v23 = vpop.f32.mrf.mxu2  ;;  %v3560_v42 = vrot.slane %v3559_v34, 4  ;;  %v3555_v49 = vsel %vm6584_vm3, %v3550_v50, %v3554_v4  ;;  %v4238_v24 = vrot.slane %v3322_v46, 5  ;;  %v3323_v15 = vld [vmem:[#allocation2 + $0x6c] sm:$0xf]  ;;  %v4305_v46 = vunpack.c.l.b16 %v4236_v48 }
 0x2c6   : > { %v2411_v30 = vpop.f32.mrf.mxu3  ;;  %3246 = vst [vmem:[#allocation2 + $0x74] sm:$0x1] %v3245_v8  ;;  %v3012_v47 = vshrl.u32 %v2841_v16, 16  ;;  %v2684_v6 = vmax.f32 %v2652_v41, 0.0  ;;  %v2284_v2 = vadd.f32 %v2234_v23, %v9457_v18  ;;  %v3015_v33 = vshll.u32 %v2841_v16, 16  ;;  %v9458_v50 = vld [vmem:[#allocation17_spill] sm:$0xff] }
 0x2c7   : > { %v3565_v53 = vsel %vm6584_vm3, %v3560_v42, %v3564_v25  ;;  %v3750_v9 = vunpack.c.l.b16 %v3555_v49  ;;  %v4239_v38 = vsel %vm6977_vm6, %v4237_v10, %v4238_v24  ;;  %v3570_v55 = vshll.u32 %v3323_v15, 16  ;;  %v9459_v34 = vld [vmem:[#allocation16_spill] sm:$0xff]  ;;  %v8294_v8 = vld [vmem:[#allocation2 + $0x30] sm:$0xff] }
 0x2c8   : > { %v3014_v21 = vrot.slane %v3012_v47, 7  ;;  %v2719_v26 = vmul.f32 %v8096_v28, %v2684_v6  ;;  %v2459_v13 = vadd.f32 %v2409_v1, %v2284_v2  ;;  %v3751_v57 = vunpack.c.l.b16 %v3565_v53 }
 0x2c9   : > { %v3567_v1 = vshrl.u32 %v3323_v15, 16  ;;  %v4306_v39 = vunpack.c.l.b16 %v4239_v38  ;;  %v2132_v54 = vadd.f32 %v9459_v34, %v9458_v50  ;;  %v3572_v2 = vrot.slane %v3570_v55, 5 }
 0x2ca   : > { %v3017_v14 = vor.u32 %v3015_v33, %v3014_v21  ;;  %v2754_v52 = vadd.f32 %v8107_v63, %v2719_v26  ;;  %v2618_v4 = vadd.f32 %v8235_v17, %v2459_v13  ;;  %v8285_v61 = vpack.c.b16 %v3751_v57, %v3750_v9 }
 0x2cb   : > { %v8298_v42 = vpack.c.b16 %v4306_v39, %v4305_v46  ;;  %v3018_v25 = vrot.slane %v3014_v21, 4  ;;  %v3569_v18 = vrot.slane %v3567_v1, 4  ;;  %v6121_v34 = vrot.slane %v3323_v15, 9 }
 0x2cc   : > { %6139 = vmatmul.msk.bf16.gmra.mxu3 %vm3794_vm15, %v8089_v19  ;;  %v8287_v60 = vpop.f32.mrf.mxu0  ;;  %v3248_v31 = vsel %vm7677_vm10, %v3017_v14, %v3247_v35  ;;  %v2842_v37 = vpack.c.bf16 %v2754_v52, %v2754_v52  ;;  %v2653_v17 = vadd.f32 %v8078_v29, %v2618_v4  ;;  %6016 = vmatmul.msk.bf16.gmra.mxu1 %vm3794_vm15, %v8285_v61  ;;  %v3324_v23 = vld [vmem:[#allocation2 + $0x70] sm:$0xf]  ;;  %v8303_v13 = vpop.f32.mrf.mxu1  ;;  %v3251_v35 = vld [vmem:[#allocation2 + $0x80] sm:$0x1] }
 0x2cd   : > { %3249 = vst [vmem:[#allocation2 + $0x78] sm:$0xf] %v3248_v31  ;;  %v2236_v16 = vpop.f32.mrf.mxu2  ;;  %v3325_v6 = vld [vmem:[#allocation2 + $0x74] sm:$0x1]  ;;  %v3576_v49 = vshll.u32 %v3324_v23, 16  ;;  %v3580_v33 = vshrl.u32 %v3324_v23, 16  ;;  %v3573_v21 = vor.u32 %v3572_v2, %v3569_v18 }
 0x2ce   : > { %v2414_v41 = vpop.f32.mrf.mxu3  ;;  %9460 = vst [vmem:[#allocation6_spill] sm:$0xff] %v8298_v42  ;;  %v3020_v48 = vshrl.u32 %v2842_v37, 16  ;;  %v2685_v10 = vmax.f32 %v2653_v17, 0.0  ;;  %v2285_v47 = vadd.f32 %v2236_v16, %v2132_v54  ;;  %v3023_v24 = vshll.u32 %v2842_v37, 16 }
 0x2cf   : > { %6167 = vmatmul.msk.bf16.gmra.mxu0 %vm3794_vm15, %v8294_v8  ;;  %v3578_v9 = vrot.slane %v3576_v49, 5  ;;  %v3582_v38 = vrot.slane %v3580_v33, 4  ;;  %v3586_v14 = vshll.u32 %v3325_v6, 16  ;;  %v3574_v39 = vrot.slane %v3573_v21, 4 }
 0x2d0   : > { %v3022_v53 = vrot.slane %v3020_v48, 7  ;;  %v2720_v26 = vmul.f32 %v8096_v28, %v2685_v10  ;;  %v2460_v57 = vadd.f32 %v2411_v30, %v2285_v47  ;;  %v4242_v30 = vrot.slane %v3324_v23, 5 }
 0x2d1   : > { %v3583_v50 = vor.u32 %v3582_v38, %v3578_v9  ;;  %v3588_v48 = vrot.slane %v3586_v14, 5  ;;  %v3579_v2 = vsel %vm6584_vm3, %v3574_v39, %v3578_v9  ;;  %v3254_v38 = vld [vmem:[#allocation2 + $0x84] sm:$0xf] }
 0x2d2   : > { %v3025_v52 = vor.u32 %v3023_v24, %v3022_v53  ;;  %v3027_v4 = vrot.slane %v3022_v53, 4  ;;  %v2755_v46 = vadd.f32 %v8107_v63, %v2720_v26  ;;  %v2619_v1 = vadd.f32 %v8260_v5, %v2460_v57  ;;  %6099 = vmatmul.msk.bf16.gmra.mxu2 %vm3794_vm15, %v8246_v27 }
 0x2d3   : > { %v3584_v27 = vrot.slane %v3583_v50, 4  ;;  %v4243_v10 = vsel %vm6977_vm6, %v6121_v34, %v4242_v30  ;;  %v4244_v15 = vrot.slane %v4242_v30, 4  ;;  %v4245_v53 = vrot.slane %v3325_v6, 5 }
 0x2d4   : > { %v8309_v55 = vpop.f32.mrf.mxu0  ;;  %v3026_v54 = vsel %vm7721_vm13, %v3018_v25, %v3025_v52  ;;  %v3252_v31 = vsel %vm7731_vm14, %v3027_v4, %v3251_v35  ;;  %v2843_v37 = vpack.c.bf16 %v2755_v46, %v2755_v46  ;;  %v2654_v17 = vadd.f32 %v8078_v29, %v2619_v1  ;;  %v9461_v25 = vld [vmem:[#allocation38_spill] sm:$0xff]  ;;  %v3326_v6 = vld [vmem:[#allocation2 + $0x78] sm:$0xf] }
 0x2d5   : > { %3250 = vst.msk [vmem:[#allocation2 + $0x7c] sm:$0xf] %vm2767_vm7, %v3026_v54  ;;  %v2239_v5 = vpop.f32.mrf.mxu2  ;;  %v3589_v33 = vsel %vm6584_vm3, %v3584_v27, %v3588_v48  ;;  %v3752_v14 = vunpack.c.l.b16 %v3579_v2  ;;  %v4246_v52 = vsel %vm6977_vm6, %v4244_v15, %v4245_v53  ;;  %v4307_v1 = vunpack.c.l.b16 %v4243_v10  ;;  %v9463_v54 = vld [vmem:[#allocation23_spill] sm:$0xff] }
 0x2d6   : > { %v2416_v16 = vpop.f32.mrf.mxu3  ;;  %3253 = vst [vmem:[#allocation2 + $0x80] sm:$0x1] %v3252_v31  ;;  %v3029_v23 = vshrl.u32 %v2843_v37, 16  ;;  %v2686_v47 = vmax.f32 %v2654_v17, 0.0  ;;  %v2286_v18 = vadd.f32 %v2239_v5, %v9461_v25  ;;  %v3032_v49 = vshll.u32 %v2843_v37, 16  ;;  %v9464_v31 = vld [vmem:[#allocation37_spill] sm:$0xff] }
 0x2d7   : > { %v8325_v35 = vpop.f32.mrf.mxu1  ;;  %v3753_v21 = vunpack.c.l.b16 %v3589_v33  ;;  %v3591_v50 = vshrl.u32 %v3326_v6, 16  ;;  %v3594_v34 = vshll.u32 %v3326_v6, 16  ;;  %v4308_v30 = vunpack.c.l.b16 %v4246_v52  ;;  %v8342_v27 = vld [vmem:[#allocation2 + $0x3c] sm:$0xff] }
 0x2d8   : > { %v3031_v24 = vrot.slane %v3029_v23, 7  ;;  %v2721_v26 = vmul.f32 %v8096_v28, %v2686_v47  ;;  %v2461_v57 = vadd.f32 %v2414_v41, %v2286_v18  ;;  %v2134_v37 = vadd.f32 %v9464_v31, %v9463_v54 }
 0x2d9   : > { %v8333_v39 = vpack.c.b16 %v3753_v21, %v3752_v14  ;;  %v8346_v23 = vpack.c.b16 %v4308_v30, %v4307_v1  ;;  %v3593_v33 = vrot.slane %v3591_v50, 4  ;;  %v3596_v53 = vrot.slane %v3594_v34, 5 }
 0x2da   : > { %v3034_v4 = vor.u32 %v3032_v49, %v3031_v24  ;;  %v2756_v9 = vadd.f32 %v8107_v63, %v2721_v26  ;;  %v2620_v46 = vadd.f32 %v8287_v60, %v2461_v57  ;;  %v3035_v47 = vrot.slane %v3031_v24, 4 }
 0x2db   : > { %9462 = vst [vmem:[#allocation11_spill] sm:$0xff] %v8333_v39  ;;  %v3597_v24 = vor.u32 %v3596_v53, %v3593_v33 }
 0x2dc   : > { %6140 = vmatmul.msk.bf16.gmra.mxu3 %vm3794_vm15, %v8142_v51  ;;  %v8335_v41 = vpop.f32.mrf.mxu0  ;;  %v3255_v17 = vsel %vm7677_vm10, %v3034_v4, %v3254_v38  ;;  %v2844_v5 = vpack.c.bf16 %v2756_v9, %v2756_v9  ;;  %v2655_v60 = vadd.f32 %v8078_v29, %v2620_v46  ;;  %6017 = vmatmul.msk.bf16.gmra.mxu1 %vm3794_vm15, %v8333_v39  ;;  %v3327_v15 = vld [vmem:[#allocation2 + $0x7c] sm:$0xf]  ;;  %v3258_v9 = vld [vmem:[#allocation2 + $0x8c] sm:$0x1] }
 0x2dd   : > { %3256 = vst [vmem:[#allocation2 + $0x84] sm:$0xf] %v3255_v17  ;;  %v2241_v48 = vpop.f32.mrf.mxu2  ;;  %v3328_v49 = vld [vmem:[#allocation2 + $0x80] sm:$0x1]  ;;  %v3600_v26 = vshll.u32 %v3327_v15, 16  ;;  %v3604_v57 = vshrl.u32 %v3327_v15, 16 }
 0x2de   : > { %v2419_v10 = vpop.f32.mrf.mxu3  ;;  %v3037_v25 = vshrl.u32 %v2844_v5, 16  ;;  %v2687_v18 = vmax.f32 %v2655_v60, 0.0  ;;  %v2287_v2 = vadd.f32 %v2241_v48, %v2134_v37  ;;  %v3040_v38 = vshll.u32 %v2844_v5, 16 }
 0x2df   : > { %6168 = vmatmul.msk.bf16.gmra.mxu0 %vm3794_vm15, %v8342_v27  ;;  %v8351_v4 = vpop.f32.mrf.mxu1  ;;  %v3602_v46 = vrot.slane %v3600_v26, 5  ;;  %v3606_v1 = vrot.slane %v3604_v57, 4  ;;  %v3610_v30 = vshll.u32 %v3328_v49, 16  ;;  %v3598_v17 = vrot.slane %v3597_v24, 4 }
 0x2e0   : > { %v3039_v21 = vrot.slane %v3037_v25, 7  ;;  %v2722_v14 = vmul.f32 %v8096_v28, %v2687_v18  ;;  %v2462_v52 = vadd.f32 %v2416_v16, %v2287_v2  ;;  %v6122_v5 = vrot.slane %v3326_v6, 9 }
 0x2e1   : > { %v3607_v16 = vor.u32 %v3606_v1, %v3602_v46  ;;  %v4249_v60 = vrot.slane %v3327_v15, 5  ;;  %v3612_v53 = vrot.slane %v3610_v30, 5 }
 0x2e2   : > { %v3042_v54 = vor.u32 %v3040_v38, %v3039_v21  ;;  %v3044_v31 = vrot.slane %v3039_v21, 4  ;;  %v2757_v37 = vadd.f32 %v8107_v63, %v2722_v14  ;;  %v2621_v50 = vadd.f32 %v8309_v55, %v2462_v52  ;;  %6100 = vmatmul.msk.bf16.gmra.mxu2 %vm3794_vm15, %v8294_v8 }
 0x2e3   : > { %v3608_v8 = vrot.slane %v3607_v16, 4  ;;  %v4250_v26 = vsel %vm6977_vm6, %v6122_v5, %v4249_v60  ;;  %v4251_v6 = vrot.slane %v4249_v60, 4  ;;  %v3603_v38 = vsel %vm6584_vm3, %v3598_v17, %v3602_v46 }
 0x2e4   : > { %v8357_v34 = vpop.f32.mrf.mxu0  ;;  %v3043_v48 = vsel %vm7721_vm13, %v3035_v47, %v3042_v54  ;;  %v3259_v25 = vsel %vm7731_vm14, %v3044_v31, %v3258_v9  ;;  %v2845_v18 = vpack.c.bf16 %v2757_v37, %v2757_v37  ;;  %v2656_v2 = vadd.f32 %v8078_v29, %v2621_v50  ;;  %v9465_v47 = vld [vmem:[#allocation20_spill] sm:$0xff]  ;;  %v3261_v37 = vld [vmem:[#allocation2 + $0x90] sm:$0xf] }
 0x2e5   : > { %3257 = vst.msk [vmem:[#allocation2 + $0x88] sm:$0xf] %vm2767_vm7, %v3043_v48  ;;  %v2244_v55 = vpop.f32.mrf.mxu2  ;;  %v3613_v52 = vsel %vm6584_vm3, %v3608_v8, %v3612_v53  ;;  %v4252_v9 = vrot.slane %v3328_v49, 5  ;;  %v3754_v50 = vunpack.c.l.b16 %v3603_v38  ;;  %v3329_v49 = vld [vmem:[#allocation2 + $0x84] sm:$0xf]  ;;  %v4309_v60 = vunpack.c.l.b16 %v4250_v26  ;;  %v9468_v8 = vld [vmem:[#allocation22_spill] sm:$0xff] }
 0x2e6   : > { %v2421_v33 = vpop.f32.mrf.mxu3  ;;  %3260 = vst [vmem:[#allocation2 + $0x8c] sm:$0x1] %v3259_v25  ;;  %v3046_v15 = vshrl.u32 %v2845_v18, 16  ;;  %v2688_v57 = vmax.f32 %v2656_v2, 0.0  ;;  %v2288_v21 = vadd.f32 %v2244_v55, %v9465_v47  ;;  %v3049_v14 = vshll.u32 %v2845_v18, 16  ;;  %v9467_v55 = vld [vmem:[#allocation24_spill] sm:$0xff] }
 0x2e7   : > { %v3755_v31 = vunpack.c.l.b16 %v3613_v52  ;;  %v4253_v16 = vsel %vm6977_vm6, %v4251_v6, %v4252_v9  ;;  %v3615_v25 = vshrl.u32 %v3329_v49, 16  ;;  %v3618_v18 = vshll.u32 %v3329_v49, 16 }
 0x2e8   : > { %v3048_v24 = vrot.slane %v3046_v15, 7  ;;  %v2723_v1 = vmul.f32 %v8096_v28, %v2688_v57  ;;  %v2463_v30 = vadd.f32 %v2419_v10, %v2288_v21  ;;  %v8373_v54 = vpop.f32.mrf.mxu1  ;;  %v4310_v2 = vunpack.c.l.b16 %v4253_v16  ;;  %v8390_v57 = vld [vmem:[#allocation2 + $0x48] sm:$0xff] }
 0x2e9   : > { %v8381_v48 = vpack.c.b16 %v3755_v31, %v3754_v50  ;;  %v2136_v53 = vadd.f32 %v9468_v8, %v9467_v55  ;;  %v3617_v31 = vrot.slane %v3615_v25, 4 }
 0x2ea   : > { %v3051_v5 = vor.u32 %v3049_v14, %v3048_v24  ;;  %v2758_v46 = vadd.f32 %v8107_v63, %v2723_v1  ;;  %v2622_v17 = vadd.f32 %v8335_v41, %v2463_v30  ;;  %v8394_v38 = vpack.c.b16 %v4310_v2, %v4309_v60  ;;  %v3265_v60 = vld [vmem:[#allocation2 + $0x98] sm:$0x1] }
 0x2eb   : > { %9466 = vst [vmem:[#allocation7_spill] sm:$0xff] %v8381_v48  ;;  %v3052_v14 = vrot.slane %v3048_v24, 4 }
 0x2ec   : > { %6141 = vmatmul.msk.bf16.gmra.mxu3 %vm3794_vm15, %v8192_v0  ;;  %v8383_v10 = vpop.f32.mrf.mxu0  ;;  %v3262_v6 = vsel %vm7677_vm10, %v3051_v5, %v3261_v37  ;;  %v2846_v15 = vpack.c.bf16 %v2758_v46, %v2758_v46  ;;  %v2657_v41 = vadd.f32 %v8078_v29, %v2622_v17  ;;  %6018 = vmatmul.msk.bf16.gmra.mxu1 %vm3794_vm15, %v8381_v48  ;;  %v3330_v21 = vld [vmem:[#allocation2 + $0x88] sm:$0xf]  ;;  %v3620_v37 = vrot.slane %v3618_v18, 5 }
 0x2ed   : > { %3263 = vst [vmem:[#allocation2 + $0x90] sm:$0xf] %v3262_v6  ;;  %v2246_v26 = vpop.f32.mrf.mxu2  ;;  %v3331_v30 = vld [vmem:[#allocation2 + $0x8c] sm:$0x1]  ;;  %v3624_v50 = vshll.u32 %v3330_v21, 16  ;;  %v3628_v16 = vshrl.u32 %v3330_v21, 16 }
 0x2ee   : > { %v2424_v47 = vpop.f32.mrf.mxu3  ;;  %v3054_v52 = vshrl.u32 %v2846_v15, 16  ;;  %v2689_v9 = vmax.f32 %v2657_v41, 0.0  ;;  %v2289_v1 = vadd.f32 %v2246_v26, %v2136_v53  ;;  %v3057_v46 = vshll.u32 %v2846_v15, 16 }
 0x2ef   : > { %6169 = vmatmul.msk.bf16.gmra.mxu0 %vm3794_vm15, %v8390_v57  ;;  %v3621_v24 = vor.u32 %v3620_v37, %v3617_v31  ;;  %v3626_v2 = vrot.slane %v3624_v50, 5  ;;  %v3630_v6 = vrot.slane %v3628_v16, 4  ;;  %v3634_v53 = vshll.u32 %v3331_v30, 16 }
 0x2f0   : > { %v3056_v5 = vrot.slane %v3054_v52, 7  ;;  %v2724_v17 = vmul.f32 %v8096_v28, %v2689_v9  ;;  %v2464_v55 = vadd.f32 %v2421_v33, %v2289_v1  ;;  %v8399_v8 = vpop.f32.mrf.mxu1  ;;  %v6123_v52 = vrot.slane %v3329_v49, 9 }
 0x2f1   : > { %v3622_v15 = vrot.slane %v3621_v24, 4  ;;  %v3631_v33 = vor.u32 %v3630_v6, %v3626_v2  ;;  %v4256_v9 = vrot.slane %v3330_v21, 5  ;;  %v4259_v24 = vrot.slane %v3331_v30, 5 }
 0x2f2   : > { %v3059_v41 = vor.u32 %v3057_v46, %v3056_v5  ;;  %v3061_v26 = vrot.slane %v3056_v5, 4  ;;  %v2759_v0 = vadd.f32 %v8107_v63, %v2724_v17  ;;  %v2623_v25 = vadd.f32 %v8357_v34, %v2464_v55  ;;  %6101 = vmatmul.msk.bf16.gmra.mxu2 %vm3794_vm15, %v8342_v27 }
 0x2f3   : > { %v3632_v27 = vrot.slane %v3631_v33, 4  ;;  %v3636_v5 = vrot.slane %v3634_v53, 5  ;;  %v4257_v46 = vsel %vm6977_vm6, %v6123_v52, %v4256_v9  ;;  %v4258_v49 = vrot.slane %v4256_v9, 4  ;;  %v3268_v33 = vld [vmem:[#allocation2 + $0x9c] sm:$0xf] }
 0x2f4   : > { %v8405_v18 = vpop.f32.mrf.mxu0  ;;  %v3060_v1 = vsel %vm7721_vm13, %v3052_v14, %v3059_v41  ;;  %v3266_v31 = vsel %vm7731_vm14, %v3061_v26, %v3265_v60  ;;  %v2847_v37 = vpack.c.bf16 %v2759_v0, %v2759_v0  ;;  %v2658_v50 = vadd.f32 %v8078_v29, %v2623_v25  ;;  %v9469_v14 = vld [vmem:[#allocation25_spill] sm:$0xff]  ;;  %v3332_v30 = vld [vmem:[#allocation2 + $0x90] sm:$0xf] }
 0x2f5   : > { %3264 = vst.msk [vmem:[#allocation2 + $0x94] sm:$0xf] %vm2767_vm7, %v3060_v1  ;;  %v2249_v34 = vpop.f32.mrf.mxu2  ;;  %v3627_v0 = vsel %vm6584_vm3, %v3622_v15, %v3626_v2  ;;  %v3637_v29 = vsel %vm6584_vm3, %v3632_v27, %v3636_v5  ;;  %v4260_v9 = vsel %vm6977_vm6, %v4258_v49, %v4259_v24  ;;  %v9471_v27 = vld [vmem:[#allocation3_spill] sm:$0xff]  ;;  %v9472_v5 = vld [vmem:[#allocation26_spill] sm:$0xff] }
 0x2f6   : > { %v2426_v16 = vpop.f32.mrf.mxu3  ;;  %3267 = vst [vmem:[#allocation2 + $0x98] sm:$0x1] %v3266_v31  ;;  %v3063_v21 = vshrl.u32 %v2847_v37, 16  ;;  %v2690_v17 = vmax.f32 %v2658_v50, 0.0  ;;  %v2290_v55 = vadd.f32 %v2249_v34, %v9469_v14  ;;  %v3066_v60 = vshll.u32 %v2847_v37, 16 }
 0x2f7   : > { %v3757_v25 = vunpack.c.l.b16 %v3637_v29  ;;  %v3756_v52 = vunpack.c.l.b16 %v3627_v0  ;;  %v3639_v37 = vshrl.u32 %v3332_v30, 16  ;;  %v3642_v50 = vshll.u32 %v3332_v30, 16 }
 0x2f8   : > { %v8420_v6 = vrot.slane %v3063_v21, 7  ;;  %v2725_v53 = vmul.f32 %v8096_v28, %v2690_v17  ;;  %v2465_v41 = vadd.f32 %v2424_v47, %v2290_v55  ;;  %v8423_v26 = vpop.f32.mrf.mxu1  ;;  %v4311_v28 = vunpack.c.l.b16 %v4257_v46  ;;  %v8446_v17 = vld [vmem:[#allocation2 + $0x54] sm:$0xff] }
 0x2f9   : > { %v8432_v47 = vpack.c.b16 %v3757_v25, %v3756_v52  ;;  %v4312_v34 = vunpack.c.l.b16 %v4260_v9  ;;  %v2138_v49 = vadd.f32 %v9472_v5, %v9471_v27  ;;  %v3644_v52 = vrot.slane %v3642_v50, 5  ;;  %v3272_v5 = vld [vmem:[#allocation2 + $0xa4] sm:$0x1] }
 0x2fa   : > { %v3068_v2 = vor.u32 %v3066_v60, %v8420_v6  ;;  %v2760_v15 = vadd.f32 %v8107_v63, %v2725_v53  ;;  %v2624_v1 = vadd.f32 %v8383_v10, %v2465_v41  ;;  %v8443_v10 = vld [vmem:[%s9259_s2] ss:$0 sm:$0xff]  ;;  %v3069_v29 = vrot.slane %v8420_v6, 4 }
 0x2fb   : > { %9470 = vst [vmem:[#allocation8_spill] sm:$0xff] %v8432_v47  ;;  %v8450_v60 = vpack.c.b16 %v4312_v34, %v4311_v28  ;;  %v8458_v28 = vld [vmem:[%s9260_s3] ss:$0 sm:$0xff] }
 0x2fc   : > { %6142 = vmatmul.msk.bf16.gmra.mxu3 %vm3794_vm15, %v8208_v56  ;;  %v8434_v31 = vpop.f32.mrf.mxu0  ;;  %v3269_v63 = vsel %vm7677_vm10, %v3068_v2, %v3268_v33  ;;  %v2848_v21 = vpack.c.bf16 %v2760_v15, %v2760_v15  ;;  %v2659_v46 = vadd.f32 %v8443_v10, %v2624_v1  ;;  %6019 = vmatmul.msk.bf16.gmra.mxu1 %vm3794_vm15, %v8432_v47  ;;  %v3333_v0 = vld [vmem:[#allocation2 + $0x94] sm:$0xf]  ;;  %v3641_v33 = vrot.slane %v3639_v37, 4 }
 0x2fd   : > { %3270 = vst [vmem:[#allocation2 + $0x9c] sm:$0xf] %v3269_v63  ;;  %v2251_v14 = vpop.f32.mrf.mxu2  ;;  %v3334_v25 = vld [vmem:[#allocation2 + $0x98] sm:$0x1]  ;;  %v3648_v9 = vshll.u32 %v3333_v0, 16  ;;  %v3652_v2 = vshrl.u32 %v3333_v0, 16 }
 0x2fe   : > { %v2429_v55 = vpop.f32.mrf.mxu3  ;;  %9473 = vst [vmem:[#allocation9_spill] sm:$0xff] %v8450_v60  ;;  %v3071_v24 = vshrl.u32 %v2848_v21, 16  ;;  %v2691_v53 = vmax.f32 %v2659_v46, 0.0  ;;  %v2291_v41 = vadd.f32 %v2251_v14, %v2138_v49  ;;  %v3074_v1 = vshll.u32 %v2848_v21, 16  ;;  %v8466_v21 = vld [vmem:[%s9261_s4] ss:$0 sm:$0xff] }
 0x2ff   : > { %6170 = vmatmul.msk.bf16.gmra.mxu0 %vm3794_vm15, %v8446_v17  ;;  %v3645_v49 = vor.u32 %v3644_v52, %v3641_v33  ;;  %v3650_v63 = vrot.slane %v3648_v9, 5  ;;  %v3654_v46 = vrot.slane %v3652_v2, 4  ;;  %v3658_v37 = vshll.u32 %v3334_v25, 16 }
 0x300   : > { %v3073_v15 = vrot.slane %v3071_v24, 7  ;;  %v2726_v6 = vmul.f32 %v8458_v28, %v2691_v53  ;;  %v2466_v34 = vadd.f32 %v2426_v16, %v2291_v41  ;;  %v8461_v27 = vpop.f32.mrf.mxu1  ;;  %v6124_v33 = vrot.slane %v3332_v30, 9 }
 0x301   : > { %v3646_v53 = vrot.slane %v3645_v49, 4  ;;  %v3655_v41 = vor.u32 %v3654_v46, %v3650_v63  ;;  %v4263_v52 = vrot.slane %v3333_v0, 5 }
 0x302   : > { %v3076_v50 = vor.u32 %v3074_v1, %v3073_v15  ;;  %v3078_v14 = vrot.slane %v3073_v15, 4  ;;  %v2761_v24 = vadd.f32 %v8466_v21, %v2726_v6  ;;  %v2625_v56 = vadd.f32 %v8405_v18, %v2466_v34  ;;  %6102 = vmatmul.msk.bf16.gmra.mxu2 %vm3794_vm15, %v8390_v57 }
 0x303   : > { %v3656_v57 = vrot.slane %v3655_v41, 4  ;;  %v3660_v34 = vrot.slane %v3658_v37, 5  ;;  %v4264_v49 = vsel %vm6977_vm6, %v6124_v33, %v4263_v52  ;;  %v4265_v30 = vrot.slane %v4263_v52, 4  ;;  %v3275_v52 = vld [vmem:[#allocation2 + $0xa8] sm:$0xf] }
 0x304   : > { %v8472_v16 = vpop.f32.mrf.mxu0  ;;  %v3077_v9 = vsel %vm7721_vm13, %v3069_v29, %v3076_v50  ;;  %v3273_v2 = vsel %vm7731_vm14, %v3078_v14, %v3272_v5  ;;  %v2849_v15 = vpack.c.bf16 %v2761_v24, %v2761_v24  ;;  %v2660_v1 = vadd.f32 %v8443_v10, %v2625_v56  ;;  %v9474_v29 = vld [vmem:[#allocation27_spill] sm:$0xff] }
 0x305   : > { %3271 = vst.msk [vmem:[#allocation2 + $0xa0] sm:$0xf] %vm2767_vm7, %v3077_v9  ;;  %v2254_v18 = vpop.f32.mrf.mxu2  ;;  %v3651_v5 = vsel %vm6584_vm3, %v3646_v53, %v3650_v63  ;;  %v3661_v56 = vsel %vm6584_vm3, %v3656_v57, %v3660_v34  ;;  %v4266_v24 = vrot.slane %v3334_v25, 5  ;;  %v3335_v25 = vld [vmem:[#allocation2 + $0x9c] sm:$0xf] }
 0x306   : > { %v2431_v6 = vpop.f32.mrf.mxu3  ;;  %3274 = vst [vmem:[#allocation2 + $0xa4] sm:$0x1] %v3273_v2  ;;  %v3080_v0 = vshrl.u32 %v2849_v15, 16  ;;  %v2692_v46 = vmax.f32 %v2660_v1, 0.0  ;;  %v2292_v50 = vadd.f32 %v2254_v18, %v9474_v29  ;;  %v3083_v14 = vshll.u32 %v2849_v15, 16  ;;  %v9476_v29 = vld [vmem:[#allocation30_spill] sm:$0xff] }
 0x307   : > { %v3759_v33 = vunpack.c.l.b16 %v3661_v56  ;;  %v3758_v2 = vunpack.c.l.b16 %v3651_v5  ;;  %v4267_v1 = vsel %vm6977_vm6, %v4265_v30, %v4266_v24  ;;  %v4313_v15 = vunpack.c.l.b16 %v4264_v49  ;;  %v8505_v56 = vld [vmem:[#allocation2 + $0x60] sm:$0xff] }
 0x308   : > { %v3082_v9 = vrot.slane %v3080_v0, 7  ;;  %v2727_v37 = vmul.f32 %v8458_v28, %v2692_v46  ;;  %v2467_v41 = vadd.f32 %v2429_v55, %v2292_v50  ;;  %v8488_v47 = vpop.f32.mrf.mxu1  ;;  %v3663_v34 = vshrl.u32 %v3335_v25, 16  ;;  %v9477_v50 = vld [vmem:[#allocation29_spill] sm:$0xff]  ;;  %9478 = vst [vmem:[#allocation12_spill] sm:$0xff] %v8505_v56 }
 0x309   : > { %v8496_v57 = vpack.c.b16 %v3759_v33, %v3758_v2  ;;  %v3666_v0 = vshll.u32 %v3335_v25, 16  ;;  %v4314_v46 = vunpack.c.l.b16 %v4267_v1  ;;  %v2140_v30 = vadd.f32 %v9477_v50, %v9476_v29 }
 0x30a   : > { %v3085_v18 = vor.u32 %v3083_v14, %v3082_v9  ;;  %v2762_v63 = vadd.f32 %v8466_v21, %v2727_v37  ;;  %v2626_v53 = vadd.f32 %v8434_v31, %v2467_v41  ;;  %v3086_v33 = vrot.slane %v3082_v9, 4 }
 0x30b   : > { %9475 = vst [vmem:[#allocation19_spill] sm:$0xff] %v8496_v57  ;;  %v8509_v41 = vpack.c.b16 %v4314_v46, %v4313_v15  ;;  %v3279_v15 = vld [vmem:[#allocation2 + $0xb0] sm:$0x1] }
 0x30c   : > { %6143 = vmatmul.msk.bf16.gmra.mxu3 %vm3794_vm15, %v8239_v58  ;;  %v8498_v55 = vpop.f32.mrf.mxu0  ;;  %v3276_v5 = vsel %vm7677_vm10, %v3085_v18, %v3275_v52  ;;  %v2850_v14 = vpack.c.bf16 %v2762_v63, %v2762_v63  ;;  %v2661_v31 = vadd.f32 %v8443_v10, %v2626_v53  ;;  %6020 = vmatmul.msk.bf16.gmra.mxu1 %vm3794_vm15, %v8496_v57  ;;  %v3336_v37 = vld [vmem:[#allocation2 + $0xa0] sm:$0xf]  ;;  %v3665_v18 = vrot.slane %v3663_v34, 4 }
 0x30d   : > { %3277 = vst [vmem:[#allocation2 + $0xa8] sm:$0xf] %v3276_v5  ;;  %v2256_v49 = vpop.f32.mrf.mxu2  ;;  %v3337_v52 = vld [vmem:[#allocation2 + $0xa4] sm:$0x1]  ;;  %v3668_v63 = vrot.slane %v3666_v0, 5  ;;  %v3672_v53 = vshll.u32 %v3336_v37, 16 }
 0x30e   : > { %9479 = vst [vmem:[#allocation10_spill] sm:$0xff] %v8509_v41  ;;  %v3088_v2 = vshrl.u32 %v2850_v14, 16  ;;  %v2693_v1 = vmax.f32 %v2661_v31, 0.0  ;;  %v2293_v29 = vadd.f32 %v2256_v49, %v2140_v30  ;;  %v3676_v50 = vshrl.u32 %v3336_v37, 16 }
 0x30f   : > { %v2434_v24 = vpop.f32.mrf.mxu3  ;;  %6171 = vmatmul.msk.bf16.gmra.mxu0 %vm3794_vm15, %v8505_v56  ;;  %v3091_v58 = vshll.u32 %v2850_v14, 16  ;;  %v3669_v9 = vor.u32 %v3668_v63, %v3665_v18  ;;  %v3674_v46 = vrot.slane %v3672_v53, 5  ;;  %v3682_v30 = vshll.u32 %v3337_v52, 16 }
 0x310   : > { %v3090_v5 = vrot.slane %v3088_v2, 7  ;;  %v2728_v57 = vmul.f32 %v8458_v28, %v2693_v1  ;;  %v2468_v48 = vadd.f32 %v2431_v6, %v2293_v29  ;;  %v8514_v51 = vpop.f32.mrf.mxu1  ;;  %v3678_v31 = vrot.slane %v3676_v50, 4 }
 0x311   : > { %v3670_v14 = vrot.slane %v3669_v9, 4  ;;  %v6125_v2 = vrot.slane %v3335_v25, 9  ;;  %v4270_v1 = vrot.slane %v3336_v37, 5  ;;  %v3684_v63 = vrot.slane %v3682_v30, 5 }
 0x312   : > { %v3093_v49 = vor.u32 %v3091_v58, %v3090_v5  ;;  %v3095_v39 = vrot.slane %v3090_v5, 4  ;;  %v2763_v19 = vadd.f32 %v8466_v21, %v2728_v57  ;;  %v2627_v34 = vadd.f32 %v8472_v16, %v2468_v48  ;;  %6103 = vmatmul.msk.bf16.gmra.mxu2 %vm3794_vm15, %v8446_v17 }
 0x313   : > { %v3679_v6 = vor.u32 %v3678_v31, %v3674_v46  ;;  %v4271_v53 = vsel %vm6977_vm6, %v6125_v2, %v4270_v1  ;;  %v4272_v25 = vrot.slane %v4270_v1, 4  ;;  %v4273_v31 = vrot.slane %v3337_v52, 5  ;;  %v3282_v1 = vld [vmem:[#allocation2 + $0xb4] sm:$0xf] }
 0x314   : > { %v8520_v0 = vpop.f32.mrf.mxu0  ;;  %v3094_v29 = vsel %vm7721_vm13, %v3086_v33, %v3093_v49  ;;  %v3280_v58 = vsel %vm7731_vm14, %v3095_v39, %v3279_v15  ;;  %v2851_v18 = vpack.c.bf16 %v2763_v19, %v2763_v19  ;;  %v2662_v57 = vadd.f32 %v8443_v10, %v2627_v34  ;;  %v9480_v33 = vld [vmem:[#allocation28_spill] sm:$0xff]  ;;  %v8535_v9 = vld [vmem:[#allocation2 + $0xa8] sm:$0xf] }
 0x315   : > { %3278 = vst.msk [vmem:[#allocation2 + $0xac] sm:$0xf] %vm2767_vm7, %v3094_v29  ;;  %v2259_v48 = vpop.f32.mrf.mxu2  ;;  %v3680_v17 = vrot.slane %v3679_v6, 4  ;;  %v3675_v19 = vsel %vm6584_vm3, %v3670_v14, %v3674_v46  ;;  %v3690_v46 = vshll.u32 %v8535_v9, 16  ;;  %v4274_v14 = vsel %vm6977_vm6, %v4272_v25, %v4273_v31 }
 0x316   : > { %3281 = vst [vmem:[#allocation2 + $0xb0] sm:$0x1] %v3280_v58  ;;  %v3097_v37 = vshrl.u32 %v2851_v18, 16  ;;  %v2694_v50 = vmax.f32 %v2662_v57, 0.0  ;;  %v2294_v5 = vadd.f32 %v2259_v48, %v9480_v33  ;;  %v3100_v39 = vshll.u32 %v2851_v18, 16  ;;  %v9482_v33 = vld [vmem:[#allocation4_spill] sm:$0xff] }
 0x317   : > { %v2436_v16 = vpop.f32.mrf.mxu3  ;;  %v3685_v15 = vsel %vm6584_vm3, %v3680_v17, %v3684_v63  ;;  %v3760_v29 = vunpack.c.l.b16 %v3675_v19  ;;  %v3687_v58 = vshrl.u32 %v8535_v9, 16  ;;  %v2142_v25 = vadd.f32 %v8248_v3, %v9482_v33 }
 0x318   : > { %v8537_v30 = vrot.slane %v3097_v37, 7  ;;  %v2729_v49 = vmul.f32 %v8458_v28, %v2694_v50  ;;  %v2469_v34 = vadd.f32 %v2434_v24, %v2294_v5  ;;  %v8540_v6 = vpop.f32.mrf.mxu1  ;;  %v3761_v2 = vunpack.c.l.b16 %v3685_v15 }
 0x319   : > { %v4315_v24 = vunpack.c.l.b16 %v4271_v53  ;;  %v3689_v63 = vrot.slane %v3687_v58, 4  ;;  %v3692_v37 = vrot.slane %v3690_v46, 5  ;;  %v4316_v50 = vunpack.c.l.b16 %v4274_v14 }
 0x31a   : > { %v3102_v18 = vor.u32 %v3100_v39, %v8537_v30  ;;  %v2764_v52 = vadd.f32 %v8466_v21, %v2729_v49  ;;  %v2628_v57 = vadd.f32 %v8498_v55, %v2469_v34  ;;  %v8551_v48 = vpack.c.b16 %v3761_v2, %v3760_v29  ;;  %v8560_v39 = vld [vmem:[#allocation2 + $0x6c] sm:$0xff] }
 0x31b   : > { %v3693_v34 = vor.u32 %v3692_v37, %v3689_v63  ;;  %v8566_v29 = vpack.c.b16 %v4316_v50, %v4315_v24  ;;  %v6374_v24 = vld [vmem:[%s9262_s5 + $0x58] sm:$0xff]  ;;  %v6376_v37 = vld [vmem:[%s9262_s5 + $0x68] sm:$0xff]  ;;  %v3103_v50 = vrot.slane %v8537_v30, 4 }
 0x31c   : > { %6144 = vmatmul.msk.bf16.gmra.mxu3 %vm3794_vm15, %v8298_v42  ;;  %9481 = vst [vmem:[#allocation15_spill] sm:$0xff] %v8551_v48  ;;  %v8553_v17 = vpop.f32.mrf.mxu0  ;;  %v3283_v5 = vsel %vm7677_vm10, %v3102_v18, %v3282_v1  ;;  %v2852_v19 = vpack.c.bf16 %v2764_v52, %v2764_v52  ;;  %v2663_v55 = vadd.f32 %v8443_v10, %v2628_v57  ;;  %v3339_v15 = vld [vmem:[#allocation2 + $0xac] sm:$0xf] }
 0x31d   : > { %3284 = vst [vmem:[#allocation2 + $0xb4] sm:$0xf] %v3283_v5  ;;  %6021 = vmatmul.msk.bf16.gmra.mxu1 %vm3794_vm15, %v8551_v48  ;;  %v2261_v53 = vpop.f32.mrf.mxu2  ;;  %v8564_v49 = vld [vmem:[#allocation2 + $0xb0] sm:$0x1]  ;;  %v3696_v2 = vshll.u32 %v3339_v15, 16  ;;  %v3700_v3 = vshrl.u32 %v3339_v15, 16  ;;  %4995 = vmatpush.bf16.msra.mxu3 %v6376_v37 }
 0x31e   : > { %9483 = vst [vmem:[#allocation13_spill] sm:$0xff] %v8566_v29  ;;  %v3105_v1 = vshrl.u32 %v2852_v19, 16  ;;  %v2695_v58 = vmax.f32 %v2663_v55, 0.0  ;;  %v2295_v46 = vadd.f32 %v2261_v53, %v2142_v25  ;;  %v3706_v52 = vshll.u32 %v8564_v49, 16  ;;  %v3286_v25 = vld [vmem:[#allocation2 + $0xbc] sm:$0x1]  ;;  %4854 = vmatpush.bf16.msra.mxu2 %v6374_v24 }
 0x31f   : > { %v4406_v31 = vpop.f32.mrf.mxu3  ;;  %6172 = vmatmul.msk.bf16.gmra.mxu0 %vm3794_vm15, %v8560_v39  ;;  %v3698_v14 = vrot.slane %v3696_v2, 5  ;;  %v3702_v18 = vrot.slane %v3700_v3, 4  ;;  %v3108_v33 = vshll.u32 %v2852_v19, 16  ;;  %v3694_v55 = vrot.slane %v3693_v34, 4  ;;  %v3289_v48 = vld [vmem:[#allocation2 + $0xc0] sm:$0xf] }
 0x320   : > { %v3107_v57 = vrot.slane %v3105_v1, 7  ;;  %v2730_v5 = vmul.f32 %v8458_v28, %v2695_v58  ;;  %v2470_v42 = vadd.f32 %v2436_v16, %v2295_v46  ;;  %v8572_v63 = vpop.f32.mrf.mxu1  ;;  %v6126_v19 = vrot.slane %v8535_v9, 9 }
 0x321   : > { %v3703_v53 = vor.u32 %v3702_v18, %v3698_v14  ;;  %v3699_v30 = vsel %vm6584_vm3, %v3694_v55, %v3698_v14  ;;  %v3708_v34 = vrot.slane %v3706_v52, 5  ;;  %v4277_v18 = vrot.slane %v3339_v15, 5 }
 0x322   : > { %v3110_v2 = vor.u32 %v3108_v33, %v3107_v57  ;;  %v3112_v3 = vrot.slane %v3107_v57, 4  ;;  %v2765_v16 = vadd.f32 %v8466_v21, %v2730_v5  ;;  %v2629_v1 = vadd.f32 %v8520_v0, %v2470_v42  ;;  %6104 = vmatmul.msk.bf16.gmra.mxu2 %vm3794_vm15, %v8505_v56 }
 0x323   : > { %v3704_v46 = vrot.slane %v3703_v53, 4  ;;  %v4278_v37 = vsel %vm6977_vm6, %v6126_v19, %v4277_v18  ;;  %v3762_v55 = vunpack.c.l.b16 %v3699_v30 }
 0x324   : > { %v8586_v58 = vpop.f32.mrf.mxu0  ;;  %v3111_v9 = vsel %vm7721_vm13, %v3103_v50, %v3110_v2  ;;  %v3287_v57 = vsel %vm7731_vm14, %v3112_v3, %v3286_v25  ;;  %v2853_v42 = vpack.c.bf16 %v2765_v16, %v2765_v16  ;;  %v2664_v0 = vadd.f32 %v8443_v10, %v2629_v1  ;;  %v8595_v33 = vld [vmem:[#allocation2 + $0xb4] sm:$0xf] }
 0x325   : > { %3285 = vst.msk [vmem:[#allocation2 + $0xb8] sm:$0xf] %vm2767_vm7, %v3111_v9  ;;  %v4081_v5 = vpop.f32.mrf.mxu2  ;;  %v3709_v14 = vsel %vm6584_vm3, %v3704_v46, %v3708_v34  ;;  %v3711_v15 = vshrl.u32 %v8595_v33, 16  ;;  %v3714_v24 = vshll.u32 %v8595_v33, 16  ;;  %v4279_v2 = vrot.slane %v4277_v18, 4 }
 0x326   : > { %3288 = vst [vmem:[#allocation2 + $0xbc] sm:$0x1] %v3287_v57  ;;  %v3114_v50 = vshrl.u32 %v2853_v42, 16  ;;  %v2696_v25 = vmax.f32 %v2664_v0, 0.0  ;;  %v4082_v10 = vadd.f32 %v4081_v5, %v8271_v44  ;;  %v3763_v53 = vunpack.c.l.b16 %v3709_v14  ;;  %v8623_v14 = vld [vmem:[#allocation2 + $0x78] sm:$0xff] }
 0x327   : > { %v4408_v52 = vpop.f32.mrf.mxu3  ;;  %v4280_v3 = vrot.slane %v8564_v49, 5  ;;  %v3117_v1 = vshll.u32 %v2853_v42, 16  ;;  %v3713_v19 = vrot.slane %v3711_v15, 4  ;;  %v3716_v57 = vrot.slane %v3714_v24, 5 }
 0x328   : > { %v3116_v16 = vrot.slane %v3114_v50, 7  ;;  %v2731_v46 = vmul.f32 %v8458_v28, %v2696_v25  ;;  %v4486_v34 = vadd.f32 %v4406_v31, %v4082_v10  ;;  %v8607_v9 = vpop.f32.mrf.mxu1  ;;  %v8609_v56 = vpack.c.b16 %v3763_v53, %v3762_v55  ;;  %v6378_v28 = vld [vmem:[%s9262_s5 + $0x78] sm:$0xff]  ;;  %v6380_v53 = vld [vmem:[%s9262_s5 + $0x88] sm:$0xff] }
 0x329   : > { %v4281_v44 = vsel %vm6977_vm6, %v4279_v2, %v4280_v3  ;;  %v4317_v31 = vunpack.c.l.b16 %v4278_v37  ;;  %5158 = vmatpush.bf16.msra.mxu0 %v6378_v28  ;;  %5305 = vmatpush.bf16.msra.mxu1 %v6380_v53 }
 0x32a   : > { %v3119_v30 = vor.u32 %v3117_v1, %v3116_v16  ;;  %v2766_v18 = vadd.f32 %v8466_v21, %v2731_v46  ;;  %v4318_v49 = vunpack.c.l.b16 %v4281_v44  ;;  %v8638_v28 = vadd.f32 %v8553_v17, %v4486_v34 }
 0x32c   : > { %6145 = vmatmul.msk.bf16.gmra.mxu3 %vm3794_vm15, %v8346_v23  ;;  %v8619_v42 = vpop.f32.mrf.mxu0  ;;  %v3290_v0 = vsel %vm7677_vm10, %v3119_v30, %v3289_v48  ;;  %v2854_v5 = vpack.c.bf16 %v2766_v18, %v2766_v18  ;;  %v3342_v15 = vld [vmem:[#allocation2 + $0xb8] sm:$0xf]  ;;  %v8625_v21 = vpack.c.b16 %v4318_v49, %v4317_v31  ;;  %v3717_v48 = vor.u32 %v3716_v57, %v3713_v19 }
 0x32d   : > { %3291 = vst [vmem:[#allocation2 + $0xc0] sm:$0xf] %v3290_v0  ;;  %6022 = vmatmul.msk.bf16.gmra.mxu1 %vm3794_vm15, %v8609_v56  ;;  %v4083_v24 = vpop.f32.mrf.mxu2  ;;  %v3343_v37 = vld [vmem:[#allocation2 + $0xbc] sm:$0x1]  ;;  %v3720_v25 = vshll.u32 %v3342_v15, 16  ;;  %v3724_v10 = vshrl.u32 %v3342_v15, 16 }
 0x32e   : > { %9484 = vst [vmem:[#allocation14_spill] sm:$0xff] %v8625_v21  ;;  %v3122_v55 = vshrl.u32 %v2854_v5, 16  ;;  %v4084_v62 = vadd.f32 %v4083_v24, %v8303_v13  ;;  %v3730_v1 = vshll.u32 %v3343_v37, 16  ;;  %v3125_v44 = vshll.u32 %v2854_v5, 16  ;;  %v3293_v13 = vld [vmem:[#allocation2 + $0xc8] sm:$0x1] }
 0x32f   : > { %v4411_v50 = vpop.f32.mrf.mxu3  ;;  %6173 = vmatmul.msk.bf16.gmra.mxu0 %vm3794_vm15, %v8623_v14  ;;  %v3722_v2 = vrot.slane %v3720_v25, 5  ;;  %v3726_v3 = vrot.slane %v3724_v10, 4  ;;  %v3120_v49 = vrot.slane %v3116_v16, 4  ;;  %v3718_v0 = vrot.slane %v3717_v48, 4 }
 0x330   : > { %v3124_v46 = vrot.slane %v3122_v55, 7  ;;  %v4487_v30 = vadd.f32 %v4408_v52, %v4084_v62  ;;  %v8635_v18 = vpop.f32.mrf.mxu1  ;;  %v3732_v10 = vrot.slane %v3730_v1, 5  ;;  %v6127_v52 = vrot.slane %v8595_v33, 9 }
 0x331   : > { %v3727_v31 = vor.u32 %v3726_v3, %v3722_v2  ;;  %v4284_v5 = vrot.slane %v3342_v15, 5  ;;  %v3723_v16 = vsel %vm6584_vm3, %v3718_v0, %v3722_v2  ;;  %v4287_v53 = vrot.slane %v3343_v37, 5 }
 0x332   : > { %v3127_v19 = vor.u32 %v3125_v44, %v3124_v46  ;;  %v3129_v57 = vrot.slane %v3124_v46, 4  ;;  %6105 = vmatmul.msk.bf16.gmra.mxu2 %vm3794_vm15, %v8560_v39  ;;  %v3764_v3 = vunpack.c.l.b16 %v3723_v16 }
 0x333   : > { %v3728_v25 = vrot.slane %v3727_v31, 4  ;;  %v4285_v33 = vsel %vm6977_vm6, %v6127_v52, %v4284_v5  ;;  %v4286_v15 = vrot.slane %v4284_v5, 4  ;;  %v8660_v31 = vadd.f32 %v8586_v58, %v4487_v30 }
 0x334   : > { %v4554_v24 = vpop.f32.mrf.mxu0  ;;  %v3128_v55 = vsel %vm7721_vm13, %v3120_v49, %v3127_v19  ;;  %v3294_v17 = vsel %vm7731_vm14, %v3129_v57, %v3293_v13  ;;  %v4319_v44 = vunpack.c.l.b16 %v4285_v33  ;;  %v8668_v19 = vld [vmem:[#allocation2 + $0x84] sm:$0xff] }
 0x335   : > { %3292 = vst.msk [vmem:[#allocation2 + $0xc4] sm:$0xf] %vm2767_vm7, %v3128_v55  ;;  %v4086_v34 = vpop.f32.mrf.mxu2  ;;  %v3733_v62 = vsel %vm6584_vm3, %v3728_v25, %v3732_v10  ;;  %v4288_v2 = vsel %vm6977_vm6, %v4286_v15, %v4287_v53  ;;  %v8680_v10 = vld [vmem:[#allocation2 + $0xc0] sm:$0xf] }
 0x336   : > { %3295 = vst [vmem:[#allocation2 + $0xc8] sm:$0x1] %v3294_v17  ;;  %v4087_v7 = vadd.f32 %v4086_v34, %v8325_v35  ;;  %v3765_v11 = vunpack.c.l.b16 %v3733_v62  ;;  %v4320_v13 = vunpack.c.l.b16 %v4288_v2 }
 0x337   : > { %v4413_v48 = vpop.f32.mrf.mxu3 }
 0x338   : > { %v4488_v1 = vadd.f32 %v4411_v50, %v4087_v7  ;;  %v8657_v46 = vpop.f32.mrf.mxu1  ;;  %v8662_v49 = vpack.c.b16 %v3765_v11, %v3764_v3  ;;  %v8666_v37 = vpack.c.b16 %v4320_v13, %v4319_v44  ;;  %v9487_v13 = vld [vmem:[#allocation31_spill] sm:$0xff] }
 0x33a   : > { %9485 = vst [vmem:[#allocation18_spill] sm:$0xff] %v8666_v37  ;;  %v8678_v25 = vadd.f32 %v8619_v42, %v4488_v1 }
 0x33c   : > { %6146 = vmatmul.msk.bf16.gmra.mxu3 %vm3794_vm15, %v8394_v38  ;;  %v4557_v35 = vpop.f32.mrf.mxu0  ;;  %v8684_v52 = vld [vmem:[#allocation2 + $0xc4] sm:$0xf] }
 0x33d   : > { %6023 = vmatmul.msk.bf16.gmra.mxu1 %vm3794_vm15, %v8662_v49  ;;  %v4088_v50 = vpop.f32.mrf.mxu2  ;;  %v8686_v55 = vld [vmem:[#allocation2 + $0xc8] sm:$0x1]  ;;  %v4825_v17 = vrot.slane %v8684_v52, 5 }
 0x33e   : > { %v4089_v0 = vadd.f32 %v4088_v50, %v8351_v4  ;;  %v6204_v4 = vrot.slane %v8680_v10, 9  ;;  %v4828_v33 = vrot.slane %v8686_v55, 5 }
 0x33f   : > { %v4416_v57 = vpop.f32.mrf.mxu3  ;;  %6174 = vmatmul.msk.bf16.gmra.mxu0 %vm3794_vm15, %v8668_v19 }
 0x340   : > { %v4489_v58 = vadd.f32 %v4413_v48, %v4089_v0  ;;  %v8675_v30 = vpop.f32.mrf.mxu1  ;;  %v4826_v42 = vsel %vm6977_vm6, %v6204_v4, %v4825_v17  ;;  %v4827_v48 = vrot.slane %v4825_v17, 4 }
 0x341   : > { %v4830_v11 = vunpack.c.l.b16 %v4826_v42 }
 0x342   : > { %6106 = vmatmul.msk.bf16.gmra.mxu2 %vm3794_vm15, %v8623_v14  ;;  %v8694_v53 = vadd.f32 %v4554_v24, %v4489_v58  ;;  %v4829_v7 = vsel %vm6977_vm6, %v4827_v48, %v4828_v33 }
 0x343   : > { %v4831_v3 = vunpack.c.l.b16 %v4829_v7 }
 0x344   : > { %v4559_v5 = vpop.f32.mrf.mxu0 }
 0x345   : > { %v4091_v16 = vpop.f32.mrf.mxu2  ;;  %v8702_v44 = vpack.c.b16 %v4831_v3, %v4830_v11 }
 0x346   : > { %v4092_v62 = vadd.f32 %v4091_v16, %v8373_v54  ;;  %v8704_v54 = vld [vmem:[#allocation2 + $0x90] sm:$0xff] }
 0x347   : > { %v4418_v34 = vpop.f32.mrf.mxu3  ;;  %9486 = vst [vmem:[#allocation17_spill] sm:$0xff] %v8702_v44 }
 0x348   : > { %v4490_v15 = vadd.f32 %v4416_v57, %v4092_v62 }
 0x349   : > { %v8698_v2 = vpop.f32.mrf.mxu1 }
 0x34a   : > { %v8711_v58 = vadd.f32 %v4557_v35, %v4490_v15  ;;  %v9489_v15 = vld [vmem:[#allocation33_spill] sm:$0xff] }
 0x34c   : > { %6147 = vmatmul.msk.bf16.gmra.mxu3 %vm3794_vm15, %v8450_v60  ;;  %v4562_v1 = vpop.f32.mrf.mxu0 }
 0x34d   : > { %6188 = vmatmul.msk.bf16.vlgmr.msrb.gmra.mxu1 %vm3794_vm15, %v9487_v13  ;;  %v4093_v24 = vpop.f32.mrf.mxu2 }
 0x34e   : > { %v4094_v57 = vadd.f32 %v4093_v24, %v8399_v8 }
 0x34f   : > { %v4421_v50 = vpop.f32.mrf.mxu3  ;;  %6175 = vmatmul.msk.bf16.gmra.mxu0 %vm3794_vm15, %v8704_v54 }
 0x350   : > { %v4491_v0 = vadd.f32 %v4418_v34, %v4094_v57  ;;  %v8724_v34 = vld [vmem:[#allocation2 + $0x9c] sm:$0xff] }
 0x351   : > { %v8713_v4 = vpop.f32.mrf.mxu1  ;;  %9488 = vst [vmem:[#allocation16_spill] sm:$0xff] %v8724_v34 }
 0x352   : > { %6107 = vmatmul.msk.bf16.gmra.mxu2 %vm3794_vm15, %v8668_v19  ;;  %v8718_v33 = vadd.f32 %v4559_v5, %v4491_v0 }
 0x354   : > { %v4564_v17 = vpop.f32.mrf.mxu0 }
 0x355   : > { %v4096_v16 = vpop.f32.mrf.mxu2 }
 0x356   : > { %v4097_v62 = vadd.f32 %v4096_v16, %v8423_v26 }
 0x357   : > { %v4423_v42 = vpop.f32.mrf.mxu3 }
 0x358   : > { %v4492_v48 = vadd.f32 %v4421_v50, %v4097_v62 }
 0x359   : > { %v8720_v8 = vpop.f32.mrf.mxu1 }
 0x35a   : > { %v8731_v5 = vadd.f32 %v4562_v1, %v4492_v48 }
 0x35c   : > { %6148 = vmatmul.msk.bf16.gmra.mxu3 %vm3794_vm15, %v8509_v41  ;;  %v4567_v35 = vpop.f32.mrf.mxu0 }
 0x35d   : > { %6189 = vmatmul.msk.bf16.gmra.mxu1 %vm3794_vm15, %v9489_v15  ;;  %v4098_v7 = vpop.f32.mrf.mxu2 }
 0x35e   : > { %v4099_v3 = vadd.f32 %v4098_v7, %v8461_v27 }
 0x35f   : > { %v4426_v11 = vpop.f32.mrf.mxu3  ;;  %6176 = vmatmul.msk.bf16.gmra.mxu0 %vm3794_vm15, %v8724_v34 }
 0x360   : > { %v4493_v26 = vadd.f32 %v4423_v42, %v4099_v3  ;;  %v8744_v42 = vld [vmem:[#allocation2 + $0xa8] sm:$0xff] }
 0x361   : > { %v8733_v13 = vpop.f32.mrf.mxu1  ;;  %9490 = vst [vmem:[#allocation38_spill] sm:$0xff] %v8744_v42 }
 0x362   : > { %6108 = vmatmul.msk.bf16.gmra.mxu2 %vm3794_vm15, %v8704_v54  ;;  %v8738_v62 = vadd.f32 %v4564_v17, %v4493_v26 }
 0x364   : > { %v4569_v24 = vpop.f32.mrf.mxu0 }
 0x365   : > { %v4101_v50 = vpop.f32.mrf.mxu2 }
 0x366   : > { %v4102_v0 = vadd.f32 %v4101_v50, %v8488_v47 }
 0x367   : > { %v4428_v57 = vpop.f32.mrf.mxu3 }
 0x368   : > { %v4494_v16 = vadd.f32 %v4426_v11, %v4102_v0 }
 0x369   : > { %v8740_v27 = vpop.f32.mrf.mxu1 }
 0x36a   : > { %v8751_v17 = vadd.f32 %v4567_v35, %v4494_v16 }
 0x36c   : > { %6149 = vmatmul.msk.bf16.gmra.mxu3 %vm3794_vm15, %v8566_v29  ;;  %v4572_v1 = vpop.f32.mrf.mxu0 }
 0x36d   : > { %6190 = vmatmul.msk.bf16.gmra.mxu1 %vm3794_vm15, %v7934_v59  ;;  %v4103_v48 = vpop.f32.mrf.mxu2 }
 0x36e   : > { %v4104_v3 = vadd.f32 %v4103_v48, %v8514_v51 }
 0x36f   : > { %v4431_v7 = vpop.f32.mrf.mxu3  ;;  %6177 = vmatmul.msk.bf16.gmra.mxu0 %vm3794_vm15, %v8744_v42 }
 0x370   : > { %v4495_v47 = vadd.f32 %v4428_v57, %v4104_v3  ;;  %v8764_v57 = vld [vmem:[#allocation2 + $0xb4] sm:$0xff] }
 0x371   : > { %v8753_v11 = vpop.f32.mrf.mxu1  ;;  %9491 = vst [vmem:[#allocation23_spill] sm:$0xff] %v8764_v57 }
 0x372   : > { %6109 = vmatmul.msk.bf16.gmra.mxu2 %vm3794_vm15, %v8724_v34  ;;  %v8758_v29 = vadd.f32 %v4569_v24, %v4495_v47  ;;  %v6373_v47 = vld [vmem:[%s9262_s5 + $0x50] sm:$0xff] }
 0x373   : > { %4855 = vmatpush.bf16.msra.mxu2 %v6373_v47 }
 0x374   : > { %v4574_v26 = vpop.f32.mrf.mxu0 }
 0x375   : > { %v4106_v50 = vpop.f32.mrf.mxu2 }
 0x376   : > { %v4107_v12 = vadd.f32 %v4106_v50, %v8540_v6  ;;  %v6375_v6 = vld [vmem:[%s9262_s5 + $0x60] sm:$0xff] }
 0x377   : > { %v4433_v0 = vpop.f32.mrf.mxu3  ;;  %4996 = vmatpush.bf16.msra.mxu3 %v6375_v6 }
 0x378   : > { %v4496_v44 = vadd.f32 %v4431_v7, %v4107_v12 }
 0x379   : > { %v8760_v51 = vpop.f32.mrf.mxu1 }
 0x37a   : > { %v8774_v7 = vadd.f32 %v4572_v1, %v4496_v44 }
 0x37c   : > { %6150 = vmatmul.msk.bf16.gmra.mxu3 %vm3794_vm15, %v8625_v21  ;;  %v4577_v35 = vpop.f32.mrf.mxu0 }
 0x37d   : > { %6191 = vmatmul.msk.bf16.gmra.mxu1 %vm3794_vm15, %v8021_v22  ;;  %v4108_v16 = vpop.f32.mrf.mxu2 }
 0x37e   : > { %v4109_v12 = vadd.f32 %v4108_v16, %v8572_v63  ;;  %v6377_v63 = vld [vmem:[%s9262_s5 + $0x70] sm:$0xff] }
 0x37f   : > { %v4436_v48 = vpop.f32.mrf.mxu3  ;;  %6178 = vmatmul.msk.bf16.gmra.mxu0 %vm3794_vm15, %v8764_v57 }
 0x380   : > { %v4497_v24 = vadd.f32 %v4433_v0, %v4109_v12  ;;  %5159 = vmatpush.bf16.msra.mxu0 %v6377_v63 }
 0x381   : > { %v8776_v3 = vpop.f32.mrf.mxu1 }
 0x382   : > { %6110 = vmatmul.msk.bf16.gmra.mxu2 %vm3794_vm15, %v8744_v42  ;;  %v8787_v6 = vadd.f32 %v4574_v26, %v4497_v24  ;;  %v8793_v42 = vld [vmem:[#allocation2 + $0xc0] sm:$0xff] }
 0x383   : > { %9492 = vst [vmem:[#allocation37_spill] sm:$0xff] %v8793_v42 }
 0x384   : > { %v4579_v50 = vpop.f32.mrf.mxu0 }
 0x385   : > { %v4111_v16 = vpop.f32.mrf.mxu2 }
 0x386   : > { %v4112_v44 = vadd.f32 %v4111_v16, %v8607_v9 }
 0x387   : > { %v4438_v0 = vpop.f32.mrf.mxu3 }
 0x388   : > { %v4498_v1 = vadd.f32 %v4436_v48, %v4112_v44 }
 0x389   : > { %v8789_v12 = vpop.f32.mrf.mxu1 }
 0x38a   : > { %v8800_v26 = vadd.f32 %v4577_v35, %v4498_v1 }
 0x38c   : > { %6151 = vmatmul.msk.bf16.gmra.mxu3 %vm3794_vm15, %v8666_v37  ;;  %v4582_v21 = vpop.f32.mrf.mxu0 }
 0x38d   : > { %6192 = vmatmul.msk.bf16.gmra.mxu1 %vm3794_vm15, %v8099_v20  ;;  %v4113_v47 = vpop.f32.mrf.mxu2 }
 0x38e   : > { %v4114_v41 = vadd.f32 %v4113_v47, %v8635_v18  ;;  %v6457_v47 = vld [vmem:[#allocation2 + $0x18] sm:$0xff] }
 0x38f   : > { %v4441_v63 = vpop.f32.mrf.mxu3  ;;  %6179 = vmatmul.msk.bf16.gmra.mxu0 %vm3794_vm15, %v8793_v42 }
 0x390   : > { %v4499_v9 = vadd.f32 %v4438_v0, %v4114_v41 }
 0x391   : > { %v8802_v48 = vpop.f32.mrf.mxu1 }
 0x392   : > { %6111 = vmatmul.msk.bf16.gmra.mxu2 %vm3794_vm15, %v8764_v57  ;;  %v8807_v60 = vadd.f32 %v4579_v50, %v4499_v9 }
 0x394   : > { %v4584_v24 = vpop.f32.mrf.mxu0 }
 0x395   : > { %v4116_v16 = vpop.f32.mrf.mxu2 }
 0x396   : > { %v4117_v37 = vadd.f32 %v4116_v16, %v8657_v46 }
 0x397   : > { %v4443_v44 = vpop.f32.mrf.mxu3 }
 0x398   : > { %v4500_v34 = vadd.f32 %v4441_v63, %v4117_v37 }
 0x39a   : > { %v8809_v18 = vpop.f32.mrf.mxu1  ;;  %v8817_v37 = vadd.f32 %v4582_v21, %v4500_v34 }
 0x39c   : > { %6241 = vmatmul.msk.bf16.vlgmr.msra.gmra.mxu3 %vm3794_vm15, %v6457_v47  ;;  %v4587_v41 = vpop.f32.mrf.mxu0 }
 0x39d   : > { %6193 = vmatmul.msk.bf16.gmra.mxu1 %vm3794_vm15, %v8169_v40  ;;  %v4118_v35 = vpop.f32.mrf.mxu2 }
 0x39e   : > { %v4119_v1 = vadd.f32 %v4118_v35, %v8675_v30  ;;  %v6458_v35 = vld [vmem:[#allocation2 + $0x24] sm:$0xff] }
 0x39f   : > { %v4446_v0 = vpop.f32.mrf.mxu3  ;;  %6265 = vmatmul.msk.bf16.vlgmr.msra.gmra.mxu0 %vm3794_vm15, %v9489_v15 }
 0x3a0   : > { %v4501_v46 = vadd.f32 %v4443_v44, %v4119_v1 }
 0x3a2   : > { %v8819_v50 = vpop.f32.mrf.mxu1  ;;  %6213 = vmatmul.msk.bf16.vlgmr.msra.gmra.mxu2 %vm3794_vm15, %v7794_v43  ;;  %v8824_v57 = vadd.f32 %v4584_v24, %v4501_v46  ;;  %v6379_v43 = vld [vmem:[%s9262_s5 + $0x80] sm:$0xff] }
 0x3a3   : > { %5306 = vmatpush.bf16.msra.mxu1 %v6379_v43  ;;  %v9495_v43 = vld [vmem:[#allocation32_spill] sm:$0xff] }
 0x3a4   : > { %v4589_v63 = vpop.f32.mrf.mxu0  ;;  %9493 = vst [vmem:[#allocation20_spill] sm:$0xff] %v8824_v57 }
 0x3a5   : > { %v4121_v9 = vpop.f32.mrf.mxu2 }
 0x3a6   : > { %v4122_v47 = vadd.f32 %v4121_v9, %v8698_v2 }
 0x3a7   : > { %v4448_v16 = vpop.f32.mrf.mxu3 }
 0x3a8   : > { %v4502_v42 = vadd.f32 %v4446_v0, %v4122_v47 }
 0x3aa   : > { %v8826_v30 = vpop.f32.mrf.mxu1  ;;  %v8837_v44 = vadd.f32 %v4587_v41, %v4502_v42 }
 0x3ac   : > { %6242 = vmatmul.msk.bf16.gmra.mxu3 %vm3794_vm15, %v6458_v35  ;;  %v4592_v21 = vpop.f32.mrf.mxu0 }
 0x3ad   : > { %6194 = vmatmul.msk.bf16.gmra.mxu1 %vm3794_vm15, %v8225_v45  ;;  %v4123_v34 = vpop.f32.mrf.mxu2 }
 0x3ae   : > { %v4124_v2 = vadd.f32 %v4123_v34, %v8713_v4 }
 0x3af   : > { %v4451_v15 = vpop.f32.mrf.mxu3  ;;  %6266 = vmatmul.msk.bf16.gmra.mxu0 %vm3794_vm15, %v7934_v59  ;;  %v6459_v59 = vld [vmem:[#allocation2 + $0x30] sm:$0xff] }
 0x3b0   : > { %v4503_v24 = vadd.f32 %v4448_v16, %v4124_v2 }
 0x3b2   : > { %v8839_v0 = vpop.f32.mrf.mxu1  ;;  %6214 = vmatmul.msk.bf16.gmra.mxu2 %vm3794_vm15, %v8027_v32  ;;  %v8844_v57 = vadd.f32 %v4589_v63, %v4503_v24 }
 0x3b4   : > { %v4594_v1 = vpop.f32.mrf.mxu0  ;;  %9494 = vst [vmem:[#allocation24_spill] sm:$0xff] %v8844_v57 }
 0x3b5   : > { %v4126_v46 = vpop.f32.mrf.mxu2 }
 0x3b6   : > { %v4127_v47 = vadd.f32 %v4126_v46, %v8720_v8 }
 0x3b7   : > { %v4453_v9 = vpop.f32.mrf.mxu3 }
 0x3b8   : > { %v4504_v35 = vadd.f32 %v4451_v15, %v4127_v47 }
 0x3ba   : > { %v8846_v4 = vpop.f32.mrf.mxu1  ;;  %v8854_v15 = vadd.f32 %v4592_v21, %v4504_v35 }
 0x3bc   : > { %6243 = vmatmul.msk.bf16.gmra.mxu3 %vm3794_vm15, %v6459_v59  ;;  %v4597_v42 = vpop.f32.mrf.mxu0 }
 0x3bd   : > { %6195 = vmatmul.msk.bf16.gmra.mxu1 %vm3794_vm15, %v8285_v61  ;;  %v4128_v41 = vpop.f32.mrf.mxu2 }
 0x3be   : > { %v4129_v34 = vadd.f32 %v4128_v41, %v8733_v13  ;;  %v6460_v41 = vld [vmem:[#allocation2 + $0x3c] sm:$0xff] }
 0x3bf   : > { %v4456_v16 = vpop.f32.mrf.mxu3  ;;  %6267 = vmatmul.msk.bf16.gmra.mxu0 %vm3794_vm15, %v8021_v22 }
 0x3c0   : > { %v4505_v8 = vadd.f32 %v4453_v9, %v4129_v34  ;;  %v9497_v9 = vld [vmem:[#allocation11_spill] sm:$0xff] }
 0x3c2   : > { %v8856_v63 = vpop.f32.mrf.mxu1  ;;  %6215 = vmatmul.msk.bf16.gmra.mxu2 %vm3794_vm15, %v9495_v43  ;;  %v8861_v57 = vadd.f32 %v4594_v1, %v4505_v8  ;;  %v9498_v8 = vld [vmem:[#allocation5_spill] sm:$0xff] }
 0x3c4   : > { %v4599_v2 = vpop.f32.mrf.mxu0  ;;  %9496 = vst [vmem:[#allocation22_spill] sm:$0xff] %v8861_v57 }
 0x3c5   : > { %v4131_v24 = vpop.f32.mrf.mxu2 }
 0x3c6   : > { %v4132_v47 = vadd.f32 %v4131_v24, %v8740_v27 }
 0x3c7   : > { %v4458_v46 = vpop.f32.mrf.mxu3 }
 0x3c8   : > { %v4506_v59 = vadd.f32 %v4456_v16, %v4132_v47 }
 0x3ca   : > { %v4710_v13 = vpop.f32.mrf.mxu1  ;;  %v8872_v1 = vadd.f32 %v4597_v42, %v4506_v59 }
 0x3cb   : > { %v8865_v22 = vadd.f32 %v4710_v13, %v8638_v28 }
 0x3cc   : > { %6244 = vmatmul.msk.bf16.gmra.mxu3 %vm3794_vm15, %v6460_v41  ;;  %v4602_v21 = vpop.f32.mrf.mxu0 }
 0x3cd   : > { %6196 = vmatmul.msk.bf16.gmra.mxu1 %vm3794_vm15, %v9497_v9  ;;  %v4133_v35 = vpop.f32.mrf.mxu2 }
 0x3ce   : > { %v4134_v43 = vadd.f32 %v4133_v35, %v8753_v11 }
 0x3cf   : > { %v4461_v34 = vpop.f32.mrf.mxu3  ;;  %6268 = vmatmul.msk.bf16.gmra.mxu0 %vm3794_vm15, %v8099_v20  ;;  %v6461_v20 = vld [vmem:[#allocation2 + $0x48] sm:$0xff] }
 0x3d0   : > { %v4507_v27 = vadd.f32 %v4458_v46, %v4134_v43  ;;  %v9500_v46 = vld [vmem:[#allocation7_spill] sm:$0xff] }
 0x3d2   : > { %v4712_v16 = vpop.f32.mrf.mxu1  ;;  %6216 = vmatmul.msk.bf16.gmra.mxu2 %vm3794_vm15, %v9498_v8  ;;  %v8880_v11 = vadd.f32 %v4599_v2, %v4507_v27  ;;  %v9501_v27 = vld [vmem:[#allocation34_spill] sm:$0xff] }
 0x3d3   : > { %v8877_v28 = vadd.f32 %v4712_v16, %v8660_v31 }
 0x3d4   : > { %v4604_v24 = vpop.f32.mrf.mxu0  ;;  %9499 = vst [vmem:[#allocation25_spill] sm:$0xff] %v8880_v11 }
 0x3d5   : > { %v4136_v47 = vpop.f32.mrf.mxu2 }
 0x3d6   : > { %v4137_v41 = vadd.f32 %v4136_v47, %v8760_v51 }
 0x3d7   : > { %v4463_v13 = vpop.f32.mrf.mxu3 }
 0x3d8   : > { %v4508_v57 = vadd.f32 %v4461_v34, %v4137_v41 }
 0x3da   : > { %v4715_v35 = vpop.f32.mrf.mxu1  ;;  %v8891_v2 = vadd.f32 %v4602_v21, %v4508_v57 }
 0x3db   : > { %v8884_v42 = vadd.f32 %v4715_v35, %v8678_v25 }
 0x3dc   : > { %6245 = vmatmul.msk.bf16.gmra.mxu3 %vm3794_vm15, %v6461_v20  ;;  %v4607_v43 = vpop.f32.mrf.mxu0 }
 0x3dd   : > { %6197 = vmatmul.msk.bf16.gmra.mxu1 %vm3794_vm15, %v9500_v46  ;;  %v4138_v31 = vpop.f32.mrf.mxu2 }
 0x3de   : > { %v4139_v16 = vadd.f32 %v4138_v31, %v8776_v3 }
 0x3df   : > { %v4466_v59 = vpop.f32.mrf.mxu3  ;;  %6269 = vmatmul.msk.bf16.gmra.mxu0 %vm3794_vm15, %v8169_v40  ;;  %v6462_v40 = vld [vmem:[#allocation2 + $0x54] sm:$0xff] }
 0x3e0   : > { %v4509_v51 = vadd.f32 %v4463_v13, %v4139_v16  ;;  %v9503_v13 = vld [vmem:[#allocation8_spill] sm:$0xff] }
 0x3e2   : > { %v4717_v34 = vpop.f32.mrf.mxu1  ;;  %6217 = vmatmul.msk.bf16.gmra.mxu2 %vm3794_vm15, %v9501_v27  ;;  %v8899_v3 = vadd.f32 %v4604_v24, %v4509_v51  ;;  %v9504_v51 = vld [vmem:[#allocation35_spill] sm:$0xff] }
 0x3e3   : > { %v8896_v25 = vadd.f32 %v4717_v34, %v8694_v53 }
 0x3e4   : > { %v4609_v47 = vpop.f32.mrf.mxu0  ;;  %9502 = vst [vmem:[#allocation3_spill] sm:$0xff] %v8899_v3 }
 0x3e5   : > { %v4141_v41 = vpop.f32.mrf.mxu2 }
 0x3e6   : > { %v4142_v20 = vadd.f32 %v4141_v41, %v8789_v12 }
 0x3e7   : > { %v4468_v35 = vpop.f32.mrf.mxu3 }
 0x3e8   : > { %v4510_v11 = vadd.f32 %v4466_v59, %v4142_v20 }
 0x3ea   : > { %v4720_v31 = vpop.f32.mrf.mxu1  ;;  %v8910_v24 = vadd.f32 %v4607_v43, %v4510_v11 }
 0x3eb   : > { %v8903_v57 = vadd.f32 %v4720_v31, %v8711_v58 }
 0x3ec   : > { %6246 = vmatmul.msk.bf16.gmra.mxu3 %vm3794_vm15, %v6462_v40  ;;  %v4612_v21 = vpop.f32.mrf.mxu0 }
 0x3ed   : > { %6198 = vmatmul.msk.bf16.gmra.mxu1 %vm3794_vm15, %v9503_v13  ;;  %v4143_v53 = vpop.f32.mrf.mxu2 }
 0x3ee   : > { %v4144_v34 = vadd.f32 %v4143_v53, %v8802_v48 }
 0x3ef   : > { %v4471_v16 = vpop.f32.mrf.mxu3  ;;  %6270 = vmatmul.msk.bf16.gmra.mxu0 %vm3794_vm15, %v8225_v45  ;;  %v9506_v45 = vld [vmem:[#allocation12_spill] sm:$0xff] }
 0x3f0   : > { %v4511_v12 = vadd.f32 %v4468_v35, %v4144_v34  ;;  %v9507_v35 = vld [vmem:[#allocation19_spill] sm:$0xff] }
 0x3f2   : > { %v4722_v59 = vpop.f32.mrf.mxu1  ;;  %6218 = vmatmul.msk.bf16.gmra.mxu2 %vm3794_vm15, %v9504_v51  ;;  %v8918_v48 = vadd.f32 %v4609_v47, %v4511_v12  ;;  %v9508_v12 = vld [vmem:[#allocation36_spill] sm:$0xff] }
 0x3f3   : > { %v8915_v58 = vadd.f32 %v4722_v59, %v8718_v33 }
 0x3f4   : > { %v4614_v41 = vpop.f32.mrf.mxu0  ;;  %9505 = vst [vmem:[#allocation26_spill] sm:$0xff] %v8918_v48 }
 0x3f5   : > { %v4146_v20 = vpop.f32.mrf.mxu2 }
 0x3f6   : > { %v4147_v40 = vadd.f32 %v4146_v20, %v8809_v18 }
 0x3f7   : > { %v4473_v31 = vpop.f32.mrf.mxu3 }
 0x3f8   : > { %v4512_v3 = vadd.f32 %v4471_v16, %v4147_v40 }
 0x3fa   : > { %v4725_v53 = vpop.f32.mrf.mxu1  ;;  %v8930_v47 = vadd.f32 %v4612_v21, %v4512_v3  ;;  %v9509_v21 = vld [vmem:[#allocation15_spill] sm:$0xff] }
 0x3fb   : > { %v8923_v11 = vadd.f32 %v4725_v53, %v8731_v5  ;;  %v9527_v36 = vld [vmem:[#allocation26_spill] sm:$0xff] }
 0x3fc   : > { %6247 = vmatmul.msk.bf16.gmra.mxu3 %vm3794_vm15, %v9506_v45  ;;  %v4617_v43 = vpop.f32.mrf.mxu0 }
 0x3fd   : > { %6199 = vmatmul.msk.bf16.gmra.mxu1 %vm3794_vm15, %v9507_v35  ;;  %v4148_v33 = vpop.f32.mrf.mxu2 }
 0x3fe   : > { %v4149_v59 = vadd.f32 %v4148_v33, %v8819_v50 }
 0x3ff   : > { %v4476_v34 = vpop.f32.mrf.mxu3  ;;  %6271 = vmatmul.msk.bf16.gmra.mxu0 %vm3794_vm15, %v8285_v61 }
 0x400   : > { %v4513_v18 = vadd.f32 %v4473_v31, %v4149_v59 }
 0x402   : > { %v4727_v16 = vpop.f32.mrf.mxu1  ;;  %6219 = vmatmul.msk.bf16.gmra.mxu2 %vm3794_vm15, %v9508_v12  ;;  %v8938_v50 = vadd.f32 %v4614_v41, %v4513_v18  ;;  %v9510_v18 = vld [vmem:[#allocation6_spill] sm:$0xff] }
 0x403   : > { %v8935_v5 = vadd.f32 %v4727_v16, %v8738_v62 }
 0x404   : > { %v4619_v20 = vpop.f32.mrf.mxu0 }
 0x405   : > { %v4151_v40 = vpop.f32.mrf.mxu2 }
 0x406   : > { %v4152_v45 = vadd.f32 %v4151_v40, %v8826_v30 }
 0x407   : > { %v4478_v53 = vpop.f32.mrf.mxu3 }
 0x408   : > { %v4514_v48 = vadd.f32 %v4476_v34, %v4152_v45 }
 0x40a   : > { %v4730_v33 = vpop.f32.mrf.mxu1  ;;  %v8950_v41 = vadd.f32 %v4617_v43, %v4514_v48 }
 0x40b   : > { %v8943_v61 = vadd.f32 %v4730_v33, %v8751_v17 }
 0x40c   : > { %6248 = vmatmul.msk.bf16.gmra.mxu3 %vm3794_vm15, %v8560_v39  ;;  %v4622_v3 = vpop.f32.mrf.mxu0 }
 0x40d   : > { %6200 = vmatmul.msk.bf16.gmra.mxu1 %vm3794_vm15, %v9509_v21  ;;  %v4153_v62 = vpop.f32.mrf.mxu2 }
 0x40e   : > { %v4154_v59 = vadd.f32 %v4153_v62, %v8839_v0 }
 0x40f   : > { %v4481_v31 = vpop.f32.mrf.mxu3  ;;  %6272 = vmatmul.msk.bf16.gmra.mxu0 %vm3794_vm15, %v9497_v9 }
 0x410   : > { %v4515_v30 = vadd.f32 %v4478_v53, %v4154_v59  ;;  %v4673_v59 = vshrl.u32 %v8684_v52, 16 }
 0x412   : > { %v4732_v34 = vpop.f32.mrf.mxu1  ;;  %6220 = vmatmul.msk.bf16.gmra.mxu2 %vm3794_vm15, %v9510_v18  ;;  %v8958_v0 = vadd.f32 %v4619_v20, %v4515_v30 }
 0x413   : > { %v8955_v39 = vadd.f32 %v4732_v34, %v8758_v29 }
 0x414   : > { %v4624_v45 = vpop.f32.mrf.mxu0 }
 0x415   : > { %v4156_v17 = vpop.f32.mrf.mxu2 }
 0x416   : > { %v4157_v40 = vadd.f32 %v4156_v17, %v8846_v4 }
 0x417   : > { %v4483_v16 = vpop.f32.mrf.mxu3 }
 0x418   : > { %v4516_v33 = vadd.f32 %v4481_v31, %v4157_v40  ;;  %v4675_v40 = vrot.slane %v4673_v59, 4 }
 0x41a   : > { %v4735_v62 = vpop.f32.mrf.mxu1  ;;  %v8970_v20 = vadd.f32 %v4622_v3, %v4516_v33  ;;  %v4663_v3 = vshll.u32 %v8680_v10, 16 }
 0x41b   : > { %v8963_v9 = vadd.f32 %v4735_v62, %v8774_v7  ;;  %v4669_v7 = vshll.u32 %v8684_v52, 16 }
 0x41c   : > { %6249 = vmatmul.msk.bf16.gmra.mxu3 %vm3794_vm15, %v8623_v14  ;;  %v5161_v53 = vpop.f32.mrf.mxu0 }
 0x41d   : > { %6201 = vmatmul.msk.bf16.gmra.mxu1 %vm3794_vm15, %v8609_v56  ;;  %v4158_v29 = vpop.f32.mrf.mxu2 }
 0x41e   : > { %v4159_v43 = vadd.f32 %v4158_v29, %v8856_v63 }
 0x41f   : > { %v4998_v48 = vpop.f32.mrf.mxu3  ;;  %6273 = vmatmul.msk.bf16.gmra.mxu0 %vm3794_vm15, %v9500_v46  ;;  %v4660_v46 = vshrl.u32 %v8680_v10, 16 }
 0x420   : > { %v4517_v4 = vadd.f32 %v4483_v16, %v4159_v43  ;;  %v4671_v16 = vrot.slane %v4669_v7, 5  ;;  %v4665_v43 = vrot.slane %v4663_v3, 5 }
 0x421   : > { %v4662_v29 = vrot.slane %v4660_v46, 4 }
 0x422   : > { %v4737_v31 = vpop.f32.mrf.mxu1  ;;  %6221 = vmatmul.msk.bf16.gmra.mxu2 %vm3794_vm15, %v8346_v23  ;;  %v8982_v33 = vadd.f32 %v4624_v45, %v4517_v4  ;;  %v4679_v45 = vshll.u32 %v8686_v55, 16 }
 0x423   : > { %v8975_v14 = vadd.f32 %v4737_v31, %v8787_v6  ;;  %v4666_v4 = vor.u32 %v4665_v43, %v4662_v29 }
 0x424   : > { %v5163_v52 = vpop.f32.mrf.mxu0 }
 0x425   : > { %v4857_v30 = vpop.f32.mrf.mxu2  ;;  %v4667_v46 = vrot.slane %v4666_v4, 4 }
 0x426   : > { %v4937_v34 = vadd.f32 %v4857_v30, %v8865_v22  ;;  %v4676_v22 = vor.u32 %v4675_v40, %v4671_v16  ;;  %v4681_v30 = vrot.slane %v4679_v45, 5  ;;  %v9511_v45 = vld [vmem:[#allocation9_spill] sm:$0xff] }
 0x427   : > { %v5000_v63 = vpop.f32.mrf.mxu3 }
 0x428   : > { %v5078_v17 = vadd.f32 %v4998_v48, %v4937_v34 }
 0x42a   : > { %v4740_v62 = vpop.f32.mrf.mxu1  ;;  %v8995_v7 = vadd.f32 %v5161_v53, %v5078_v17  ;;  %v4672_v53 = vsel %vm6584_vm3, %v4667_v46, %v4671_v16  ;;  %v9513_v46 = vld [vmem:[#allocation16_spill] sm:$0xff] }
 0x42b   : > { %v8987_v6 = vadd.f32 %v4740_v62, %v8800_v26  ;;  %v4677_v26 = vrot.slane %v4676_v22, 4  ;;  %v4683_v29 = vunpack.c.l.b16 %v4672_v53 }
 0x42c   : > { %6250 = vmatmul.msk.bf16.gmra.mxu3 %vm3794_vm15, %v8668_v19 }
 0x42d   : > { %6202 = vmatmul.msk.bf16.gmra.mxu1 %vm3794_vm15, %v8662_v49  ;;  %v4859_v10 = vpop.f32.mrf.mxu2 }
 0x42e   : > { %v4938_v31 = vadd.f32 %v4859_v10, %v8877_v28  ;;  %v4682_v28 = vsel %vm6584_vm3, %v4677_v26, %v4681_v30 }
 0x42f   : > { %v5003_v48 = vpop.f32.mrf.mxu3  ;;  %6274 = vmatmul.msk.bf16.gmra.mxu0 %vm3794_vm15, %v9503_v13  ;;  %v5166_v13 = vpop.f32.mrf.mxu0 }
 0x430   : > { %v5079_v19 = vadd.f32 %v5000_v63, %v4938_v31  ;;  %v4684_v63 = vunpack.c.l.b16 %v4682_v28 }
 0x432   : > { %v4742_v59 = vpop.f32.mrf.mxu1  ;;  %6222 = vmatmul.msk.bf16.gmra.mxu2 %vm3794_vm15, %v8394_v38  ;;  %v9007_v62 = vadd.f32 %v5163_v52, %v5079_v19  ;;  %v9014_v22 = vpack.c.b16 %v4684_v63, %v4683_v29 }
 0x433   : > { %v9000_v34 = vadd.f32 %v4742_v59, %v8807_v60 }
 0x435   : > { %v4862_v3 = vpop.f32.mrf.mxu2 }
 0x436   : > { %v4939_v55 = vadd.f32 %v4862_v3, %v8884_v42 }
 0x437   : > { %v5005_v17 = vpop.f32.mrf.mxu3  ;;  %v5168_v52 = vpop.f32.mrf.mxu0 }
 0x438   : > { %v5080_v40 = vadd.f32 %v5003_v48, %v4939_v55 }
 0x43a   : > { %v4745_v43 = vpop.f32.mrf.mxu1  ;;  %v9021_v48 = vadd.f32 %v5166_v13, %v5080_v40 }
 0x43b   : > { %v9012_v60 = vadd.f32 %v4745_v43, %v8817_v37  ;;  %v9512_v37 = vld [vmem:[#allocation20_spill] sm:$0xff] }
 0x43c   : > { %6251 = vmatmul.msk.bf16.gmra.mxu3 %vm3794_vm15, %v8704_v54 }
 0x43d   : > { %6203 = vmatmul.msk.bf16.gmra.mxu1 %vm3794_vm15, %v9014_v22  ;;  %v4864_v42 = vpop.f32.mrf.mxu2 }
 0x43e   : > { %v4940_v16 = vadd.f32 %v4864_v42, %v8896_v25 }
 0x43f   : > { %6275 = vmatmul.msk.bf16.gmra.mxu0 %vm3794_vm15, %v9507_v35  ;;  %v5008_v31 = vpop.f32.mrf.mxu3  ;;  %v5171_v30 = vpop.f32.mrf.mxu0 }
 0x440   : > { %v5081_v10 = vadd.f32 %v5005_v17, %v4940_v16  ;;  %v9514_v17 = vld [vmem:[#allocation10_spill] sm:$0xff] }
 0x442   : > { %v4747_v54 = vpop.f32.mrf.mxu1  ;;  %6223 = vmatmul.msk.bf16.gmra.mxu2 %vm3794_vm15, %v9511_v45  ;;  %v9029_v25 = vadd.f32 %v5168_v52, %v5081_v10 }
 0x443   : > { %v9026_v19 = vadd.f32 %v4747_v54, %v9512_v37  ;;  %v9517_v54 = vld [vmem:[#allocation32_spill] sm:$0xff] }
 0x445   : > { %v4867_v4 = vpop.f32.mrf.mxu2 }
 0x446   : > { %v4941_v26 = vadd.f32 %v4867_v4, %v8903_v57 }
 0x447   : > { %v5010_v13 = vpop.f32.mrf.mxu3  ;;  %v5173_v40 = vpop.f32.mrf.mxu0 }
 0x448   : > { %v5082_v59 = vadd.f32 %v5008_v31, %v4941_v26 }
 0x44a   : > { %v4750_v35 = vpop.f32.mrf.mxu1  ;;  %v9041_v53 = vadd.f32 %v5171_v30, %v5082_v59 }
 0x44b   : > { %v9034_v28 = vadd.f32 %v4750_v35, %v8837_v44  ;;  %v9515_v44 = vld [vmem:[#allocation24_spill] sm:$0xff]  ;;  %v9518_v35 = vld [vmem:[#allocation13_spill] sm:$0xff] }
 0x44c   : > { %6252 = vmatmul.msk.bf16.gmra.mxu3 %vm3794_vm15, %v9513_v46 }
 0x44d   : > { %6290 = vmatmul.msk.bf16.vlgmr.msra.gmra.mxu1 %vm3794_vm15, %v8027_v32  ;;  %v4869_v3 = vpop.f32.mrf.mxu2 }
 0x44e   : > { %v4942_v55 = vadd.f32 %v4869_v3, %v8915_v58 }
 0x44f   : > { %6276 = vmatmul.msk.bf16.gmra.mxu0 %vm3794_vm15, %v9509_v21  ;;  %v5013_v43 = vpop.f32.mrf.mxu3  ;;  %v9516_v21 = vld [vmem:[#allocation38_spill] sm:$0xff]  ;;  %v5176_v31 = vpop.f32.mrf.mxu0 }
 0x450   : > { %v5083_v57 = vadd.f32 %v5010_v13, %v4942_v55 }
 0x452   : > { %v4752_v63 = vpop.f32.mrf.mxu1  ;;  %6224 = vmatmul.msk.bf16.gmra.mxu2 %vm3794_vm15, %v9514_v17  ;;  %v9049_v58 = vadd.f32 %v5173_v40, %v5083_v57  ;;  %v9520_v57 = vld [vmem:[#allocation23_spill] sm:$0xff]  ;;  %v9522_v40 = vld [vmem:[#allocation25_spill] sm:$0xff] }
 0x453   : > { %v9046_v29 = vadd.f32 %v4752_v63, %v9515_v44  ;;  %v9521_v63 = vld [vmem:[#allocation14_spill] sm:$0xff] }
 0x455   : > { %v4872_v42 = vpop.f32.mrf.mxu2 }
 0x456   : > { %v4943_v32 = vadd.f32 %v4872_v42, %v8923_v11  ;;  %v9523_v42 = vld [vmem:[#allocation37_spill] sm:$0xff] }
 0x457   : > { %v5015_v11 = vpop.f32.mrf.mxu3  ;;  %v5178_v13 = vpop.f32.mrf.mxu0 }
 0x458   : > { %v5084_v16 = vadd.f32 %v5013_v43, %v4943_v32  ;;  %v9095_v32 = vld [vmem:[#allocation2 + $0xd4] sm:$0x1] }
 0x45a   : > { %v4755_v52 = vpop.f32.mrf.mxu1  ;;  %v9061_v59 = vadd.f32 %v5176_v31, %v5084_v16  ;;  %v5130_v31 = vshll.u32 %v9095_v32, 16 }
 0x45b   : > { %v9054_v10 = vadd.f32 %v4755_v52, %v8854_v15  ;;  %v9519_v15 = vld [vmem:[#allocation22_spill] sm:$0xff] }
 0x45c   : > { %6253 = vmatmul.msk.bf16.gmra.mxu3 %vm3794_vm15, %v9516_v21 }
 0x45d   : > { %6291 = vmatmul.msk.bf16.gmra.mxu1 %vm3794_vm15, %v9517_v54  ;;  %v4874_v37 = vpop.f32.mrf.mxu2 }
 0x45e   : > { %v4944_v4 = vadd.f32 %v4874_v37, %v8935_v5 }
 0x45f   : > { %6277 = vmatmul.msk.bf16.gmra.mxu0 %vm3794_vm15, %v8609_v56 }
 0x460   : > { %v5085_v26 = vadd.f32 %v5015_v11, %v4944_v4 }
 0x462   : > { %v4757_v30 = vpop.f32.mrf.mxu1  ;;  %6225 = vmatmul.msk.bf16.gmra.mxu2 %vm3794_vm15, %v9518_v35  ;;  %v9068_v3 = vadd.f32 %v5178_v13, %v5085_v26  ;;  %v9524_v26 = vld [vmem:[#allocation18_spill] sm:$0xff] }
 0x463   : > { %v9066_v46 = vadd.f32 %v4757_v30, %v9519_v15 }
 0x46a   : > { %v4760_v55 = vpop.f32.mrf.mxu1 }
 0x46b   : > { %v9073_v56 = vadd.f32 %v4760_v55, %v8872_v1  ;;  %v5132_v55 = vrot.slane %v5130_v31, 5 }
 0x46c   : > { %6254 = vmatmul.msk.bf16.gmra.mxu3 %vm3794_vm15, %v9520_v57 }
 0x46d   : > { %6292 = vmatmul.msk.bf16.gmra.mxu1 %vm3794_vm15, %v9498_v8  ;;  %v9091_v8 = vld [vmem:[#allocation2 + $0xcc] sm:$0xf] }
 0x46e   : > { %v5111_v16 = vshrl.u32 %v9091_v8, 16  ;;  %v5114_v52 = vshll.u32 %v9091_v8, 16 }
 0x46f   : > { %6278 = vmatmul.msk.bf16.gmra.mxu0 %vm3794_vm15, %v8662_v49  ;;  %v9093_v49 = vld [vmem:[#allocation2 + $0xd0] sm:$0xf] }
 0x470   : > { %v5120_v21 = vshll.u32 %v9093_v49, 16  ;;  %v5116_v54 = vrot.slane %v5114_v52, 5 }
 0x472   : > { %v4762_v5 = vpop.f32.mrf.mxu1  ;;  %6226 = vmatmul.msk.bf16.gmra.mxu2 %vm3794_vm15, %v9521_v63  ;;  %v5122_v37 = vrot.slane %v5120_v21, 5 }
 0x473   : > { %v9082_v44 = vadd.f32 %v4762_v5, %v9522_v40  ;;  %v6398_v40 = vld [vmem:[#allocation2 + $0xcc] sm:$0xff] }
 0x47a   : > { %v4765_v43 = vpop.f32.mrf.mxu1 }
 0x47b   : > { %v9087_v1 = vadd.f32 %v4765_v43, %v8891_v2  ;;  %v5124_v2 = vshrl.u32 %v9093_v49, 16 }
 0x47c   : > { %6255 = vmatmul.msk.bf16.gmra.mxu3 %vm3794_vm15, %v9523_v42 }
 0x47d   : > { %6293 = vmatmul.msk.bf16.gmra.mxu1 %vm3794_vm15, %v9501_v27  ;;  %v5113_v27 = vrot.slane %v5111_v16, 4  ;;  %v5126_v4 = vrot.slane %v5124_v2, 4 }
 0x47f   : > { %6279 = vmatmul.msk.bf16.gmra.mxu0 %vm3794_vm15, %v9014_v22  ;;  %v5117_v30 = vor.u32 %v5116_v54, %v5113_v27  ;;  %v9525_v22 = vld [vmem:[#allocation3_spill] sm:$0xff]  ;;  %v5127_v13 = vor.u32 %v5126_v4, %v5122_v37  ;;  %v9526_v54 = vld [vmem:[#allocation17_spill] sm:$0xff] }
 0x481   : > { %v5118_v57 = vrot.slane %v5117_v30, 4  ;;  %v5128_v5 = vrot.slane %v5127_v13, 4 }
 0x482   : > { %v4767_v11 = vpop.f32.mrf.mxu1  ;;  %6227 = vmatmul.msk.bf16.gmra.mxu2 %vm3794_vm15, %v9524_v26 }
 0x483   : > { %v9107_v15 = vadd.f32 %v4767_v11, %v9525_v22  ;;  %v5123_v43 = vsel %vm6584_vm3, %v5118_v57, %v5122_v37  ;;  %v5133_v42 = vsel %vm6584_vm3, %v5128_v5, %v5132_v55 }
 0x484   : > { %v5134_v16 = vunpack.c.l.b16 %v5123_v43  ;;  %v5135_v52 = vunpack.c.l.b16 %v5133_v42  ;;  %v5018_v42 = vpop.f32.mrf.mxu3 }
 0x486   : > { %v5136_v2 = vpack.c.b16 %v5135_v52, %v5134_v16  ;;  %v5181_v52 = vpop.f32.mrf.mxu0 }
 0x48a   : > { %v4770_v21 = vpop.f32.mrf.mxu1 }
 0x48b   : > { %v9115_v27 = vadd.f32 %v4770_v21, %v8910_v24 }
 0x48c   : > { %6256 = vmatmul.msk.bf16.gmra.mxu3 %vm3794_vm15, %v6398_v40  ;;  %v4877_v40 = vpop.f32.mrf.mxu2 }
 0x48d   : > { %6294 = vmatmul.msk.bf16.gmra.mxu1 %vm3794_vm15, %v9504_v51 }
 0x48f   : > { %6280 = vmatmul.msk.bf16.gmra.mxu0 %vm3794_vm15, %v5136_v2 }
 0x492   : > { %v4772_v31 = vpop.f32.mrf.mxu1  ;;  %6228 = vmatmul.msk.bf16.gmra.mxu2 %vm3794_vm15, %v9526_v54 }
 0x493   : > { %v9123_v37 = vadd.f32 %v4772_v31, %v9527_v36  ;;  %v5020_v36 = vpop.f32.mrf.mxu3 }
 0x494   : > { %v4879_v21 = vpop.f32.mrf.mxu2 }
 0x49a   : > { %v4775_v4 = vpop.f32.mrf.mxu1 }
 0x49b   : > { %v9126_v11 = vadd.f32 %v4775_v4, %v8930_v47 }
 0x49d   : > { %6295 = vmatmul.msk.bf16.gmra.mxu1 %vm3794_vm15, %v9508_v12 }
 0x4a2   : > { %v4777_v24 = vpop.f32.mrf.mxu1 }
 0x4a3   : > { %v9131_v30 = vadd.f32 %v4777_v24, %v8938_v50 }
 0x4aa   : > { %v4780_v51 = vpop.f32.mrf.mxu1 }
 0x4ab   : > { %v9134_v22 = vadd.f32 %v4780_v51, %v8950_v41  ;;  %v9152_v41 = vld [vmem:[%s9263_s6] ss:$0 sm:$0xff]  ;;  %v4882_v51 = vpop.f32.mrf.mxu2 }
 0x4ad   : > { %6296 = vmatmul.msk.bf16.gmra.mxu1 %vm3794_vm15, %v9510_v18 }
 0x4b2   : > { %v4782_v13 = vpop.f32.mrf.mxu1 }
 0x4b3   : > { %v9139_v55 = vadd.f32 %v4782_v13, %v8958_v0 }
 0x4ba   : > { %v4785_v47 = vpop.f32.mrf.mxu1 }
 0x4bb   : > { %v9142_v57 = vadd.f32 %v4785_v47, %v8970_v20 }
 0x4bd   : > { %6297 = vmatmul.msk.bf16.gmra.mxu1 %vm3794_vm15, %v8346_v23 }
 0x4c2   : > { %v4787_v12 = vpop.f32.mrf.mxu1 }
 0x4c3   : > { %v9147_v50 = vadd.f32 %v4787_v12, %v8982_v33  ;;  %v5023_v12 = vpop.f32.mrf.mxu3 }
 0x4ca   : > { %v5308_v18 = vpop.f32.mrf.mxu1 }
 0x4cb   : > { %v5388_v0 = vadd.f32 %v5308_v18, %v8995_v7 }
 0x4cd   : > { %6298 = vmatmul.msk.bf16.gmra.mxu1 %vm3794_vm15, %v8394_v38  ;;  %v5423_v20 = vadd.f32 %v9152_v41, %v5388_v0 }
 0x4cf   : > { %v5455_v5 = vmax.f32 %v5423_v20, 0.0  ;;  %v4884_v20 = vpop.f32.mrf.mxu2 }
 0x4d1   : > { %5487 = vxpose.xlu0.b32.start [1/16] (narrow) %v5455_v5, 32 }
 0x4d2   : > { %v5310_v23 = vpop.f32.mrf.mxu1 }
 0x4d3   : > { %v5389_v33 = vadd.f32 %v5310_v23, %v9007_v62  ;;  %v5183_v62 = vpop.f32.mrf.mxu0 }
 0x4d5   : > { %v5424_v43 = vadd.f32 %v9152_v41, %v5389_v33  ;;  %v5025_v33 = vpop.f32.mrf.mxu3 }
 0x4d7   : > { %v5456_v16 = vmax.f32 %v5424_v43, 0.0 }
 0x4d9   : > { %5488 = vxpose.xlu0.b32.cont [2/16] (narrow) %v5456_v16, 32 }
 0x4da   : > { %v5313_v2 = vpop.f32.mrf.mxu1 }
 0x4db   : > { %v5390_v7 = vadd.f32 %v5313_v2, %v9021_v48  ;;  %v5186_v0 = vpop.f32.mrf.mxu0 }
 0x4dd   : > { %6299 = vmatmul.msk.bf16.gmra.mxu1 %vm3794_vm15, %v9511_v45  ;;  %v5425_v38 = vadd.f32 %v9152_v41, %v5390_v7  ;;  %v4887_v7 = vpop.f32.mrf.mxu2 }
 0x4df   : > { %v5457_v31 = vmax.f32 %v5425_v38, 0.0 }
 0x4e1   : > { %5489 = vxpose.xlu0.b32.cont [3/16] (narrow) %v5457_v31, 32  ;;  %v5028_v31 = vpop.f32.mrf.mxu3 }
 0x4e2   : > { %v5315_v4 = vpop.f32.mrf.mxu1 }
 0x4e3   : > { %v5391_v24 = vadd.f32 %v5315_v4, %v9029_v25  ;;  %v5188_v16 = vpop.f32.mrf.mxu0 }
 0x4e5   : > { %v5426_v13 = vadd.f32 %v9152_v41, %v5391_v24  ;;  %v4945_v24 = vadd.f32 %v4877_v40, %v8943_v61 }
 0x4e7   : > { %v5458_v47 = vmax.f32 %v5426_v13, 0.0  ;;  %v4889_v13 = vpop.f32.mrf.mxu2 }
 0x4e9   : > { %5490 = vxpose.xlu0.b32.cont [4/16] (narrow) %v5458_v47, 32 }
 0x4ea   : > { %v5318_v18 = vpop.f32.mrf.mxu1 }
 0x4eb   : > { %v5392_v48 = vadd.f32 %v5318_v18, %v9041_v53 }
 0x4ed   : > { %6300 = vmatmul.msk.bf16.gmra.mxu1 %vm3794_vm15, %v9514_v17  ;;  %v5427_v45 = vadd.f32 %v9152_v41, %v5392_v48  ;;  %v5086_v48 = vadd.f32 %v5018_v42, %v4945_v24  ;;  %v4947_v42 = vadd.f32 %v4882_v51, %v8963_v9 }
 0x4ef   : > { %v5459_v5 = vmax.f32 %v5427_v45, 0.0 }
 0x4f1   : > { %5491 = vxpose.xlu0.b32.cont [5/16] (narrow) %v5459_v5, 32 }
 0x4f2   : > { %v5320_v23 = vpop.f32.mrf.mxu1 }
 0x4f3   : > { %v5393_v25 = vadd.f32 %v5320_v23, %v9049_v58  ;;  %v5191_v58 = vpop.f32.mrf.mxu0  ;;  %v4946_v23 = vadd.f32 %v4879_v21, %v8955_v39  ;;  %v5088_v21 = vadd.f32 %v5023_v12, %v4947_v42 }
 0x4f5   : > { %v5428_v43 = vadd.f32 %v9152_v41, %v5393_v25  ;;  %v5087_v61 = vadd.f32 %v5020_v36, %v4946_v23  ;;  %v4948_v36 = vadd.f32 %v4884_v20, %v8975_v14 }
 0x4f7   : > { %v5460_v2 = vmax.f32 %v5428_v43, 0.0  ;;  %v5089_v23 = vadd.f32 %v5025_v33, %v4948_v36  ;;  %v4950_v33 = vadd.f32 %v4889_v13, %v9000_v34 }
 0x4f9   : > { %5492 = vxpose.xlu0.b32.cont [6/16] (narrow) %v5460_v2, 32 }
 0x4fa   : > { %v5323_v53 = vpop.f32.mrf.mxu1 }
 0x4fb   : > { %v5394_v38 = vadd.f32 %v5323_v53, %v9061_v59  ;;  %v5030_v59 = vpop.f32.mrf.mxu3  ;;  %v5193_v43 = vpop.f32.mrf.mxu0 }
 0x4fc   : > { %v4892_v53 = vpop.f32.mrf.mxu2 }
 0x4fd   : > { %6301 = vmatmul.msk.bf16.gmra.mxu1 %vm3794_vm15, %v9518_v35  ;;  %v5429_v17 = vadd.f32 %v9152_v41, %v5394_v38  ;;  %v5249_v35 = vadd.f32 %v5181_v52, %v5086_v48  ;;  %v5250_v38 = vadd.f32 %v5183_v62, %v5087_v61 }
 0x4ff   : > { %v5461_v4 = vmax.f32 %v5429_v17, 0.0 }
 0x501   : > { %5493 = vxpose.xlu0.b32.cont [7/16] (narrow) %v5461_v4, 32 }
 0x502   : > { %v5325_v47 = vpop.f32.mrf.mxu1 }
 0x503   : > { %v5395_v18 = vadd.f32 %v5325_v47, %v9068_v3  ;;  %v5033_v17 = vpop.f32.mrf.mxu3  ;;  %v5196_v52 = vpop.f32.mrf.mxu0 }
 0x504   : > { %v4894_v47 = vpop.f32.mrf.mxu2 }
 0x505   : > { %v5430_v45 = vadd.f32 %v9152_v41, %v5395_v18 }
 0x507   : > { %v5462_v5 = vmax.f32 %v5430_v45, 0.0 }
 0x509   : > { %5494 = vxpose.xlu0.b32.cont [8/16] (narrow) %v5462_v5, 32 }
 0x50a   : > { %v5328_v25 = vpop.f32.mrf.mxu1 }
 0x50b   : > { %v5396_v2 = vadd.f32 %v5328_v25, %v5249_v35  ;;  %v5035_v5 = vpop.f32.mrf.mxu3  ;;  %v5198_v62 = vpop.f32.mrf.mxu0  ;;  %v4949_v35 = vadd.f32 %v4887_v7, %v8987_v6  ;;  %v5252_v25 = vadd.f32 %v5188_v16, %v5089_v23  ;;  %v5091_v6 = vadd.f32 %v5030_v59, %v4950_v33 }
 0x50c   : > { %v4897_v12 = vpop.f32.mrf.mxu2  ;;  %v6281_v7 = vrot.slane %v9091_v8, 9 }
 0x50d   : > { %6302 = vmatmul.msk.bf16.gmra.mxu1 %vm3794_vm15, %v9521_v63  ;;  %v5431_v40 = vadd.f32 %v9152_v41, %v5396_v2  ;;  %v5251_v63 = vadd.f32 %v5186_v0, %v5088_v21  ;;  %v5090_v20 = vadd.f32 %v5028_v31, %v4949_v35  ;;  %v5279_v21 = vrot.slane %v9095_v32, 5 }
 0x50f   : > { %v5463_v3 = vmax.f32 %v5431_v40, 0.0 }
 0x511   : > { %5495 = vxpose.xlu0.b32.cont [9/16] (narrow) %v5463_v3, 32 }
 0x512   : > { %v5330_v4 = vpop.f32.mrf.mxu1 }
 0x513   : > { %v5397_v39 = vadd.f32 %v5330_v4, %v5250_v38  ;;  %v5038_v61 = vpop.f32.mrf.mxu3  ;;  %v5201_v3 = vpop.f32.mrf.mxu0  ;;  %v5276_v4 = vrot.slane %v9093_v49, 5 }
 0x514   : > { %v4899_v42 = vpop.f32.mrf.mxu2 }
 0x515   : > { %v5432_v24 = vadd.f32 %v9152_v41, %v5397_v39  ;;  %v5278_v31 = vrot.slane %v5276_v4, 4  ;;  %v5277_v59 = vsel %vm6977_vm6, %v6281_v7, %v5276_v4 }
 0x516   : > { %v5281_v32 = vunpack.c.l.b16 %v5277_v59 }
 0x517   : > { %v5464_v18 = vmax.f32 %v5432_v24, 0.0  ;;  %v5254_v24 = vadd.f32 %v5193_v43, %v5091_v6  ;;  %v4954_v6 = vadd.f32 %v4899_v42, %v9046_v29 }
 0x519   : > { %5496 = vxpose.xlu0.b32.cont [10/16] (narrow) %v5464_v18, 32 }
 0x51a   : > { %v5333_v48 = vpop.f32.mrf.mxu1 }
 0x51b   : > { %v5398_v45 = vadd.f32 %v5333_v48, %v5251_v63  ;;  %v5040_v13 = vpop.f32.mrf.mxu3  ;;  %v5203_v36 = vpop.f32.mrf.mxu0 }
 0x51c   : > { %v4902_v48 = vpop.f32.mrf.mxu2 }
 0x51d   : > { %6303 = vmatmul.msk.bf16.gmra.mxu1 %vm3794_vm15, %v9524_v26  ;;  %v5433_v9 = vadd.f32 %v9152_v41, %v5398_v45  ;;  %v5253_v26 = vadd.f32 %v5191_v58, %v5090_v20  ;;  %v4951_v58 = vadd.f32 %v4892_v53, %v9012_v60  ;;  %v4952_v60 = vadd.f32 %v4894_v47, %v9026_v19 }
 0x51f   : > { %v5465_v51 = vmax.f32 %v5433_v9, 0.0  ;;  %v5092_v8 = vadd.f32 %v5033_v17, %v4951_v58 }
 0x521   : > { %5497 = vxpose.xlu0.b32.cont [11/16] (narrow) %v5465_v51, 32  ;;  %v5255_v43 = vadd.f32 %v5196_v52, %v5092_v8 }
 0x522   : > { %v5335_v2 = vpop.f32.mrf.mxu1 }
 0x523   : > { %v5399_v14 = vadd.f32 %v5335_v2, %v5252_v25  ;;  %v5043_v51 = vpop.f32.mrf.mxu3  ;;  %v5093_v2 = vadd.f32 %v5035_v5, %v4952_v60 }
 0x524   : > { %v4904_v17 = vpop.f32.mrf.mxu2 }
 0x525   : > { %v5434_v0 = vadd.f32 %v9152_v41, %v5399_v14  ;;  %v5206_v14 = vpop.f32.mrf.mxu0  ;;  %v5256_v33 = vadd.f32 %v5198_v62, %v5093_v2 }
 0x527   : > { %v5466_v40 = vmax.f32 %v5434_v0, 0.0 }
 0x529   : > { %5498 = vxpose.xlu0.b32.cont [12/16] (narrow) %v5466_v40, 32  ;;  %v4953_v40 = vadd.f32 %v4897_v12, %v9034_v28 }
 0x52a   : > { %v5338_v38 = vpop.f32.mrf.mxu1 }
 0x52b   : > { %v5400_v39 = vadd.f32 %v5338_v38, %v5253_v26  ;;  %v5045_v47 = vpop.f32.mrf.mxu3  ;;  %v5094_v52 = vadd.f32 %v5038_v61, %v4953_v40 }
 0x52c   : > { %v4907_v5 = vpop.f32.mrf.mxu2 }
 0x52d   : > { %6304 = vmatmul.msk.bf16.gmra.mxu1 %vm3794_vm15, %v9526_v54  ;;  %v5435_v16 = vadd.f32 %v9152_v41, %v5400_v39  ;;  %v5280_v54 = vsel %vm6977_vm6, %v5278_v31, %v5279_v21  ;;  %v5208_v4 = vpop.f32.mrf.mxu0  ;;  %v5095_v21 = vadd.f32 %v5040_v13, %v4954_v6 }
 0x52e   : > { %v5282_v23 = vunpack.c.l.b16 %v5280_v54  ;;  %v4956_v54 = vadd.f32 %v4904_v17, %v9066_v46 }
 0x52f   : > { %v5467_v34 = vmax.f32 %v5435_v16, 0.0  ;;  %v5257_v16 = vadd.f32 %v5201_v3, %v5094_v52  ;;  %v5258_v61 = vadd.f32 %v5203_v36, %v5095_v21 }
 0x530   : > { %v5283_v53 = vpack.c.b16 %v5282_v23, %v5281_v32  ;;  %v4957_v23 = vadd.f32 %v4907_v5, %v9073_v56 }
 0x531   : > { %5499 = vxpose.xlu0.b32.cont [13/16] (narrow) %v5467_v34, 32  ;;  %v4955_v34 = vadd.f32 %v4902_v48, %v9054_v10  ;;  %v5097_v10 = vadd.f32 %v5045_v47, %v4956_v54 }
 0x532   : > { %v5340_v18 = vpop.f32.mrf.mxu1 }
 0x533   : > { %v5401_v63 = vadd.f32 %v5340_v18, %v5254_v24  ;;  %v5048_v12 = vpop.f32.mrf.mxu3  ;;  %v5096_v59 = vadd.f32 %v5043_v51, %v4955_v34 }
 0x534   : > { %v4909_v24 = vpop.f32.mrf.mxu2  ;;  %v5098_v51 = vadd.f32 %v5048_v12, %v4957_v23 }
 0x535   : > { %v5436_v45 = vadd.f32 %v9152_v41, %v5401_v63  ;;  %v5211_v58 = vpop.f32.mrf.mxu0  ;;  %v5259_v13 = vadd.f32 %v5206_v14, %v5096_v59  ;;  %v4958_v14 = vadd.f32 %v4909_v24, %v9082_v44 }
 0x537   : > { %v5468_v9 = vmax.f32 %v5436_v45, 0.0 }
 0x539   : > { %5500 = vxpose.xlu0.b32.cont [14/16] (narrow) %v5468_v9, 32  ;;  %v5260_v9 = vadd.f32 %v5208_v4, %v5097_v10 }
 0x53a   : > { %v5343_v35 = vpop.f32.mrf.mxu1 }
 0x53b   : > { %v5402_v25 = vadd.f32 %v5343_v35, %v5255_v43  ;;  %v5050_v3 = vpop.f32.mrf.mxu3 }
 0x53c   : > { %v4912_v32 = vpop.f32.mrf.mxu2 }
 0x53d   : > { %6305 = vmatmul.msk.bf16.gmra.mxu1 %vm3794_vm15, %v5283_v53  ;;  %v5437_v20 = vadd.f32 %v9152_v41, %v5402_v25  ;;  %v5213_v8 = vpop.f32.mrf.mxu0  ;;  %v4959_v52 = vadd.f32 %v4912_v32, %v9087_v1 }
 0x53f   : > { %v5469_v0 = vmax.f32 %v5437_v20, 0.0  ;;  %v5261_v20 = vadd.f32 %v5211_v58, %v5098_v51 }
 0x541   : > { %5501 = vxpose.xlu0.b32.cont [15/16] (narrow) %v5469_v0, 32 }
 0x542   : > { %v5345_v26 = vpop.f32.mrf.mxu1 }
 0x543   : > { %v5403_v19 = vadd.f32 %v5345_v26, %v5256_v33  ;;  %v5053_v60 = vpop.f32.mrf.mxu3  ;;  %v5099_v33 = vadd.f32 %v5050_v3, %v4958_v14 }
 0x544   : > { %v4914_v25 = vpop.f32.mrf.mxu2  ;;  %v5100_v5 = vadd.f32 %v5053_v60, %v4959_v52 }
 0x545   : > { %v5438_v38 = vadd.f32 %v9152_v41, %v5403_v19  ;;  %v5216_v35 = vpop.f32.mrf.mxu0 }
 0x546   : > { %v5263_v21 = vadd.f32 %v5216_v35, %v5100_v5 }
 0x547   : > { %v5470_v39 = vmax.f32 %v5438_v38, 0.0  ;;  %v5262_v38 = vadd.f32 %v5213_v8, %v5099_v33 }
 0x549   : > { %5502 = vxpose.xlu0.b32.end [16/16] (narrow) %v5470_v39, 32 }
 0x54a   : > { %v5348_v7 = vpop.f32.mrf.mxu1 }
 0x54b   : > { %v5404_v31 = vadd.f32 %v5348_v7, %v5257_v16  ;;  %v5055_v40 = vpop.f32.mrf.mxu3  ;;  %v4960_v7 = vadd.f32 %v4914_v25, %v9107_v15 }
 0x54c   : > { %v4917_v47 = vpop.f32.mrf.mxu2 }
 0x54d   : > { %v5439_v28 = vadd.f32 %v9152_v41, %v5404_v31  ;;  %v5218_v26 = vpop.f32.mrf.mxu0  ;;  %v5101_v34 = vadd.f32 %v5055_v40, %v4960_v7  ;;  %v4961_v24 = vadd.f32 %v4917_v47, %v9115_v27 }
 0x54f   : > { %v5471_v62 = vmax.f32 %v5439_v28, 0.0 }
 0x551   : > { %5519 = vxpose.xlu1.b32.start [1/16] (narrow) %v5471_v62, 32 }
 0x552   : > { %v5350_v18 = vpop.f32.mrf.mxu1 }
 0x553   : > { %v5405_v49 = vadd.f32 %v5350_v18, %v5258_v61  ;;  %v5058_v6 = vpop.f32.mrf.mxu3  ;;  %v5264_v18 = vadd.f32 %v5218_v26, %v5101_v34 }
 0x554   : > { %v4919_v28 = vpop.f32.mrf.mxu2  ;;  %v5102_v15 = vadd.f32 %v5058_v6, %v4961_v24 }
 0x555   : > { %v5440_v29 = vadd.f32 %v9152_v41, %v5405_v49  ;;  %v5221_v31 = vpop.f32.mrf.mxu0 }
 0x557   : > { %v5472_v42 = vmax.f32 %v5440_v29, 0.0 }
 0x559   : > { %5520 = vxpose.xlu1.b32.cont [2/16] (narrow) %v5472_v42, 32 }
 0x55a   : > { %v5353_v63 = vpop.f32.mrf.mxu1 }
 0x55b   : > { %v5406_v45 = vadd.f32 %v5353_v63, %v5259_v13  ;;  %v5060_v61 = vpop.f32.mrf.mxu3  ;;  %v4962_v13 = vadd.f32 %v4919_v28, %v9123_v37  ;;  %v5265_v63 = vadd.f32 %v5221_v31, %v5102_v15 }
 0x55c   : > { %v4922_v42 = vpop.f32.mrf.mxu2 }
 0x55d   : > { %v5441_v48 = vadd.f32 %v9152_v41, %v5406_v45  ;;  %v5223_v59 = vpop.f32.mrf.mxu0  ;;  %v5103_v10 = vadd.f32 %v5060_v61, %v4962_v13 }
 0x55f   : > { %v5473_v36 = vmax.f32 %v5441_v48, 0.0  ;;  %v5266_v60 = vadd.f32 %v5223_v59, %v5103_v10 }
 0x561   : > { %5521 = vxpose.xlu1.b32.cont [3/16] (narrow) %v5473_v36, 32 }
 0x562   : > { %v5355_v43 = vpop.f32.mrf.mxu1 }
 0x563   : > { %v5407_v53 = vadd.f32 %v5355_v43, %v5260_v9  ;;  %v5063_v8 = vpop.f32.mrf.mxu3  ;;  %v4963_v9 = vadd.f32 %v4922_v42, %v9126_v11 }
 0x564   : > { %v4924_v36 = vpop.f32.mrf.mxu2 }
 0x565   : > { %v5442_v46 = vadd.f32 %v9152_v41, %v5407_v53  ;;  %v5226_v48 = vpop.f32.mrf.mxu0  ;;  %v5104_v35 = vadd.f32 %v5063_v8, %v4963_v9  ;;  %v4964_v14 = vadd.f32 %v4924_v36, %v9131_v30 }
 0x567   : > { %v5474_v2 = vmax.f32 %v5442_v46, 0.0 }
 0x569   : > { %5522 = vxpose.xlu1.b32.cont [4/16] (narrow) %v5474_v2, 32 }
 0x56a   : > { %v5358_v17 = vpop.f32.mrf.mxu1 }
 0x56b   : > { %v5408_v0 = vadd.f32 %v5358_v17, %v5261_v20  ;;  %v5065_v51 = vpop.f32.mrf.mxu3  ;;  %v5267_v20 = vadd.f32 %v5226_v48, %v5104_v35 }
 0x56c   : > { %v4927_v2 = vpop.f32.mrf.mxu2  ;;  %v5105_v40 = vadd.f32 %v5065_v51, %v4964_v14 }
 0x56d   : > { %v5443_v56 = vadd.f32 %v9152_v41, %v5408_v0  ;;  %v5228_v46 = vpop.f32.mrf.mxu0 }
 0x56e   : > { %v5268_v47 = vadd.f32 %v5228_v46, %v5105_v40 }
 0x56f   : > { %v5475_v19 = vmax.f32 %v5443_v56, 0.0 }
 0x571   : > { %5523 = vxpose.xlu1.b32.cont [5/16] (narrow) %v5475_v19, 32  ;;  %v4965_v19 = vadd.f32 %v4927_v2, %v9134_v22 }
 0x572   : > { %v5360_v4 = vpop.f32.mrf.mxu1 }
 0x573   : > { %v5409_v39 = vadd.f32 %v5360_v4, %v5262_v38  ;;  %v5068_v33 = vpop.f32.mrf.mxu3 }
 0x574   : > { %v4929_v52 = vpop.f32.mrf.mxu2  ;;  %v5106_v30 = vadd.f32 %v5068_v33, %v4965_v19 }
 0x575   : > { %v5444_v44 = vadd.f32 %v9152_v41, %v5409_v39  ;;  %v5231_v26 = vpop.f32.mrf.mxu0  ;;  %v4966_v6 = vadd.f32 %v4929_v52, %v9139_v55 }
 0x576   : > { %v5269_v22 = vadd.f32 %v5231_v26, %v5106_v30 }
 0x577   : > { %v5476_v16 = vmax.f32 %v5444_v44, 0.0 }
 0x579   : > { %5524 = vxpose.xlu1.b32.cont [6/16] (narrow) %v5476_v16, 32  ;;  %v5503_v16 = vpop.trf.xlu0 }
 0x57a   : > { %v5363_v12 = vpop.f32.mrf.mxu1  ;;  %5551 = vst [vmem:[%s9237_s15] sm:$0xff] %v5503_v16 }
 0x57b   : > { %v5410_v62 = vadd.f32 %v5363_v12, %v5263_v21  ;;  %v5070_v44 = vpop.f32.mrf.mxu3 }
 0x57c   : > { %v4932_v28 = vpop.f32.mrf.mxu2  ;;  %v5107_v12 = vadd.f32 %v5070_v44, %v4966_v6 }
 0x57d   : > { %v5445_v1 = vadd.f32 %v9152_v41, %v5410_v62  ;;  %v5233_v21 = vpop.f32.mrf.mxu0 }
 0x57e   : > { %v5270_v61 = vadd.f32 %v5233_v21, %v5107_v12 }
 0x57f   : > { %v5477_v58 = vmax.f32 %v5445_v1, 0.0 }
 0x581   : > { %5525 = vxpose.xlu1.b32.cont [7/16] (narrow) %v5477_v58, 32  ;;  %v4967_v58 = vadd.f32 %v4932_v28, %v9142_v57 }
 0x582   : > { %v5365_v49 = vpop.f32.mrf.mxu1 }
 0x583   : > { %v5411_v29 = vadd.f32 %v5365_v49, %v5264_v18  ;;  %v5073_v1 = vpop.f32.mrf.mxu3 }
 0x584   : > { %v5108_v49 = vadd.f32 %v5073_v1, %v4967_v58 }
 0x585   : > { %v5446_v3 = vadd.f32 %v9152_v41, %v5411_v29  ;;  %v5236_v55 = vpop.f32.mrf.mxu0  ;;  %v4934_v29 = vpop.f32.mrf.mxu2 }
 0x586   : > { %v5271_v15 = vadd.f32 %v5236_v55, %v5108_v49 }
 0x587   : > { %v5478_v54 = vmax.f32 %v5446_v3, 0.0  ;;  %v4968_v3 = vadd.f32 %v4934_v29, %v9147_v50 }
 0x589   : > { %5526 = vxpose.xlu1.b32.cont [8/16] (narrow) %v5478_v54, 32 }
 0x58a   : > { %v5368_v45 = vpop.f32.mrf.mxu1 }
 0x58b   : > { %v5412_v32 = vadd.f32 %v5368_v45, %v5265_v63  ;;  %v5075_v54 = vpop.f32.mrf.mxu3 }
 0x58c   : > { %v5109_v57 = vadd.f32 %v5075_v54, %v4968_v3 }
 0x58d   : > { %v5447_v27 = vadd.f32 %v9152_v41, %v5412_v32  ;;  %v5238_v45 = vpop.f32.mrf.mxu0 }
 0x58e   : > { %v5272_v10 = vadd.f32 %v5238_v45, %v5109_v57 }
 0x58f   : > { %v5479_v23 = vmax.f32 %v5447_v27, 0.0 }
 0x591   : > { %5527 = vxpose.xlu1.b32.cont [9/16] (narrow) %v5479_v23, 32  ;;  %v5504_v23 = vpop.trf.xlu0 }
 0x592   : > { %v5370_v43 = vpop.f32.mrf.mxu1  ;;  %5553 = vst [vmem:[%s9237_s15 + $0x10] sm:$0xff] %v5504_v23 }
 0x593   : > { %v5413_v53 = vadd.f32 %v5370_v43, %v5266_v60 }
 0x595   : > { %v5448_v37 = vadd.f32 %v9152_v41, %v5413_v53 }
 0x597   : > { %v5480_v25 = vmax.f32 %v5448_v37, 0.0 }
 0x599   : > { %5528 = vxpose.xlu1.b32.cont [10/16] (narrow) %v5480_v25, 32  ;;  %v5505_v9 = vpop.trf.xlu0 }
 0x59a   : > { %v5373_v17 = vpop.f32.mrf.mxu1  ;;  %5555 = vst [vmem:[%s9237_s15 + $0x20] sm:$0xff] %v5505_v9 }
 0x59b   : > { %v5414_v0 = vadd.f32 %v5373_v17, %v5267_v20 }
 0x59d   : > { %v5449_v11 = vadd.f32 %v9152_v41, %v5414_v0 }
 0x59f   : > { %v5481_v56 = vmax.f32 %v5449_v11, 0.0 }
 0x5a1   : > { %5529 = vxpose.xlu1.b32.cont [11/16] (narrow) %v5481_v56, 32  ;;  %v5506_v60 = vpop.trf.xlu0 }
 0x5a2   : > { %v5375_v38 = vpop.f32.mrf.mxu1  ;;  %5557 = vst [vmem:[%s9237_s15 + $0x30] sm:$0xff] %v5506_v60 }
 0x5a3   : > { %v5415_v4 = vadd.f32 %v5375_v38, %v5268_v47 }
 0x5a5   : > { %v5450_v39 = vadd.f32 %v9152_v41, %v5415_v4 }
 0x5a7   : > { %v5482_v5 = vmax.f32 %v5450_v39, 0.0 }
 0x5a9   : > { %5530 = vxpose.xlu1.b32.cont [12/16] (narrow) %v5482_v5, 32 }
 0x5aa   : > { %v5378_v7 = vpop.f32.mrf.mxu1 }
 0x5ab   : > { %v5416_v31 = vadd.f32 %v5378_v7, %v5269_v22 }
 0x5ad   : > { %v5451_v62 = vadd.f32 %v9152_v41, %v5416_v31 }
 0x5af   : > { %v5483_v34 = vmax.f32 %v5451_v62, 0.0 }
 0x5b1   : > { %5531 = vxpose.xlu1.b32.cont [13/16] (narrow) %v5483_v34, 32 }
 0x5b2   : > { %v5380_v24 = vpop.f32.mrf.mxu1 }
 0x5b3   : > { %v5417_v18 = vadd.f32 %v5380_v24, %v5270_v61 }
 0x5b5   : > { %v5452_v59 = vadd.f32 %v9152_v41, %v5417_v18 }
 0x5b7   : > { %v5484_v42 = vmax.f32 %v5452_v59, 0.0 }
 0x5b9   : > { %5532 = vxpose.xlu1.b32.cont [14/16] (narrow) %v5484_v42, 32 }
 0x5ba   : > { %v5383_v13 = vpop.f32.mrf.mxu1 }
 0x5bb   : > { %v5418_v63 = vadd.f32 %v5383_v13, %v5271_v15 }
 0x5bd   : > { %v5453_v8 = vadd.f32 %v9152_v41, %v5418_v63 }
 0x5bf   : > { %v5485_v32 = vmax.f32 %v5453_v8, 0.0 }
 0x5c1   : > { %5533 = vxpose.xlu1.b32.cont [15/16] (narrow) %v5485_v32, 32 }
 0x5c2   : > { %v5385_v48 = vpop.f32.mrf.mxu1 }
 0x5c3   : > { %v5419_v27 = vadd.f32 %v5385_v48, %v5272_v10 }
 0x5c5   : > { %v5454_v50 = vadd.f32 %v9152_v41, %v5419_v27 }
 0x5c7   : > { %v5486_v36 = vmax.f32 %v5454_v50, 0.0 }
 0x5c9   : > { %5534 = vxpose.xlu1.b32.end [16/16] (narrow) %v5486_v36, 32 }
 0x5f5   : > { %v5535_v43 = vpop.trf.xlu1 }
 0x5f6   : > { %5552 = vst [vmem:[%s9237_s15 + $0x8] sm:$0xff] %v5535_v43 }
 0x5fd   : > { %v5536_v53 = vpop.trf.xlu1 }
 0x5fe   : > { %5554 = vst [vmem:[%s9237_s15 + $0x18] sm:$0xff] %v5536_v53 }
 0x605   : > { %v5537_v51 = vpop.trf.xlu1 }
 0x606   : > { %5556 = vst [vmem:[%s9237_s15 + $0x28] sm:$0xff] %v5537_v51 }
 0x60d   : > { %v5538_v35 = vpop.trf.xlu1 }
 0x60e   : > { %5558 = vst [vmem:[%s9237_s15 + $0x38] sm:$0xff] %v5538_v35 }
 0x60f PF: > { %s17_s24 = sadd.s32 1, %s6469_s24  }
 0x610   : > { %p14_p4 = scmp.ge.s32.totalorder %s17_s24, 4  }
 0x612   :  { %16 = sbr.rel (!%p14_p4) target bundleno = 1 (0x1), region = 79 }

</bundles_post_ra>
